<compile_context>
chip_gen: v5e
topology: v5e:2x2
jax: 0.10.0
libtpu: 0.0.40
codegen_flags: <defaults>
</compile_context>

<pallas_src>
import jax
import jax.numpy as jnp
from jax import lax
from jax.experimental import pallas as pl
from jax.experimental.pallas import tpu as pltpu


# ----------------------------- module config --------------------------------
INP = 16
HID = 32
OUP = 16
K = 3
STRIDE = 1
USE_SE = True
USE_HS = True
PAD = (K - 1) // 2


def _make_divisible(v, divisor, min_value=None):
    if min_value is None:
        min_value = divisor
    new_v = max(min_value, int(v + divisor / 2) // divisor * divisor)
    if new_v < 0.9 * v:
        new_v += divisor
    return new_v


SE_DIM = _make_divisible(HID // 4, 8)
IDENTITY = (STRIDE == 1 and INP == OUP)


def _h_swish(x):
    return x * (jnp.clip(x + 3.0, 0.0, 6.0) * (1.0 / 6.0))


# ------------------------------ Pallas kernel --------------------------------
def _make_kernel(H, W):
    HW = H * W

    def kernel(x_ref, w1t_ref, b1_ref, dwt_ref, b2_ref,
               fc1w_ref, fc1b_ref, fc2wt_ref, fc2b_ref,
               w3t_ref, b3_ref, o_ref):
        BB = x_ref.shape[0]

        # ---- hoisted weight / bias loads (tiny, shared across the batch block) --
        w1t = w1t_ref[...]                                   # (HID, INP)
        w3t = w3t_ref[...]                                   # (OUP, HID)
        b1 = b1_ref[...]                                     # (HID, 1)
        b2 = b2_ref[...]                                     # (HID, 1)
        b3 = b3_ref[...]                                     # (OUP, 1)
        taps = [dwt_ref[:, t:t + 1] for t in range(K * K)]   # (HID, 1) columns

        # ---- hoisted boundary masks for the shifted depthwise taps --------------
        lane = lax.broadcasted_iota(jnp.int32, (1, HW), 1)
        if W & (W - 1) == 0:                                 # power-of-two fast path
            col = lane & (W - 1)
            row = lane >> (W.bit_length() - 1)
        else:
            col = lane % W
            row = lane // W
        masks = {}
        for t in range(K * K):
            ddy, ddx = t // K - PAD, t % K - PAD
            if ddy == 0 and ddx == 0:
                continue
            conds = []
            if ddx > 0:
                conds.append(col < (W - ddx))
            elif ddx < 0:
                conds.append(col >= (-ddx))
            if ddy > 0:
                conds.append(row < (H - ddy))
            elif ddy < 0:
                conds.append(row >= (-ddy))
            m = conds[0]
            for c in conds[1:]:
                m = m & c
            masks[t] = m                                     # (1, HW) bool

        for b in range(BB):                                  # static unroll over batch
            xb = x_ref[b]                                    # (INP, HW)

            # --- 1x1 expand conv (BN folded) + bias + h_swish -------------------
            hb = jnp.dot(w1t, xb, preferred_element_type=jnp.float32) + b1
            hb = _h_swish(hb) if USE_HS else jnp.maximum(hb, 0.0)    # (HID, HW) f32

            # --- depthwise KxK conv via masked circular lane shifts -------------
            acc = hb * taps[PAD * K + PAD]                   # centre tap: no shift
            for t in range(K * K):
                ddy, ddx = t // K - PAD, t % K - PAD
                if ddy == 0 and ddx == 0:
                    continue
                s = ddy * W + ddx
                shifted = pltpu.roll(hb, shift=(-s) % HW, axis=1)    # [p] <- hb[p+s]
                acc = acc + jnp.where(masks[t], shifted, 0.0) * taps[t]
            yb = acc + b2                                    # (HID, HW)

            # --- SE: pool -> fc1 -> ReLU -> fc2 -> h_sigmoid -> gate (VPU/XLU) --
            if USE_SE:
                pooled = jnp.sum(yb, axis=-1, keepdims=True) * (1.0 / HW)   # (HID,1)
                z = jnp.sum(fc1w_ref[...] * pooled, axis=0, keepdims=True)  # (1,SE)
                z = jnp.maximum(z + fc1b_ref[...], 0.0)
                g = jnp.sum(fc2wt_ref[...] * z, axis=-1, keepdims=True)     # (HID,1)
                g = jnp.clip(g + fc2b_ref[...] + 3.0, 0.0, 6.0) * (1.0 / 6.0)
                yb = yb * g

            # --- activation after SE (expand-branch ordering of the Sequential) --
            yb = _h_swish(yb) if USE_HS else jnp.maximum(yb, 0.0)

            # --- 1x1 projection (BN folded) + bias (+ identity residual) --------
            ob = jnp.dot(w3t, yb.astype(w3t.dtype),
                         preferred_element_type=jnp.float32) + b3           # (OUP,HW)
            if IDENTITY:
                ob = ob + xb.astype(jnp.float32)
            o_ref[b] = ob.astype(o_ref.dtype)

    return kernel


# ------------------------------ wrapper --------------------------------------
def inverted_residual_v3(x_nchw, params, batch_block=None,
                         storage_dtype=jnp.float32):
    B, C, H, W = x_nchw.shape
    assert C == INP
    assert STRIDE == 1
    HW = H * W

    # NCHW is already (C, H*W) per image: flatten spatial (free reshape, no
    # transpose) and keep H*W on the 128-lane axis.
    x = x_nchw.reshape(B, INP, HW).astype(storage_dtype)

    if batch_block is None:
        # Default: a single grid step (best on single-TC v5e/v6e and for small
        # per-step work), capped so in/out blocks + f32 temporaries stay well
        # inside v7x's 64 MiB VMEM.  Pass a smaller batch_block to split the
        # "parallel" batch axis across v7x's two TensorCores for large batches.
        itemsize = jnp.dtype(storage_dtype).itemsize
        per_img = HW * (2 * (INP + OUP) * itemsize + 6 * HID * 4)
        batch_block = max(1, min(B, (24 * 1024 * 1024) // max(per_img, 1)))
        while B % batch_block:
            batch_block -= 1
    assert B % batch_block == 0
    nb = B // batch_block

    (w1, s1, b1, dww, s2, b2, fc1w, fc1b, fc2w, fc2b, w3, s3, b3) = params
    # Fold eval-mode BN scales into the conv weights and lay everything out for
    # the channels-on-sublanes kernel (no transposes needed inside the kernel).
    kparams = (
        (w1 * s1).T.astype(storage_dtype),        # (HID, INP)   1x1 expand
        b1.reshape(HID, 1),                       # (HID, 1)
        (dww * s2).T.astype(storage_dtype),       # (HID, K*K)   depthwise taps
        b2.reshape(HID, 1),                       # (HID, 1)
        fc1w,                                     # (HID, SE_DIM)
        fc1b.reshape(1, SE_DIM),                  # (1, SE_DIM)
        fc2w.T,                                   # (HID, SE_DIM)
        fc2b.reshape(HID, 1),                     # (HID, 1)
        (w3 * s3).T.astype(storage_dtype),        # (OUP, HID)   1x1 project
        b3.reshape(OUP, 1),                       # (OUP, 1)
    )

    def full_spec(a):
        nd = a.ndim
        return pl.BlockSpec(a.shape, lambda i, _nd=nd: (0,) * _nd)

    in_specs = ([pl.BlockSpec((batch_block, INP, HW), lambda i: (i, 0, 0))]
                + [full_spec(a) for a in kparams])
    out_specs = pl.BlockSpec((batch_block, OUP, HW), lambda i: (i, 0, 0))

    out = pl.pallas_call(
        _make_kernel(H, W),
        out_shape=jax.ShapeDtypeStruct((B, OUP, HW), jnp.float32),
        grid=(nb,),
        in_specs=in_specs,
        out_specs=out_specs,
        compiler_params=pltpu.CompilerParams(
            dimension_semantics=("parallel",),
            vmem_limit_bytes=32 * 1024 * 1024),
    )(x, *kparams)

    # Lane-dense (B, OUP, H*W) slab back to NCHW with a free reshape.
    return out.reshape(B, OUP, H, W)


# ------------------------- deterministic parameters ---------------------------
def init_params(key):
    ks = jax.random.split(key, 19)
    eps = 1e-5

    def bn_fold(kg, kb, km, kv, c):
        gamma = 1.0 + 0.1 * jax.random.normal(kg, (c,), jnp.float32)
        beta = 0.1 * jax.random.normal(kb, (c,), jnp.float32)
        mean = 0.1 * jax.random.normal(km, (c,), jnp.float32)
        var = 0.5 + 0.5 * jnp.abs(jax.random.normal(kv, (c,), jnp.float32))
        scale = gamma / jnp.sqrt(var + eps)
        bias = beta - mean * scale
        return scale.reshape(1, c), bias.reshape(1, c)

    w1 = 0.1 * jax.random.normal(ks[0], (INP, HID), jnp.float32)        # 1x1 expand
    s1, b1 = bn_fold(ks[1], ks[2], ks[3], ks[4], HID)
    dww = 0.1 * jax.random.normal(ks[5], (K * K, HID), jnp.float32)     # depthwise taps
    s2, b2 = bn_fold(ks[6], ks[7], ks[8], ks[9], HID)
    fc1w = 0.1 * jax.random.normal(ks[10], (HID, SE_DIM), jnp.float32)
    fc1b = 0.1 * jax.random.normal(ks[11], (1, SE_DIM), jnp.float32)
    fc2w = 0.1 * jax.random.normal(ks[12], (SE_DIM, HID), jnp.float32)
    fc2b = 0.1 * jax.random.normal(ks[13], (1, HID), jnp.float32)
    w3 = 0.1 * jax.random.normal(ks[14], (HID, OUP), jnp.float32)       # 1x1 project
    s3, b3 = bn_fold(ks[15], ks[16], ks[17], ks[18], OUP)
    return (w1, s1, b1, dww, s2, b2, fc1w, fc1b, fc2w, fc2b, w3, s3, b3)


# ------------------------------ pure-JAX reference ----------------------------
def ref_forward(x_nchw, params):
    w1, s1, b1, dww, s2, b2, fc1w, fc1b, fc2w, fc2b, w3, s3, b3 = params

    def hsw(v):
        return v * (jnp.clip(v + 3.0, 0.0, 6.0) / 6.0)

    x = x_nchw
    w1_oihw = w1.T.reshape(HID, INP, 1, 1)
    h = lax.conv_general_dilated(x, w1_oihw, (1, 1), 'VALID',
                                 dimension_numbers=('NCHW', 'OIHW', 'NCHW'))
    h = h * s1.reshape(1, HID, 1, 1) + b1.reshape(1, HID, 1, 1)
    h = hsw(h) if USE_HS else jnp.maximum(h, 0.0)

    dw_oihw = jnp.transpose(dww.reshape(K, K, HID), (2, 0, 1)).reshape(HID, 1, K, K)
    y = lax.conv_general_dilated(h, dw_oihw, (STRIDE, STRIDE),
                                 ((PAD, PAD), (PAD, PAD)),
                                 dimension_numbers=('NCHW', 'OIHW', 'NCHW'),
                                 feature_group_count=HID)
    y = y * s2.reshape(1, HID, 1, 1) + b2.reshape(1, HID, 1, 1)

    if USE_SE:
        pooled = jnp.mean(y, axis=(2, 3))                      # (B, HID)
        z = jnp.maximum(pooled @ fc1w + fc1b, 0.0)
        g = jnp.clip(z @ fc2w + fc2b + 3.0, 0.0, 6.0) / 6.0
        y = y * g[:, :, None, None]

    y = hsw(y) if USE_HS else jnp.maximum(y, 0.0)

    w3_oihw = w3.T.reshape(OUP, HID, 1, 1)
    out = lax.conv_general_dilated(y, w3_oihw, (1, 1), 'VALID',
                                   dimension_numbers=('NCHW', 'OIHW', 'NCHW'))
    out = out * s3.reshape(1, OUP, 1, 1) + b3.reshape(1, OUP, 1, 1)
    return out + x if IDENTITY else out


# ----------------------------------- main -------------------------------------
if __name__ == "__main__":
    key = jax.random.PRNGKey(0)
    kx, kp = jax.random.split(key)
    x = jax.random.normal(kx, (2, INP, 16, 16), jnp.float32)   # NCHW, like PyTorch
    params = init_params(kp)

    out = inverted_residual_v3(x, params)
    out = jax.block_until_ready(out)

    ref = ref_forward(x, params)
    assert out.shape == ref.shape == (2, OUP, 16, 16)
    max_err = float(jnp.max(jnp.abs(out - ref)))
    assert jnp.allclose(out, ref, atol=2e-4, rtol=2e-4), f"max abs err = {max_err}"
    print("KERNEL_OK")
</pallas_src>

<mosaic_0001>
module attributes {stable_mosaic.version = 11 : i64} {
  func.func @kernel(%arg0: i32, %arg1: memref<2x16x256xf32, #tpu.memory_space<vmem>>, %arg2: memref<32x16xf32, #tpu.memory_space<vmem>>, %arg3: memref<32x1xf32, #tpu.memory_space<vmem>>, %arg4: memref<32x9xf32, #tpu.memory_space<vmem>>, %arg5: memref<32x1xf32, #tpu.memory_space<vmem>>, %arg6: memref<32x8xf32, #tpu.memory_space<vmem>>, %arg7: memref<1x8xf32, #tpu.memory_space<vmem>>, %arg8: memref<32x8xf32, #tpu.memory_space<vmem>>, %arg9: memref<32x1xf32, #tpu.memory_space<vmem>>, %arg10: memref<16x32xf32, #tpu.memory_space<vmem>>, %arg11: memref<16x1xf32, #tpu.memory_space<vmem>>, %arg12: memref<2x16x256xf32, #tpu.memory_space<vmem>>) attributes {dimension_semantics = [#tpu.dimension_semantics<parallel>], iteration_bounds = array<i64: 1>, scalar_prefetch = 0 : i64, scratch_operands = 0 : i64, tpu.core_type = #tpu.core_type<tc>, window_params = [{transform_indices = @transform_0, window_bounds = array<i64: 2, 16, 256>}, {pipeline_mode = #tpu.pipeline_mode<synchronous>, transform_indices = @transform_1, window_bounds = array<i64: 32, 16>}, {pipeline_mode = #tpu.pipeline_mode<synchronous>, transform_indices = @transform_2, window_bounds = array<i64: 32, 1>}, {pipeline_mode = #tpu.pipeline_mode<synchronous>, transform_indices = @transform_3, window_bounds = array<i64: 32, 9>}, {pipeline_mode = #tpu.pipeline_mode<synchronous>, transform_indices = @transform_4, window_bounds = array<i64: 32, 1>}, {pipeline_mode = #tpu.pipeline_mode<synchronous>, transform_indices = @transform_5, window_bounds = array<i64: 32, 8>}, {pipeline_mode = #tpu.pipeline_mode<synchronous>, transform_indices = @transform_6, window_bounds = array<i64: 1, 8>}, {pipeline_mode = #tpu.pipeline_mode<synchronous>, transform_indices = @transform_7, window_bounds = array<i64: 32, 8>}, {pipeline_mode = #tpu.pipeline_mode<synchronous>, transform_indices = @transform_8, window_bounds = array<i64: 32, 1>}, {pipeline_mode = #tpu.pipeline_mode<synchronous>, transform_indices = @transform_9, window_bounds = array<i64: 16, 32>}, {pipeline_mode = #tpu.pipeline_mode<synchronous>, transform_indices = @transform_10, window_bounds = array<i64: 16, 1>}, {transform_indices = @transform_11, window_bounds = array<i64: 2, 16, 256>}]} {
    %c0 = arith.constant 0 : index
    %c0_0 = arith.constant 0 : index
    %0 = vector.load %arg2[%c0, %c0_0] : memref<32x16xf32, #tpu.memory_space<vmem>>, vector<32x16xf32>
    %c0_1 = arith.constant 0 : index
    %c0_2 = arith.constant 0 : index
    %1 = vector.load %arg10[%c0_1, %c0_2] : memref<16x32xf32, #tpu.memory_space<vmem>>, vector<16x32xf32>
    %c0_3 = arith.constant 0 : index
    %c0_4 = arith.constant 0 : index
    %2 = vector.load %arg3[%c0_3, %c0_4] : memref<32x1xf32, #tpu.memory_space<vmem>>, vector<32x1xf32>
    %c0_5 = arith.constant 0 : index
    %c0_6 = arith.constant 0 : index
    %3 = vector.load %arg5[%c0_5, %c0_6] : memref<32x1xf32, #tpu.memory_space<vmem>>, vector<32x1xf32>
    %c0_7 = arith.constant 0 : index
    %c0_8 = arith.constant 0 : index
    %4 = vector.load %arg11[%c0_7, %c0_8] : memref<16x1xf32, #tpu.memory_space<vmem>>, vector<16x1xf32>
    %c0_9 = arith.constant 0 : index
    %c0_10 = arith.constant 0 : index
    %5 = vector.load %arg4[%c0_9, %c0_10] : memref<32x9xf32, #tpu.memory_space<vmem>>, vector<32x1xf32>
    %c0_11 = arith.constant 0 : index
    %c1 = arith.constant 1 : index
    %6 = vector.load %arg4[%c0_11, %c1] : memref<32x9xf32, #tpu.memory_space<vmem>>, vector<32x1xf32>
    %c0_12 = arith.constant 0 : index
    %c2 = arith.constant 2 : index
    %7 = vector.load %arg4[%c0_12, %c2] : memref<32x9xf32, #tpu.memory_space<vmem>>, vector<32x1xf32>
    %c0_13 = arith.constant 0 : index
    %c3 = arith.constant 3 : index
    %8 = vector.load %arg4[%c0_13, %c3] : memref<32x9xf32, #tpu.memory_space<vmem>>, vector<32x1xf32>
    %c0_14 = arith.constant 0 : index
    %c4 = arith.constant 4 : index
    %9 = vector.load %arg4[%c0_14, %c4] : memref<32x9xf32, #tpu.memory_space<vmem>>, vector<32x1xf32>
    %c0_15 = arith.constant 0 : index
    %c5 = arith.constant 5 : index
    %10 = vector.load %arg4[%c0_15, %c5] : memref<32x9xf32, #tpu.memory_space<vmem>>, vector<32x1xf32>
    %c0_16 = arith.constant 0 : index
    %c6 = arith.constant 6 : index
    %11 = vector.load %arg4[%c0_16, %c6] : memref<32x9xf32, #tpu.memory_space<vmem>>, vector<32x1xf32>
    %c0_17 = arith.constant 0 : index
    %c7 = arith.constant 7 : index
    %12 = vector.load %arg4[%c0_17, %c7] : memref<32x9xf32, #tpu.memory_space<vmem>>, vector<32x1xf32>
    %c0_18 = arith.constant 0 : index
    %c8 = arith.constant 8 : index
    %13 = vector.load %arg4[%c0_18, %c8] : memref<32x9xf32, #tpu.memory_space<vmem>>, vector<32x1xf32>
    %14 = tpu.iota {dimensions = array<i32: 1>} : vector<1x256xi32>
    %c15_i32 = arith.constant 15 : i32
    %15 = vector.broadcast %c15_i32 : i32 to vector<1x256xi32>
    %16 = arith.andi %14, %15 : vector<1x256xi32>
    %c4_i32 = arith.constant 4 : i32
    %17 = vector.broadcast %c4_i32 : i32 to vector<1x256xi32>
    %18 = arith.shrsi %14, %17 : vector<1x256xi32>
    %c1_i32 = arith.constant 1 : i32
    %19 = vector.broadcast %c1_i32 : i32 to vector<1x256xi32>
    %20 = arith.cmpi sge, %16, %19 : vector<1x256xi32>
    %c1_i32_19 = arith.constant 1 : i32
    %21 = vector.broadcast %c1_i32_19 : i32 to vector<1x256xi32>
    %22 = arith.cmpi sge, %18, %21 : vector<1x256xi32>
    %23 = arith.andi %20, %22 : vector<1x256xi1>
    %c1_i32_20 = arith.constant 1 : i32
    %24 = vector.broadcast %c1_i32_20 : i32 to vector<1x256xi32>
    %25 = arith.cmpi sge, %18, %24 : vector<1x256xi32>
    %c15_i32_21 = arith.constant 15 : i32
    %26 = vector.broadcast %c15_i32_21 : i32 to vector<1x256xi32>
    %27 = arith.cmpi slt, %16, %26 : vector<1x256xi32>
    %c1_i32_22 = arith.constant 1 : i32
    %28 = vector.broadcast %c1_i32_22 : i32 to vector<1x256xi32>
    %29 = arith.cmpi sge, %18, %28 : vector<1x256xi32>
    %30 = arith.andi %27, %29 : vector<1x256xi1>
    %c1_i32_23 = arith.constant 1 : i32
    %31 = vector.broadcast %c1_i32_23 : i32 to vector<1x256xi32>
    %32 = arith.cmpi sge, %16, %31 : vector<1x256xi32>
    %c15_i32_24 = arith.constant 15 : i32
    %33 = vector.broadcast %c15_i32_24 : i32 to vector<1x256xi32>
    %34 = arith.cmpi slt, %16, %33 : vector<1x256xi32>
    %c1_i32_25 = arith.constant 1 : i32
    %35 = vector.broadcast %c1_i32_25 : i32 to vector<1x256xi32>
    %36 = arith.cmpi sge, %16, %35 : vector<1x256xi32>
    %c15_i32_26 = arith.constant 15 : i32
    %37 = vector.broadcast %c15_i32_26 : i32 to vector<1x256xi32>
    %38 = arith.cmpi slt, %18, %37 : vector<1x256xi32>
    %39 = arith.andi %36, %38 : vector<1x256xi1>
    %c15_i32_27 = arith.constant 15 : i32
    %40 = vector.broadcast %c15_i32_27 : i32 to vector<1x256xi32>
    %41 = arith.cmpi slt, %18, %40 : vector<1x256xi32>
    %c15_i32_28 = arith.constant 15 : i32
    %42 = vector.broadcast %c15_i32_28 : i32 to vector<1x256xi32>
    %43 = arith.cmpi slt, %16, %42 : vector<1x256xi32>
    %c15_i32_29 = arith.constant 15 : i32
    %44 = vector.broadcast %c15_i32_29 : i32 to vector<1x256xi32>
    %45 = arith.cmpi slt, %18, %44 : vector<1x256xi32>
    %46 = arith.andi %43, %45 : vector<1x256xi1>
    %c0_30 = arith.constant 0 : index
    %c0_31 = arith.constant 0 : index
    %c0_32 = arith.constant 0 : index
    %47 = vector.load %arg1[%c0_30, %c0_31, %c0_32] : memref<2x16x256xf32, #tpu.memory_space<vmem>>, vector<1x16x256xf32>
    %48 = vector.shape_cast %47 : vector<1x16x256xf32> to vector<16x256xf32>
    %cst = arith.constant dense<0.000000e+00> : vector<32x256xf32>
    %49 = tpu.matmul %0, %48, %cst {dimension_numbers = #tpu.dot_dimension_numbers<[1], [0], [0], [1], [0, 0, 1, 1], [], []>} : vector<32x16xf32>, vector<16x256xf32>, vector<32x256xf32> -> vector<32x256xf32>
    %50 = vector.broadcast %2 : vector<32x1xf32> to vector<32x256xf32>
    %51 = arith.addf %49, %50 : vector<32x256xf32>
    %cst_33 = arith.constant 3.000000e+00 : f32
    %52 = vector.broadcast %cst_33 : f32 to vector<32x256xf32>
    %53 = arith.addf %51, %52 : vector<32x256xf32>
    %cst_34 = arith.constant 0.000000e+00 : f32
    %cst_35 = arith.constant 6.000000e+00 : f32
    %54 = vector.broadcast %cst_34 : f32 to vector<32x256xf32>
    %55 = arith.maximumf %54, %53 : vector<32x256xf32>
    %56 = vector.broadcast %cst_35 : f32 to vector<32x256xf32>
    %57 = arith.minimumf %56, %55 : vector<32x256xf32>
    %cst_36 = arith.constant 0.166666672 : f32
    %58 = vector.broadcast %cst_36 : f32 to vector<32x256xf32>
    %59 = arith.mulf %57, %58 : vector<32x256xf32>
    %60 = arith.mulf %51, %59 : vector<32x256xf32>
    %61 = vector.broadcast %9 : vector<32x1xf32> to vector<32x256xf32>
    %62 = arith.mulf %60, %61 : vector<32x256xf32>
    %c17_i32 = arith.constant 17 : i32
    %63 = tpu.dynamic_rotate %60 by %c17_i32 dim 1 : vector<32x256xf32>, i32 -> vector<32x256xf32>
    %cst_37 = arith.constant 0.000000e+00 : f32
    %64 = vector.shape_cast %23 : vector<1x256xi1> to vector<1x256xi1>
    %65 = vector.broadcast %64 : vector<1x256xi1> to vector<32x256xi1>
    %66 = vector.broadcast %cst_37 : f32 to vector<32x256xf32>
    %67 = arith.select %65, %63, %66 : vector<32x256xi1>, vector<32x256xf32>
    %68 = vector.broadcast %5 : vector<32x1xf32> to vector<32x256xf32>
    %69 = arith.mulf %67, %68 : vector<32x256xf32>
    %70 = arith.addf %62, %69 : vector<32x256xf32>
    %c16_i32 = arith.constant 16 : i32
    %71 = tpu.dynamic_rotate %60 by %c16_i32 dim 1 : vector<32x256xf32>, i32 -> vector<32x256xf32>
    %cst_38 = arith.constant 0.000000e+00 : f32
    %72 = vector.shape_cast %25 : vector<1x256xi1> to vector<1x256xi1>
    %73 = vector.broadcast %72 : vector<1x256xi1> to vector<32x256xi1>
    %74 = vector.broadcast %cst_38 : f32 to vector<32x256xf32>
    %75 = arith.select %73, %71, %74 : vector<32x256xi1>, vector<32x256xf32>
    %76 = vector.broadcast %6 : vector<32x1xf32> to vector<32x256xf32>
    %77 = arith.mulf %75, %76 : vector<32x256xf32>
    %78 = arith.addf %70, %77 : vector<32x256xf32>
    %c15_i32_39 = arith.constant 15 : i32
    %79 = tpu.dynamic_rotate %60 by %c15_i32_39 dim 1 : vector<32x256xf32>, i32 -> vector<32x256xf32>
    %cst_40 = arith.constant 0.000000e+00 : f32
    %80 = vector.shape_cast %30 : vector<1x256xi1> to vector<1x256xi1>
    %81 = vector.broadcast %80 : vector<1x256xi1> to vector<32x256xi1>
    %82 = vector.broadcast %cst_40 : f32 to vector<32x256xf32>
    %83 = arith.select %81, %79, %82 : vector<32x256xi1>, vector<32x256xf32>
    %84 = vector.broadcast %7 : vector<32x1xf32> to vector<32x256xf32>
    %85 = arith.mulf %83, %84 : vector<32x256xf32>
    %86 = arith.addf %78, %85 : vector<32x256xf32>
    %c1_i32_41 = arith.constant 1 : i32
    %87 = tpu.dynamic_rotate %60 by %c1_i32_41 dim 1 : vector<32x256xf32>, i32 -> vector<32x256xf32>
    %cst_42 = arith.constant 0.000000e+00 : f32
    %88 = vector.shape_cast %32 : vector<1x256xi1> to vector<1x256xi1>
    %89 = vector.broadcast %88 : vector<1x256xi1> to vector<32x256xi1>
    %90 = vector.broadcast %cst_42 : f32 to vector<32x256xf32>
    %91 = arith.select %89, %87, %90 : vector<32x256xi1>, vector<32x256xf32>
    %92 = vector.broadcast %8 : vector<32x1xf32> to vector<32x256xf32>
    %93 = arith.mulf %91, %92 : vector<32x256xf32>
    %94 = arith.addf %86, %93 : vector<32x256xf32>
    %c255_i32 = arith.constant 255 : i32
    %95 = tpu.dynamic_rotate %60 by %c255_i32 dim 1 : vector<32x256xf32>, i32 -> vector<32x256xf32>
    %cst_43 = arith.constant 0.000000e+00 : f32
    %96 = vector.shape_cast %34 : vector<1x256xi1> to vector<1x256xi1>
    %97 = vector.broadcast %96 : vector<1x256xi1> to vector<32x256xi1>
    %98 = vector.broadcast %cst_43 : f32 to vector<32x256xf32>
    %99 = arith.select %97, %95, %98 : vector<32x256xi1>, vector<32x256xf32>
    %100 = vector.broadcast %10 : vector<32x1xf32> to vector<32x256xf32>
    %101 = arith.mulf %99, %100 : vector<32x256xf32>
    %102 = arith.addf %94, %101 : vector<32x256xf32>
    %c241_i32 = arith.constant 241 : i32
    %103 = tpu.dynamic_rotate %60 by %c241_i32 dim 1 : vector<32x256xf32>, i32 -> vector<32x256xf32>
    %cst_44 = arith.constant 0.000000e+00 : f32
    %104 = vector.shape_cast %39 : vector<1x256xi1> to vector<1x256xi1>
    %105 = vector.broadcast %104 : vector<1x256xi1> to vector<32x256xi1>
    %106 = vector.broadcast %cst_44 : f32 to vector<32x256xf32>
    %107 = arith.select %105, %103, %106 : vector<32x256xi1>, vector<32x256xf32>
    %108 = vector.broadcast %11 : vector<32x1xf32> to vector<32x256xf32>
    %109 = arith.mulf %107, %108 : vector<32x256xf32>
    %110 = arith.addf %102, %109 : vector<32x256xf32>
    %c240_i32 = arith.constant 240 : i32
    %111 = tpu.dynamic_rotate %60 by %c240_i32 dim 1 : vector<32x256xf32>, i32 -> vector<32x256xf32>
    %cst_45 = arith.constant 0.000000e+00 : f32
    %112 = vector.shape_cast %41 : vector<1x256xi1> to vector<1x256xi1>
    %113 = vector.broadcast %112 : vector<1x256xi1> to vector<32x256xi1>
    %114 = vector.broadcast %cst_45 : f32 to vector<32x256xf32>
    %115 = arith.select %113, %111, %114 : vector<32x256xi1>, vector<32x256xf32>
    %116 = vector.broadcast %12 : vector<32x1xf32> to vector<32x256xf32>
    %117 = arith.mulf %115, %116 : vector<32x256xf32>
    %118 = arith.addf %110, %117 : vector<32x256xf32>
    %c239_i32 = arith.constant 239 : i32
    %119 = tpu.dynamic_rotate %60 by %c239_i32 dim 1 : vector<32x256xf32>, i32 -> vector<32x256xf32>
    %cst_46 = arith.constant 0.000000e+00 : f32
    %120 = vector.shape_cast %46 : vector<1x256xi1> to vector<1x256xi1>
    %121 = vector.broadcast %120 : vector<1x256xi1> to vector<32x256xi1>
    %122 = vector.broadcast %cst_46 : f32 to vector<32x256xf32>
    %123 = arith.select %121, %119, %122 : vector<32x256xi1>, vector<32x256xf32>
    %124 = vector.broadcast %13 : vector<32x1xf32> to vector<32x256xf32>
    %125 = arith.mulf %123, %124 : vector<32x256xf32>
    %126 = arith.addf %118, %125 : vector<32x256xf32>
    %127 = vector.broadcast %3 : vector<32x1xf32> to vector<32x256xf32>
    %128 = arith.addf %126, %127 : vector<32x256xf32>
    %cst_47 = arith.constant dense<0.000000e+00> : vector<32xf32>
    %129 = vector.multi_reduction <add>, %128, %cst_47 [1] : vector<32x256xf32> to vector<32xf32>
    %130 = vector.shape_cast %129 : vector<32xf32> to vector<32x1xf32>
    %cst_48 = arith.constant 3.906250e-03 : f32
    %131 = vector.broadcast %cst_48 : f32 to vector<32x1xf32>
    %132 = arith.mulf %130, %131 : vector<32x1xf32>
    %c0_49 = arith.constant 0 : index
    %c0_50 = arith.constant 0 : index
    %133 = vector.load %arg6[%c0_49, %c0_50] : memref<32x8xf32, #tpu.memory_space<vmem>>, vector<32x8xf32>
    %134 = vector.broadcast %132 : vector<32x1xf32> to vector<32x8xf32>
    %135 = arith.mulf %133, %134 : vector<32x8xf32>
    %cst_51 = arith.constant dense<0.000000e+00> : vector<8xf32>
    %136 = vector.multi_reduction <add>, %135, %cst_51 [0] : vector<32x8xf32> to vector<8xf32>
    %137 = vector.shape_cast %136 : vector<8xf32> to vector<1x8xf32>
    %c0_52 = arith.constant 0 : index
    %c0_53 = arith.constant 0 : index
    %138 = vector.load %arg7[%c0_52, %c0_53] : memref<1x8xf32, #tpu.memory_space<vmem>>, vector<1x8xf32>
    %139 = arith.addf %137, %138 : vector<1x8xf32>
    %cst_54 = arith.constant 0.000000e+00 : f32
    %140 = vector.broadcast %cst_54 : f32 to vector<1x8xf32>
    %141 = arith.maximumf %139, %140 : vector<1x8xf32>
    %c0_55 = arith.constant 0 : index
    %c0_56 = arith.constant 0 : index
    %142 = vector.load %arg8[%c0_55, %c0_56] : memref<32x8xf32, #tpu.memory_space<vmem>>, vector<32x8xf32>
    %143 = vector.broadcast %141 : vector<1x8xf32> to vector<32x8xf32>
    %144 = arith.mulf %142, %143 : vector<32x8xf32>
    %cst_57 = arith.constant dense<0.000000e+00> : vector<32xf32>
    %145 = vector.multi_reduction <add>, %144, %cst_57 [1] : vector<32x8xf32> to vector<32xf32>
    %146 = vector.shape_cast %145 : vector<32xf32> to vector<32x1xf32>
    %c0_58 = arith.constant 0 : index
    %c0_59 = arith.constant 0 : index
    %147 = vector.load %arg9[%c0_58, %c0_59] : memref<32x1xf32, #tpu.memory_space<vmem>>, vector<32x1xf32>
    %148 = arith.addf %146, %147 : vector<32x1xf32>
    %cst_60 = arith.constant 3.000000e+00 : f32
    %149 = vector.broadcast %cst_60 : f32 to vector<32x1xf32>
    %150 = arith.addf %148, %149 : vector<32x1xf32>
    %cst_61 = arith.constant 0.000000e+00 : f32
    %cst_62 = arith.constant 6.000000e+00 : f32
    %151 = vector.broadcast %cst_61 : f32 to vector<32x1xf32>
    %152 = arith.maximumf %151, %150 : vector<32x1xf32>
    %153 = vector.broadcast %cst_62 : f32 to vector<32x1xf32>
    %154 = arith.minimumf %153, %152 : vector<32x1xf32>
    %cst_63 = arith.constant 0.166666672 : f32
    %155 = vector.broadcast %cst_63 : f32 to vector<32x1xf32>
    %156 = arith.mulf %154, %155 : vector<32x1xf32>
    %157 = vector.broadcast %156 : vector<32x1xf32> to vector<32x256xf32>
    %158 = arith.mulf %128, %157 : vector<32x256xf32>
    %cst_64 = arith.constant 3.000000e+00 : f32
    %159 = vector.broadcast %cst_64 : f32 to vector<32x256xf32>
    %160 = arith.addf %158, %159 : vector<32x256xf32>
    %cst_65 = arith.constant 0.000000e+00 : f32
    %cst_66 = arith.constant 6.000000e+00 : f32
    %161 = vector.broadcast %cst_65 : f32 to vector<32x256xf32>
    %162 = arith.maximumf %161, %160 : vector<32x256xf32>
    %163 = vector.broadcast %cst_66 : f32 to vector<32x256xf32>
    %164 = arith.minimumf %163, %162 : vector<32x256xf32>
    %cst_67 = arith.constant 0.166666672 : f32
    %165 = vector.broadcast %cst_67 : f32 to vector<32x256xf32>
    %166 = arith.mulf %164, %165 : vector<32x256xf32>
    %167 = arith.mulf %158, %166 : vector<32x256xf32>
    %cst_68 = arith.constant dense<0.000000e+00> : vector<16x256xf32>
    %168 = tpu.matmul %1, %167, %cst_68 {dimension_numbers = #tpu.dot_dimension_numbers<[1], [0], [0], [1], [0, 0, 1, 1], [], []>} : vector<16x32xf32>, vector<32x256xf32>, vector<16x256xf32> -> vector<16x256xf32>
    %169 = vector.broadcast %4 : vector<16x1xf32> to vector<16x256xf32>
    %170 = arith.addf %168, %169 : vector<16x256xf32>
    %171 = arith.addf %170, %48 : vector<16x256xf32>
    %c0_69 = arith.constant 0 : index
    %c0_70 = arith.constant 0 : index
    %c0_71 = arith.constant 0 : index
    %172 = vector.load %arg12[%c0_69, %c0_70, %c0_71] : memref<2x16x256xf32, #tpu.memory_space<vmem>>, vector<1x16x256xf32>
    %173 = vector.shape_cast %172 : vector<1x16x256xf32> to vector<16x256xf32>
    %174 = vector.shape_cast %171 : vector<16x256xf32> to vector<1x16x256xf32>
    tpu.vector_store %arg12[%c0_69, %c0_70, %c0_71], %174 {strides = array<i32>} : memref<2x16x256xf32, #tpu.memory_space<vmem>>, vector<1x16x256xf32>,
    %c1_72 = arith.constant 1 : index
    %c0_73 = arith.constant 0 : index
    %c0_74 = arith.constant 0 : index
    %175 = vector.load %arg1[%c1_72, %c0_73, %c0_74] : memref<2x16x256xf32, #tpu.memory_space<vmem>>, vector<1x16x256xf32>
    %176 = vector.shape_cast %175 : vector<1x16x256xf32> to vector<16x256xf32>
    %cst_75 = arith.constant dense<0.000000e+00> : vector<32x256xf32>
    %177 = tpu.matmul %0, %176, %cst_75 {dimension_numbers = #tpu.dot_dimension_numbers<[1], [0], [0], [1], [0, 0, 1, 1], [], []>} : vector<32x16xf32>, vector<16x256xf32>, vector<32x256xf32> -> vector<32x256xf32>
    %178 = vector.broadcast %2 : vector<32x1xf32> to vector<32x256xf32>
    %179 = arith.addf %177, %178 : vector<32x256xf32>
    %cst_76 = arith.constant 3.000000e+00 : f32
    %180 = vector.broadcast %cst_76 : f32 to vector<32x256xf32>
    %181 = arith.addf %179, %180 : vector<32x256xf32>
    %cst_77 = arith.constant 0.000000e+00 : f32
    %cst_78 = arith.constant 6.000000e+00 : f32
    %182 = vector.broadcast %cst_77 : f32 to vector<32x256xf32>
    %183 = arith.maximumf %182, %181 : vector<32x256xf32>
    %184 = vector.broadcast %cst_78 : f32 to vector<32x256xf32>
    %185 = arith.minimumf %184, %183 : vector<32x256xf32>
    %cst_79 = arith.constant 0.166666672 : f32
    %186 = vector.broadcast %cst_79 : f32 to vector<32x256xf32>
    %187 = arith.mulf %185, %186 : vector<32x256xf32>
    %188 = arith.mulf %179, %187 : vector<32x256xf32>
    %189 = vector.broadcast %9 : vector<32x1xf32> to vector<32x256xf32>
    %190 = arith.mulf %188, %189 : vector<32x256xf32>
    %c17_i32_80 = arith.constant 17 : i32
    %191 = tpu.dynamic_rotate %188 by %c17_i32_80 dim 1 : vector<32x256xf32>, i32 -> vector<32x256xf32>
    %cst_81 = arith.constant 0.000000e+00 : f32
    %192 = vector.shape_cast %23 : vector<1x256xi1> to vector<1x256xi1>
    %193 = vector.broadcast %192 : vector<1x256xi1> to vector<32x256xi1>
    %194 = vector.broadcast %cst_81 : f32 to vector<32x256xf32>
    %195 = arith.select %193, %191, %194 : vector<32x256xi1>, vector<32x256xf32>
    %196 = vector.broadcast %5 : vector<32x1xf32> to vector<32x256xf32>
    %197 = arith.mulf %195, %196 : vector<32x256xf32>
    %198 = arith.addf %190, %197 : vector<32x256xf32>
    %c16_i32_82 = arith.constant 16 : i32
    %199 = tpu.dynamic_rotate %188 by %c16_i32_82 dim 1 : vector<32x256xf32>, i32 -> vector<32x256xf32>
    %cst_83 = arith.constant 0.000000e+00 : f32
    %200 = vector.shape_cast %25 : vector<1x256xi1> to vector<1x256xi1>
    %201 = vector.broadcast %200 : vector<1x256xi1> to vector<32x256xi1>
    %202 = vector.broadcast %cst_83 : f32 to vector<32x256xf32>
    %203 = arith.select %201, %199, %202 : vector<32x256xi1>, vector<32x256xf32>
    %204 = vector.broadcast %6 : vector<32x1xf32> to vector<32x256xf32>
    %205 = arith.mulf %203, %204 : vector<32x256xf32>
    %206 = arith.addf %198, %205 : vector<32x256xf32>
    %c15_i32_84 = arith.constant 15 : i32
    %207 = tpu.dynamic_rotate %188 by %c15_i32_84 dim 1 : vector<32x256xf32>, i32 -> vector<32x256xf32>
    %cst_85 = arith.constant 0.000000e+00 : f32
    %208 = vector.shape_cast %30 : vector<1x256xi1> to vector<1x256xi1>
    %209 = vector.broadcast %208 : vector<1x256xi1> to vector<32x256xi1>
    %210 = vector.broadcast %cst_85 : f32 to vector<32x256xf32>
    %211 = arith.select %209, %207, %210 : vector<32x256xi1>, vector<32x256xf32>
    %212 = vector.broadcast %7 : vector<32x1xf32> to vector<32x256xf32>
    %213 = arith.mulf %211, %212 : vector<32x256xf32>
    %214 = arith.addf %206, %213 : vector<32x256xf32>
    %c1_i32_86 = arith.constant 1 : i32
    %215 = tpu.dynamic_rotate %188 by %c1_i32_86 dim 1 : vector<32x256xf32>, i32 -> vector<32x256xf32>
    %cst_87 = arith.constant 0.000000e+00 : f32
    %216 = vector.shape_cast %32 : vector<1x256xi1> to vector<1x256xi1>
    %217 = vector.broadcast %216 : vector<1x256xi1> to vector<32x256xi1>
    %218 = vector.broadcast %cst_87 : f32 to vector<32x256xf32>
    %219 = arith.select %217, %215, %218 : vector<32x256xi1>, vector<32x256xf32>
    %220 = vector.broadcast %8 : vector<32x1xf32> to vector<32x256xf32>
    %221 = arith.mulf %219, %220 : vector<32x256xf32>
    %222 = arith.addf %214, %221 : vector<32x256xf32>
    %c255_i32_88 = arith.constant 255 : i32
    %223 = tpu.dynamic_rotate %188 by %c255_i32_88 dim 1 : vector<32x256xf32>, i32 -> vector<32x256xf32>
    %cst_89 = arith.constant 0.000000e+00 : f32
    %224 = vector.shape_cast %34 : vector<1x256xi1> to vector<1x256xi1>
    %225 = vector.broadcast %224 : vector<1x256xi1> to vector<32x256xi1>
    %226 = vector.broadcast %cst_89 : f32 to vector<32x256xf32>
    %227 = arith.select %225, %223, %226 : vector<32x256xi1>, vector<32x256xf32>
    %228 = vector.broadcast %10 : vector<32x1xf32> to vector<32x256xf32>
    %229 = arith.mulf %227, %228 : vector<32x256xf32>
    %230 = arith.addf %222, %229 : vector<32x256xf32>
    %c241_i32_90 = arith.constant 241 : i32
    %231 = tpu.dynamic_rotate %188 by %c241_i32_90 dim 1 : vector<32x256xf32>, i32 -> vector<32x256xf32>
    %cst_91 = arith.constant 0.000000e+00 : f32
    %232 = vector.shape_cast %39 : vector<1x256xi1> to vector<1x256xi1>
    %233 = vector.broadcast %232 : vector<1x256xi1> to vector<32x256xi1>
    %234 = vector.broadcast %cst_91 : f32 to vector<32x256xf32>
    %235 = arith.select %233, %231, %234 : vector<32x256xi1>, vector<32x256xf32>
    %236 = vector.broadcast %11 : vector<32x1xf32> to vector<32x256xf32>
    %237 = arith.mulf %235, %236 : vector<32x256xf32>
    %238 = arith.addf %230, %237 : vector<32x256xf32>
    %c240_i32_92 = arith.constant 240 : i32
    %239 = tpu.dynamic_rotate %188 by %c240_i32_92 dim 1 : vector<32x256xf32>, i32 -> vector<32x256xf32>
    %cst_93 = arith.constant 0.000000e+00 : f32
    %240 = vector.shape_cast %41 : vector<1x256xi1> to vector<1x256xi1>
    %241 = vector.broadcast %240 : vector<1x256xi1> to vector<32x256xi1>
    %242 = vector.broadcast %cst_93 : f32 to vector<32x256xf32>
    %243 = arith.select %241, %239, %242 : vector<32x256xi1>, vector<32x256xf32>
    %244 = vector.broadcast %12 : vector<32x1xf32> to vector<32x256xf32>
    %245 = arith.mulf %243, %244 : vector<32x256xf32>
    %246 = arith.addf %238, %245 : vector<32x256xf32>
    %c239_i32_94 = arith.constant 239 : i32
    %247 = tpu.dynamic_rotate %188 by %c239_i32_94 dim 1 : vector<32x256xf32>, i32 -> vector<32x256xf32>
    %cst_95 = arith.constant 0.000000e+00 : f32
    %248 = vector.shape_cast %46 : vector<1x256xi1> to vector<1x256xi1>
    %249 = vector.broadcast %248 : vector<1x256xi1> to vector<32x256xi1>
    %250 = vector.broadcast %cst_95 : f32 to vector<32x256xf32>
    %251 = arith.select %249, %247, %250 : vector<32x256xi1>, vector<32x256xf32>
    %252 = vector.broadcast %13 : vector<32x1xf32> to vector<32x256xf32>
    %253 = arith.mulf %251, %252 : vector<32x256xf32>
    %254 = arith.addf %246, %253 : vector<32x256xf32>
    %255 = vector.broadcast %3 : vector<32x1xf32> to vector<32x256xf32>
    %256 = arith.addf %254, %255 : vector<32x256xf32>
    %cst_96 = arith.constant dense<0.000000e+00> : vector<32xf32>
    %257 = vector.multi_reduction <add>, %256, %cst_96 [1] : vector<32x256xf32> to vector<32xf32>
    %258 = vector.shape_cast %257 : vector<32xf32> to vector<32x1xf32>
    %cst_97 = arith.constant 3.906250e-03 : f32
    %259 = vector.broadcast %cst_97 : f32 to vector<32x1xf32>
    %260 = arith.mulf %258, %259 : vector<32x1xf32>
    %c0_98 = arith.constant 0 : index
    %c0_99 = arith.constant 0 : index
    %261 = vector.load %arg6[%c0_98, %c0_99] : memref<32x8xf32, #tpu.memory_space<vmem>>, vector<32x8xf32>
    %262 = vector.broadcast %260 : vector<32x1xf32> to vector<32x8xf32>
    %263 = arith.mulf %261, %262 : vector<32x8xf32>
    %cst_100 = arith.constant dense<0.000000e+00> : vector<8xf32>
    %264 = vector.multi_reduction <add>, %263, %cst_100 [0] : vector<32x8xf32> to vector<8xf32>
    %265 = vector.shape_cast %264 : vector<8xf32> to vector<1x8xf32>
    %c0_101 = arith.constant 0 : index
    %c0_102 = arith.constant 0 : index
    %266 = vector.load %arg7[%c0_101, %c0_102] : memref<1x8xf32, #tpu.memory_space<vmem>>, vector<1x8xf32>
    %267 = arith.addf %265, %266 : vector<1x8xf32>
    %cst_103 = arith.constant 0.000000e+00 : f32
    %268 = vector.broadcast %cst_103 : f32 to vector<1x8xf32>
    %269 = arith.maximumf %267, %268 : vector<1x8xf32>
    %c0_104 = arith.constant 0 : index
    %c0_105 = arith.constant 0 : index
    %270 = vector.load %arg8[%c0_104, %c0_105] : memref<32x8xf32, #tpu.memory_space<vmem>>, vector<32x8xf32>
    %271 = vector.broadcast %269 : vector<1x8xf32> to vector<32x8xf32>
    %272 = arith.mulf %270, %271 : vector<32x8xf32>
    %cst_106 = arith.constant dense<0.000000e+00> : vector<32xf32>
    %273 = vector.multi_reduction <add>, %272, %cst_106 [1] : vector<32x8xf32> to vector<32xf32>
    %274 = vector.shape_cast %273 : vector<32xf32> to vector<32x1xf32>
    %c0_107 = arith.constant 0 : index
    %c0_108 = arith.constant 0 : index
    %275 = vector.load %arg9[%c0_107, %c0_108] : memref<32x1xf32, #tpu.memory_space<vmem>>, vector<32x1xf32>
    %276 = arith.addf %274, %275 : vector<32x1xf32>
    %cst_109 = arith.constant 3.000000e+00 : f32
    %277 = vector.broadcast %cst_109 : f32 to vector<32x1xf32>
    %278 = arith.addf %276, %277 : vector<32x1xf32>
    %cst_110 = arith.constant 0.000000e+00 : f32
    %cst_111 = arith.constant 6.000000e+00 : f32
    %279 = vector.broadcast %cst_110 : f32 to vector<32x1xf32>
    %280 = arith.maximumf %279, %278 : vector<32x1xf32>
    %281 = vector.broadcast %cst_111 : f32 to vector<32x1xf32>
    %282 = arith.minimumf %281, %280 : vector<32x1xf32>
    %cst_112 = arith.constant 0.166666672 : f32
    %283 = vector.broadcast %cst_112 : f32 to vector<32x1xf32>
    %284 = arith.mulf %282, %283 : vector<32x1xf32>
    %285 = vector.broadcast %284 : vector<32x1xf32> to vector<32x256xf32>
    %286 = arith.mulf %256, %285 : vector<32x256xf32>
    %cst_113 = arith.constant 3.000000e+00 : f32
    %287 = vector.broadcast %cst_113 : f32 to vector<32x256xf32>
    %288 = arith.addf %286, %287 : vector<32x256xf32>
    %cst_114 = arith.constant 0.000000e+00 : f32
    %cst_115 = arith.constant 6.000000e+00 : f32
    %289 = vector.broadcast %cst_114 : f32 to vector<32x256xf32>
    %290 = arith.maximumf %289, %288 : vector<32x256xf32>
    %291 = vector.broadcast %cst_115 : f32 to vector<32x256xf32>
    %292 = arith.minimumf %291, %290 : vector<32x256xf32>
    %cst_116 = arith.constant 0.166666672 : f32
    %293 = vector.broadcast %cst_116 : f32 to vector<32x256xf32>
    %294 = arith.mulf %292, %293 : vector<32x256xf32>
    %295 = arith.mulf %286, %294 : vector<32x256xf32>
    %cst_117 = arith.constant dense<0.000000e+00> : vector<16x256xf32>
    %296 = tpu.matmul %1, %295, %cst_117 {dimension_numbers = #tpu.dot_dimension_numbers<[1], [0], [0], [1], [0, 0, 1, 1], [], []>} : vector<16x32xf32>, vector<32x256xf32>, vector<16x256xf32> -> vector<16x256xf32>
    %297 = vector.broadcast %4 : vector<16x1xf32> to vector<16x256xf32>
    %298 = arith.addf %296, %297 : vector<16x256xf32>
    %299 = arith.addf %298, %176 : vector<16x256xf32>
    %c1_118 = arith.constant 1 : index
    %c0_119 = arith.constant 0 : index
    %c0_120 = arith.constant 0 : index
    %300 = vector.load %arg12[%c1_118, %c0_119, %c0_120] : memref<2x16x256xf32, #tpu.memory_space<vmem>>, vector<1x16x256xf32>
    %301 = vector.shape_cast %300 : vector<1x16x256xf32> to vector<16x256xf32>
    %302 = vector.shape_cast %299 : vector<16x256xf32> to vector<1x16x256xf32>
    tpu.vector_store %arg12[%c1_118, %c0_119, %c0_120], %302 {strides = array<i32>} : memref<2x16x256xf32, #tpu.memory_space<vmem>>, vector<1x16x256xf32>,
    return
  }
  func.func @transform_0(%arg0: i32) -> (i32, i32, i32) {
    %c0_i32 = arith.constant 0 : i32
    %c0_i32_0 = arith.constant 0 : i32
    %c0_i32_1 = arith.constant 0 : i32
    return %arg0, %c0_i32, %c0_i32_0 : i32, i32, i32
  }
  func.func @transform_1(%arg0: i32) -> (i32, i32) {
    %c0_i32 = arith.constant 0 : i32
    %c0_i32_0 = arith.constant 0 : i32
    %c0_i32_1 = arith.constant 0 : i32
    return %c0_i32, %c0_i32_0 : i32, i32
  }
  func.func @transform_2(%arg0: i32) -> (i32, i32) {
    %c0_i32 = arith.constant 0 : i32
    %c0_i32_0 = arith.constant 0 : i32
    %c0_i32_1 = arith.constant 0 : i32
    return %c0_i32, %c0_i32_0 : i32, i32
  }
  func.func @transform_3(%arg0: i32) -> (i32, i32) {
    %c0_i32 = arith.constant 0 : i32
    %c0_i32_0 = arith.constant 0 : i32
    %c0_i32_1 = arith.constant 0 : i32
    return %c0_i32, %c0_i32_0 : i32, i32
  }
  func.func @transform_4(%arg0: i32) -> (i32, i32) {
    %c0_i32 = arith.constant 0 : i32
    %c0_i32_0 = arith.constant 0 : i32
    %c0_i32_1 = arith.constant 0 : i32
    return %c0_i32, %c0_i32_0 : i32, i32
  }
  func.func @transform_5(%arg0: i32) -> (i32, i32) {
    %c0_i32 = arith.constant 0 : i32
    %c0_i32_0 = arith.constant 0 : i32
    %c0_i32_1 = arith.constant 0 : i32
    return %c0_i32, %c0_i32_0 : i32, i32
  }
  func.func @transform_6(%arg0: i32) -> (i32, i32) {
    %c0_i32 = arith.constant 0 : i32
    %c0_i32_0 = arith.constant 0 : i32
    %c0_i32_1 = arith.constant 0 : i32
    return %c0_i32, %c0_i32_0 : i32, i32
  }
  func.func @transform_7(%arg0: i32) -> (i32, i32) {
    %c0_i32 = arith.constant 0 : i32
    %c0_i32_0 = arith.constant 0 : i32
    %c0_i32_1 = arith.constant 0 : i32
    return %c0_i32, %c0_i32_0 : i32, i32
  }
  func.func @transform_8(%arg0: i32) -> (i32, i32) {
    %c0_i32 = arith.constant 0 : i32
    %c0_i32_0 = arith.constant 0 : i32
    %c0_i32_1 = arith.constant 0 : i32
    return %c0_i32, %c0_i32_0 : i32, i32
  }
  func.func @transform_9(%arg0: i32) -> (i32, i32) {
    %c0_i32 = arith.constant 0 : i32
    %c0_i32_0 = arith.constant 0 : i32
    %c0_i32_1 = arith.constant 0 : i32
    return %c0_i32, %c0_i32_0 : i32, i32
  }
  func.func @transform_10(%arg0: i32) -> (i32, i32) {
    %c0_i32 = arith.constant 0 : i32
    %c0_i32_0 = arith.constant 0 : i32
    %c0_i32_1 = arith.constant 0 : i32
    return %c0_i32, %c0_i32_0 : i32, i32
  }
  func.func @transform_11(%arg0: i32) -> (i32, i32, i32) {
    %c0_i32 = arith.constant 0 : i32
    %c0_i32_0 = arith.constant 0 : i32
    %c0_i32_1 = arith.constant 0 : i32
    return %arg0, %c0_i32, %c0_i32_0 : i32, i32, i32
  }
}

</mosaic_0001>

<bundles_post_ra>
// kernel: tpu_custom_call.1
= control target key start
LH: loop header
LB: loop body
LE: loop exit
PB: predicated region body
PF: predicated region fallthrough
CT: control target
= control target key end

     0   :  { %vm3848_vm0 = vcmask 130048   ;;  %v3812_v5 = vmov 0   ;;  %s3800_s0 = inlined_call_operand.vmem [shape: f32[2,16,256], index: 0, kind: input, shape index: {}]   ;;  %s3801_s1 = inlined_call_operand.vmem [shape: f32[32,16], index: 1, kind: input, shape index: {}]   ;;  %s3802_s2 = inlined_call_operand.vmem [shape: f32[32,1], index: 2, kind: input, shape index: {}]   ;;  %s3803_s3 = inlined_call_operand.vmem [shape: f32[32,9], index: 3, kind: input, shape index: {}]   ;;  %s3804_s4 = inlined_call_operand.vmem [shape: f32[32,1], index: 4, kind: input, shape index: {}]   ;;  %s3805_s5 = inlined_call_operand.vmem [shape: f32[32,8], index: 5, kind: input, shape index: {}]   ;;  %s3806_s6 = inlined_call_operand.vmem [shape: f32[1,8], index: 6, kind: input, shape index: {}]   ;;  %s3807_s7 = inlined_call_operand.vmem [shape: f32[32,8], index: 7, kind: input, shape index: {}]   ;;  %s3808_s8 = inlined_call_operand.vmem [shape: f32[32,1], index: 8, kind: input, shape index: {}]   ;;  %s3809_s9 = inlined_call_operand.vmem [shape: f32[16,32], index: 9, kind: input, shape index: {}]   ;;  %s3810_s10 = inlined_call_operand.vmem [shape: f32[16,1], index: 10, kind: input, shape index: {}]   ;;  %s3811_s11 = inlined_call_operand.hbm [shape: f32[2,16,256], index: 11, kind: output, shape index: {}]  }
   0x1   :  { %v84_v0 = vld [vmem:[%s3800_s0 + $0x10] sm:$0xff]  ;;  %v85_v1 = vld [vmem:[%s3800_s0 + $0x18] sm:$0xff]  ;;  %v82_v2 = vld [vmem:[%s3800_s0] sm:$0xff]  ;;  %1826 = vset.pattern.permute.xlu0 %v3812_v5  ;;  %1827 = vset.pattern.permute.xlu1 %v3812_v5 }
   0x2   :  { %133 = vmatpush.msra.mxu0 %v84_v0  ;;  %162 = vmatpush.msra.mxu1 %v85_v1  ;;  %v83_v3 = vld [vmem:[%s3800_s0 + $0x8] sm:$0xff]  ;;  %v39_v4 = vld [vmem:[%s3801_s1] sm:$0xff]  ;;  %v47_v7 = vld [vmem:[%s3802_s2 + $0x10] sm:$0xff] }
   0x3   :  { %v45_v6 = vld [vmem:[%s3802_s2] sm:$0xff]  ;;  %98 = vperm.xlu1 %1827, %v47_v7  }
   0x4   :  { %134 = vmatpush.msra.mxu0 %v82_v2  ;;  %163 = vmatpush.msra.mxu1 %v83_v3 }
   0x5   :  { %1779 = vmatmul.msk.f32.vlgmr.msra.gmra.mxu0 %vm3848_vm0, %v39_v4  ;;  %1783 = vmatmul.msk.f32.vlgmr.msra.gmra.mxu1 %vm3848_vm0, %v39_v4 }
   0x6   :  { %88 = vperm.xlu0 %1826, %v45_v6  }
   0x7   :  { %16 = vsyncpa [#allocation3], 0  ;;  %v2011_v8 = vld [vmem:[%s3803_s3] sm:$0xff]  ;;  %v1905_v9 = vmov 4   ;;  %v40_v10 = vld [vmem:[%s3801_s1 + $0x8] sm:$0xff]  ;;  %v1906_v15 = vmov 1  }
   0x8   :  { %1828 = vset.pattern.permute.xlu2 %v1905_v9  ;;  %v46_v11 = vld [vmem:[%s3802_s2 + $0x8] sm:$0xff]  ;;  %v48_v12 = vld [vmem:[%s3802_s2 + $0x18] sm:$0xff]  ;;  %v41_v14 = vld [vmem:[%s3801_s1 + $0x10] sm:$0xff]  ;;  %v1907_v18 = vmov 2   ;;  %v1908_v20 = vmov 3   ;;  %s1910_s29 = smov 1  }
   0x9   :  { %219 = vperm.xlu2 %1828, %v2011_v8   ;;  %v2028_v13 = vld [vmem:[%s3803_s3 + $0x8] sm:$0xff]  ;;  %v42_v16 = vld [vmem:[%s3801_s1 + $0x18] sm:$0xff]  ;;  %v2046_v17 = vld [vmem:[%s3803_s3 + $0x10] sm:$0xff]  ;;  %s1911_s30 = smov 16   ;;  %s1912_s12 = smov 15   ;;  %v1914_v7 = vmov 5  }
   0xa   :  { %v2055_v19 = vld [vmem:[%s3803_s3 + $0x18] sm:$0xff]  ;;  %s1909_s3 = smov 17   ;;  %s1913_s13 = smov 127  }
   0xb   :  { %103 = vperm.xlu1 %1827, %v48_v12   ;;  %s1915_s14 = smov 113   ;;  %s1918_s15 = smov 112  }
   0xc   :  { %s1919_s16 = smov 111   ;;  %s1921_s24 = smov [#allocation2]  }
   0xd   :  { %1780 = vmatmul.msk.f32.gmra.mxu0 %vm3848_vm0, %v40_v10  ;;  %1784 = vmatmul.msk.f32.gmra.mxu1 %vm3848_vm0, %v40_v10  ;;  %s1765_s25 = sshll.u32 %s1921_s24, 4  ;;  %s1766_s25 = int_to_ptr.vmem [resolvable:$true] %s1765_s25 }
   0xe   :  { %93 = vperm.xlu0 %1826, %v46_v11  }
  0x11   :  { %1830 = vset.pattern.permute.xlu2 %v3812_v5 }
  0x12   :  { %287 = vperm.xlu2 %1830, %v2028_v13  }
  0x13   :  { %283 = vperm.xlu1 %1827, %v2011_v8  }
  0x15   :  { %1781 = vmatmul.msk.f32.gmra.mxu0 %vm3848_vm0, %v41_v14  ;;  %1785 = vmatmul.msk.f32.gmra.mxu1 %vm3848_vm0, %v41_v14 }
  0x16   :  { %1829 = vset.pattern.permute.xlu0 %v1905_v9 }
  0x17   :  { %224 = vperm.xlu0 %1829, %v2028_v13  }
  0x1a   :  { %1834 = vset.pattern.permute.xlu2 %v1906_v15 }
  0x1b   :  { %356 = vperm.xlu2 %1834, %v2028_v13   ;;  %1831 = vset.pattern.permute.xlu1 %v1905_v9 }
  0x1c   :  { %229 = vperm.xlu1 %1831, %v2046_v17  }
  0x1d   :  { %1782 = vmatmul.msk.f32.gmra.mxu0 %vm3848_vm0, %v42_v16  ;;  %1786 = vmatmul.msk.f32.gmra.mxu1 %vm3848_vm0, %v42_v16 }
  0x1f   :  { %1839 = vset.pattern.permute.xlu0 %v1907_v18 }
  0x20   :  { %425 = vperm.xlu0 %1839, %v2028_v13  }
  0x23   :  { %1836 = vset.pattern.permute.xlu2 %v3812_v5 }
  0x24   :  { %295 = vperm.xlu2 %1836, %v2055_v19   ;;  %1832 = vset.pattern.permute.xlu1 %v3812_v5 }
  0x25   :  { %291 = vperm.xlu1 %1832, %v2046_v17  }
  0x28   :  { %1840 = vset.pattern.permute.xlu0 %v1906_v15 }
  0x29   :  { %364 = vperm.xlu0 %1840, %v2055_v19  }
  0x2c   :  { %1837 = vset.pattern.permute.xlu2 %v1906_v15 }
  0x2d   :  { %360 = vperm.xlu2 %1837, %v2046_v17   ;;  %1833 = vset.pattern.permute.xlu1 %v1906_v15 }
  0x2e   :  { %352 = vperm.xlu1 %1833, %v2011_v8  }
  0x35   :  { %1838 = vset.pattern.permute.xlu2 %v1907_v18 }
  0x36   :  { %421 = vperm.xlu2 %1838, %v2011_v8   ;;  %1835 = vset.pattern.permute.xlu1 %v1905_v9 }
  0x37   :  { %234 = vperm.xlu1 %1835, %v2055_v19  }
  0x3e   :  { %1843 = vset.pattern.permute.xlu2 %v1908_v20 }
  0x3f   :  { %494 = vperm.xlu2 %1843, %v2028_v13   ;;  %1841 = vset.pattern.permute.xlu1 %v1907_v18 }
  0x40   :  { %429 = vperm.xlu1 %1841, %v2046_v17  }
  0x47   :  { %1847 = vset.pattern.permute.xlu2 %v1914_v7 }
  0x48   :  { %1842 = vset.pattern.permute.xlu1 %v1908_v20 }
  0x49   :  { %490 = vperm.xlu1 %1842, %v2011_v8  }
  0x51   :  { %1844 = vset.pattern.permute.xlu1 %v1907_v18 }
  0x52   :  { %433 = vperm.xlu1 %1844, %v2055_v19  }
  0x5a   :  { %1845 = vset.pattern.permute.xlu1 %v1908_v20 }
  0x5b   :  { %498 = vperm.xlu1 %1845, %v2046_v17  }
  0x63   :  { %v2112_v53 = vpop.permute.xlu2 %219  ;;  %1846 = vset.pattern.permute.xlu1 %v1914_v7 }
  0x6c   :  { %v2123_v59 = vpop.permute.xlu2 %287 }
  0x6d   :  { %3923 = vst [vmem:[#allocation9_spill] sm:$0xff] %v2123_v59 }
  0x75   :  { %v2092_v43 = vpop.permute.xlu1 %98  ;;  %v2140_v2 = vpop.permute.xlu2 %356 }
  0x76   :  { %3921 = vst [vmem:[#allocation7_spill] sm:$0xff] %v2092_v43 }
  0x77   :  { %3925 = vst [vmem:[#allocation11_spill] sm:$0xff] %v2140_v2 }
  0x78   :  { %v2074_v21 = vpop.permute.xlu0 %88 }
  0x79   :  { %3919 = vst [vmem:[#allocation5_spill] sm:$0xff] %v2074_v21 }
  0x7d   :  { %v2102_v50 = vpop.permute.xlu1 %103 }
  0x7e   :  { %3922 = vst [vmem:[#allocation8_spill] sm:$0xff] %v2102_v50 }
  0x80   :  { %v2078_v32 = vpop.permute.xlu0 %93 }
  0x81   :  { %3920 = vst [vmem:[#allocation6_spill] sm:$0xff] %v2078_v32 }
  0x82   :  { %v136_v22 = vpop.f32.mrf.mxu0  ;;  %v165_v23 = vpop.f32.mrf.mxu1 }
  0x83   :  { %v137_v24 = vadd.f32 %v136_v22, %v2074_v21  ;;  %v166_v25 = vadd.f32 %v165_v23, %v2074_v21  ;;  %v2156_v22 = vpop.permute.xlu2 %295 }
  0x84   :  { %3927 = vst [vmem:[#allocation13_spill] sm:$0xff] %v2156_v22 }
  0x85   :  { %v177_v26 = vadd.f32 3.0, %v137_v24  ;;  %v178_v27 = vadd.f32 3.0, %v166_v25  ;;  %v2120_v55 = vpop.permute.xlu1 %283 }
  0x87   :  { %v185_v28 = vmax.f32 %v177_v26, 0.0  ;;  %v186_v29 = vmax.f32 %v178_v27, 0.0 }
  0x89   :  { %v193_v30 = vmin.f32 %v185_v28, 6.0  ;;  %v194_v31 = vmin.f32 %v186_v29, 6.0 }
  0x8a   :  { %v168_v33 = vpop.f32.mrf.mxu1  ;;  %v139_v40 = vpop.f32.mrf.mxu0 }
  0x8b   :  { %v201_v34 = vmul.f32 0.16666667, %v193_v30  ;;  %v202_v35 = vmul.f32 0.16666667, %v194_v31  ;;  %v169_v36 = vadd.f32 %v168_v33, %v2078_v32  ;;  %v140_v41 = vadd.f32 %v139_v40, %v2078_v32  ;;  %v2168_v29 = vpop.permute.xlu2 %360 }
  0x8c   :  { %3928 = vst [vmem:[#allocation14_spill] sm:$0xff] %v2168_v29 }
  0x8d   :  { %v2081_v37 = vmul.f32 %v201_v34, %v137_v24  ;;  %v2083_v38 = vmul.f32 %v202_v35, %v166_v25  ;;  %v180_v39 = vadd.f32 3.0, %v169_v36  ;;  %v179_v44 = vadd.f32 3.0, %v140_v41 }
  0x8e   :  { %v2132_v62 = vpop.permute.xlu1 %229 }
  0x8f   :  { %253 = vrot.lane.b32.xlu0 %v2083_v38, %s1909_s3  ;;  %452 = vrot.lane.b32.xlu1 %v2081_v37, %s1910_s29  ;;  %v188_v42 = vmax.f32 %v180_v39, 0.0  ;;  %v187_v46 = vmax.f32 %v179_v44, 0.0  ;;  %3924 = vst [vmem:[#allocation10_spill] sm:$0xff] %v2132_v62 }
  0x90   :  { %245 = vrot.lane.b32.xlu2 %v2081_v37, %s1909_s3 }
  0x91   :  { %v196_v45 = vmin.f32 %v188_v42, 6.0  ;;  %v195_v48 = vmin.f32 %v187_v46, 6.0  ;;  %v2201_v42 = vpop.permute.xlu0 %224 }
  0x92   :  { %v142_v54 = vpop.f32.mrf.mxu0  ;;  %v171_v57 = vpop.f32.mrf.mxu1  ;;  %3934 = vst [vmem:[#allocation20_spill] sm:$0xff] %v2201_v42 }
  0x93   :  { %v204_v47 = vmul.f32 0.16666667, %v196_v45  ;;  %v203_v51 = vmul.f32 0.16666667, %v195_v48  ;;  %v143_v56 = vadd.f32 %v142_v54, %v2092_v43  ;;  %v172_v61 = vadd.f32 %v171_v57, %v2092_v43 }
  0x94   :  { %v1916_v54 = vmov 6  }
  0x95   :  { %v2100_v49 = vmul.f32 %v204_v47, %v169_v36  ;;  %v2110_v52 = vmul.f32 %v203_v51, %v140_v41  ;;  %v181_v58 = vadd.f32 3.0, %v143_v56  ;;  %v182_v0 = vadd.f32 3.0, %v172_v61  ;;  %v2182_v36 = vpop.permute.xlu2 %421 }
  0x96   :  { %3930 = vst [vmem:[#allocation16_spill] sm:$0xff] %v2182_v36 }
  0x97   :  { %460 = vrot.lane.b32.xlu1 %v2083_v38, %s1910_s29  ;;  %314 = vrot.lane.b32.xlu0 %v2081_v37, %s1911_s30  ;;  %v189_v60 = vmax.f32 %v181_v58, 0.0  ;;  %v190_v4 = vmax.f32 %v182_v0, 0.0  ;;  %v2147_v11 = vpop.permute.xlu1 %291 }
  0x98   :  { %322 = vrot.lane.b32.xlu2 %v2083_v38, %s1911_s30  ;;  %3926 = vst [vmem:[#allocation12_spill] sm:$0xff] %v2147_v11 }
  0x99   :  { %v197_v63 = vmin.f32 %v189_v60, 6.0  ;;  %v198_v10 = vmin.f32 %v190_v4, 6.0  ;;  %v2212_v45 = vpop.permute.xlu0 %425  ;;  %v1917_v60 = vmov 7  }
  0x9a   :  { %v174_v1 = vpop.f32.mrf.mxu1  ;;  %v145_v14 = vpop.f32.mrf.mxu0  ;;  %3935 = vst [vmem:[#allocation21_spill] sm:$0xff] %v2212_v45  ;;  %1860 = vset.pattern.permute.xlu0 %v1917_v60 }
  0x9b   :  { %v205_v3 = vmul.f32 0.16666667, %v197_v63  ;;  %v175_v6 = vadd.f32 %v174_v1, %v2102_v50  ;;  %v206_v15 = vmul.f32 0.16666667, %v198_v10  ;;  %v146_v16 = vadd.f32 %v145_v14, %v2102_v50 }
  0x9d   :  { %v2145_v9 = vmul.f32 %v205_v3, %v143_v56  ;;  %v184_v12 = vadd.f32 3.0, %v175_v6  ;;  %v2158_v23 = vmul.f32 %v206_v15, %v172_v61  ;;  %v183_v24 = vadd.f32 3.0, %v146_v16  ;;  %v2197_v40 = vpop.permute.xlu2 %494 }
  0x9e   :  { %3932 = vst [vmem:[#allocation18_spill] sm:$0xff] %v2197_v40 }
  0x9f   :  { %255 = vrot.lane.b32.xlu1 %v2100_v49, %s1909_s3  ;;  %383 = vrot.lane.b32.xlu0 %v2081_v37, %s1912_s12  ;;  %v192_v18 = vmax.f32 %v184_v12, 0.0  ;;  %v191_v27 = vmax.f32 %v183_v24, 0.0  ;;  %v242_v59 = vmul.f32 %v2132_v62, %v2158_v23 }
  0xa0   :  { %391 = vrot.lane.b32.xlu2 %v2083_v38, %s1912_s12  ;;  %v2160_v26 = vpop.permute.xlu1 %352 }
  0xa1   :  { %v200_v25 = vmin.f32 %v192_v18, 6.0  ;;  %v199_v30 = vmin.f32 %v191_v27, 6.0  ;;  %v2228_v48 = vpop.permute.xlu0 %364 }
  0xa2   :  { %3938 = vst [vmem:[#allocation24_spill] sm:$0xff] %v2228_v48 }
  0xa3   :  { %v208_v28 = vmul.f32 0.16666667, %v200_v25  ;;  %v207_v33 = vmul.f32 0.16666667, %v199_v30  ;;  %v59_v25 = vlaneseq }
  0xa5   :  { %v2170_v31 = vmul.f32 %v208_v28, %v175_v6  ;;  %v2180_v35 = vmul.f32 %v207_v33, %v146_v16  ;;  %v2302_v27 = vand.u32 127, %v59_v25 }
  0xa7   :  { %316 = vrot.lane.b32.xlu1 %v2110_v52, %s1911_s30  ;;  %521 = vrot.lane.b32.xlu0 %v2081_v37, %s1913_s13  ;;  %v2310_v5 = vadd.s32 128, %v2302_v27  ;;  %v3826_v50 = vshra.s32 %v2302_v27, 4  ;;  %vm3851_vm5 = vcmp.lt.s32.totalorder %v2302_v27, 17  ;;  %vm3855_vm7 = vcmp.lt.s32.totalorder %v2302_v27, 16 }
  0xa8   :  { %529 = vrot.lane.b32.xlu2 %v2083_v38, %s1913_s13  ;;  %vm3857_vm11 = vcmp.lt.s32.totalorder %v2302_v27, 15  ;;  %vm3856_vm14 = vcmp.lt.s32.totalorder %v2302_v27, 1  ;;  %vm3858_vm15 = vcmp.lt.s32.totalorder %v2302_v27, 127  ;;  %vm3854_vm0 = vcmp.lt.s32.totalorder %v2302_v27, 113 }
  0xa9   :  { %v2178_v34 = vpop.permute.xlu1 %234  ;;  %3949 = vst [vmem:[#allocation35_spill] sm:$0xff] %v2310_v5  ;;  %v63_v25 = vand.u32 15, %v2310_v5  ;;  %v3829_v43 = vshra.s32 %v2310_v5, 4  ;;  %vm2328_vm2 = vcmp.ge.s32.totalorder %v3826_v50, 1 }
  0xaa   :  { %3929 = vst [vmem:[#allocation15_spill] sm:$0xff] %v2178_v34 }
  0xab   :  { %vm2333_vm3 = vcmp.ge.s32.totalorder %v63_v25, 1  ;;  %vm2339_vm4 = vcmp.ge.s32.totalorder %v3829_v43, 1  ;;  %vm2371_vm10 = vcmp.lt.s32.totalorder %v63_v25, 15 }
  0xac   :  { %vm2363_vm8 = vmand %vm2333_vm3, %vm2339_vm4 }
  0xad   :  { %vm2407_vm13 = vmand %vm2371_vm10, %vm2339_vm4 }
  0xaf   :  { %385 = vrot.lane.b32.xlu1 %v2110_v52, %s1912_s12  ;;  %324 = vrot.lane.b32.xlu0 %v2100_v49, %s1911_s30 }
  0xb0   :  { %247 = vrot.lane.b32.xlu2 %v2110_v52, %s1909_s3 }
  0xb2   :  { %v2190_v39 = vpop.permute.xlu1 %429 }
  0xb3   :  { %3931 = vst [vmem:[#allocation17_spill] sm:$0xff] %v2190_v39 }
  0xb7   :  { %523 = vrot.lane.b32.xlu1 %v2110_v52, %s1913_s13  ;;  %393 = vrot.lane.b32.xlu0 %v2100_v49, %s1912_s12 }
  0xb8   :  { %454 = vrot.lane.b32.xlu2 %v2110_v52, %s1910_s29 }
  0xbb   :  { %v2199_v41 = vpop.permute.xlu1 %490 }
  0xbc   :  { %3933 = vst [vmem:[#allocation19_spill] sm:$0xff] %v2199_v41  ;;  %v241_v41 = vmul.f32 %v2132_v62, %v2145_v9 }
  0xbf   :  { %249 = vrot.lane.b32.xlu1 %v2145_v9, %s1909_s3  ;;  %531 = vrot.lane.b32.xlu0 %v2100_v49, %s1913_s13 }
  0xc0   :  { %462 = vrot.lane.b32.xlu2 %v2100_v49, %s1910_s29 }
  0xc4   :  { %v2214_v46 = vpop.permute.xlu1 %433 }
  0xc5   :  { %3936 = vst [vmem:[#allocation22_spill] sm:$0xff] %v2214_v46 }
  0xc7   :  { %395 = vrot.lane.b32.xlu1 %v2158_v23, %s1912_s12  ;;  %326 = vrot.lane.b32.xlu0 %v2158_v23, %s1911_s30 }
  0xc8   :  { %257 = vrot.lane.b32.xlu2 %v2158_v23, %s1909_s3 }
  0xcf   :  { %328 = vrot.lane.b32.xlu1 %v2170_v31, %s1911_s30  ;;  %387 = vrot.lane.b32.xlu0 %v2145_v9, %s1912_s12 }
  0xd0   :  { %318 = vrot.lane.b32.xlu2 %v2145_v9, %s1911_s30 }
  0xd7   :  { %389 = vrot.lane.b32.xlu1 %v2180_v35, %s1912_s12  ;;  %464 = vrot.lane.b32.xlu0 %v2158_v23, %s1910_s29 }
  0xd8   :  { %456 = vrot.lane.b32.xlu2 %v2145_v9, %s1910_s29 }
  0xdf   :  { %559 = vperm.xlu1 %1846, %v2011_v8   ;;  %259 = vrot.lane.b32.xlu0 %v2170_v31, %s1909_s3 }
  0xe0   :  { %525 = vrot.lane.b32.xlu2 %v2145_v9, %s1913_s13 }
  0xe7   :  { %592 = vrot.lane.b32.xlu1 %v2110_v52, %s1915_s14  ;;  %320 = vrot.lane.b32.xlu0 %v2180_v35, %s1911_s30 }
  0xe8   :  { %251 = vrot.lane.b32.xlu2 %v2180_v35, %s1909_s3  ;;  %1848 = vset.pattern.permute.xlu1 %v1908_v20  ;;  %v2226_v20 = vpop.permute.xlu1 %498 }
  0xe9   :  { %3937 = vst [vmem:[#allocation23_spill] sm:$0xff] %v2226_v20 }
  0xea   :  { %v2210_v44 = vpop.permute.xlu2 %245 }
  0xef   :  { %502 = vperm.xlu1 %1848, %v2055_v19   ;;  %466 = vrot.lane.b32.xlu0 %v2170_v31, %s1910_s29 }
  0xf0   :  { %397 = vrot.lane.b32.xlu2 %v2170_v31, %s1912_s12 }
  0xf2   :  { %v2221_v47 = vpop.permute.xlu2 %322 }
  0xf7   :  { %1849 = vset.pattern.permute.xlu1 %v1914_v7  ;;  %533 = vrot.lane.b32.xlu0 %v2158_v23, %s1913_s13 }
  0xf8   :  { %458 = vrot.lane.b32.xlu2 %v2180_v35, %s1910_s29  ;;  %567 = vperm.xlu1 %1849, %v2046_v17  }
  0xfa   :  { %v2233_v51 = vpop.permute.xlu2 %391 }
  0xff   :  { %590 = vrot.lane.b32.xlu0 %v2081_v37, %s1915_s14 }
 0x100   :  { %563 = vperm.xlu2 %1847, %v2028_v13   ;;  %1850 = vset.pattern.permute.xlu1 %v1916_v54 }
 0x101   :  { %v2238_v56 = vpop.permute.xlu0 %253  ;;  %628 = vperm.xlu1 %1850, %v2011_v8   ;;  %v2241_v57 = vpop.permute.xlu1 %452 }
 0x102   :  { %v2243_v58 = vpop.permute.xlu2 %529 }
 0x103   :  { %3939 = vst [vmem:[#allocation25_spill] sm:$0xff] %v2243_v58 }
 0x107   :  { %600 = vrot.lane.b32.xlu0 %v2100_v49, %s1915_s14 }
 0x108   :  { %598 = vrot.lane.b32.xlu2 %v2083_v38, %s1915_s14 }
 0x109   :  { %661 = vrot.lane.b32.xlu1 %v2110_v52, %s1918_s15  ;;  %v2251_v61 = vpop.permute.xlu1 %460  ;;  %v2253_v63 = vpop.permute.xlu0 %314  ;;  %1851 = vset.pattern.permute.xlu2 %v1916_v54 }
 0x10a   :  { %v2255_v0 = vpop.permute.xlu2 %247  ;;  %1852 = vset.pattern.permute.xlu1 %v1914_v7 }
 0x10f   :  { %535 = vrot.lane.b32.xlu0 %v2170_v31, %s1913_s13 }
 0x110   :  { %527 = vrot.lane.b32.xlu2 %v2180_v35, %s1913_s13 }
 0x111   :  { %571 = vperm.xlu1 %1852, %v2055_v19   ;;  %v2263_v1 = vpop.permute.xlu1 %255  ;;  %v2265_v3 = vpop.permute.xlu0 %383 }
 0x112   :  { %v2267_v4 = vpop.permute.xlu2 %454 }
 0x113   :  { %3940 = vst [vmem:[#allocation26_spill] sm:$0xff] %v2267_v4 }
 0x117   :  { %602 = vrot.lane.b32.xlu0 %v2158_v23, %s1915_s14 }
 0x118   :  { %594 = vrot.lane.b32.xlu2 %v2145_v9, %s1915_s14 }
 0x119   :  { %1853 = vset.pattern.permute.xlu1 %v1916_v54  ;;  %v2273_v6 = vpop.permute.xlu1 %316  ;;  %v2275_v7 = vpop.permute.xlu0 %521 }
 0x11a   :  { %3941 = vst [vmem:[#allocation27_spill] sm:$0xff] %v2273_v6  ;;  %v2277_v10 = vpop.permute.xlu2 %462  ;;  %636 = vperm.xlu1 %1853, %v2046_v17  }
 0x11b   :  { %3942 = vst [vmem:[#allocation28_spill] sm:$0xff] %v2275_v7 }
 0x11c   :  { %3943 = vst [vmem:[#allocation29_spill] sm:$0xff] %v2277_v10 }
 0x11f   :  { %659 = vrot.lane.b32.xlu0 %v2081_v37, %s1918_s15 }
 0x120   :  { %632 = vperm.xlu2 %1851, %v2028_v13  }
 0x121   :  { %v2283_v12 = vpop.permute.xlu1 %385  ;;  %v2285_v14 = vpop.permute.xlu0 %324 }
 0x122   :  { %3944 = vst [vmem:[#allocation30_spill] sm:$0xff] %v2283_v12  ;;  %v258_v15 = vpop.permute.xlu2 %257  ;;  %1854 = vset.pattern.permute.xlu1 %v1917_v60 }
 0x123   :  { %3945 = vst [vmem:[#allocation31_spill] sm:$0xff] %v2285_v14  ;;  %697 = vperm.xlu1 %1854, %v2011_v8   ;;  %v1920_v14 = vmov 8  }
 0x127   :  { %669 = vrot.lane.b32.xlu0 %v2100_v49, %s1918_s15 }
 0x128   :  { %667 = vrot.lane.b32.xlu2 %v2083_v38, %s1918_s15 }
 0x129   :  { %v2292_v16 = vpop.permute.xlu1 %523  ;;  %v2294_v18 = vpop.permute.xlu0 %393  ;;  %1855 = vset.pattern.permute.xlu2 %v1917_v60 }
 0x12a   :  { %3946 = vst [vmem:[#allocation32_spill] sm:$0xff] %v2292_v16  ;;  %v319_v24 = vpop.permute.xlu2 %318 }
 0x12b   :  { %3947 = vst [vmem:[#allocation33_spill] sm:$0xff] %v2294_v18  ;;  %730 = vrot.lane.b32.xlu1 %v2110_v52, %s1919_s16 }
 0x12c   :  { %1856 = vset.pattern.permute.xlu1 %v1916_v54  ;;  %v62_v54 = vand.u32 15, %v2302_v27 }
 0x12e   :  { %vm2322_vm1 = vcmp.ge.s32.totalorder %v62_v54, 1  ;;  %vm2367_vm9 = vcmp.lt.s32.totalorder %v62_v54, 15 }
 0x12f   :  { %604 = vrot.lane.b32.xlu0 %v2170_v31, %s1915_s14  ;;  %vm2352_vm6 = vmand %vm2322_vm1, %vm2328_vm2 }
 0x130   :  { %596 = vrot.lane.b32.xlu2 %v2180_v35, %s1915_s14  ;;  %vm2395_vm12 = vmand %vm2367_vm9, %vm2328_vm2 }
 0x131   :  { %v250_v28 = vpop.permute.xlu1 %249  ;;  %v2304_v30 = vpop.permute.xlu0 %531 }
 0x132   :  { %3948 = vst [vmem:[#allocation34_spill] sm:$0xff] %v2304_v30  ;;  %v2306_v33 = vpop.permute.xlu2 %456  ;;  %v264_v50 = vsel %vm3851_vm5, %v250_v28, %v258_v15  ;;  %v268_v2 = vsel %vm3851_vm5, %v258_v15, %v250_v28  ;;  %v3962_v15 = vmov 0  ;;  %v3964_v28 = vmov 0 }
 0x133   :  { %640 = vperm.xlu1 %1856, %v2055_v19   ;;  %v3963_v15 = vsel %vm2367_vm9, 4294967295, %v3962_v15  ;;  %v3965_v28 = vsel %vm2371_vm10, 4294967295, %v3964_v28  ;;  %v278_v54 = vsel %vm2352_vm6, %v268_v2, 0.0  ;;  %v279_v58 = vsel %vm2363_vm8, %v264_v50, 0.0 }
 0x134   :  { %v303_v6 = vmul.f32 %v2147_v11, %v279_v58 }
 0x137   :  { %671 = vrot.lane.b32.xlu0 %v2158_v23, %s1918_s15 }
 0x138   :  { %663 = vrot.lane.b32.xlu2 %v2145_v9, %s1918_s15 }
 0x139   :  { %v396_v32 = vpop.permute.xlu1 %395  ;;  %v327_v21 = vpop.permute.xlu0 %326 }
 0x13a   :  { %v2320_v40 = vpop.permute.xlu2 %525  ;;  %v333_v10 = vsel %vm3855_vm7, %v319_v24, %v327_v21  ;;  %v337_v7 = vsel %vm3855_vm7, %v327_v21, %v319_v24  ;;  %v3966_v24 = vmov 0 }
 0x13b   :  { %1857 = vset.pattern.permute.xlu1 %v1917_v60  ;;  %v3967_v24 = vsel %vm2395_vm12, 4294967295, %v3966_v24  ;;  %v347_v50 = vsel %vm2328_vm2, %v337_v7, 0.0  ;;  %v348_v2 = vsel %vm2339_vm4, %v333_v10, 0.0 }
 0x13c   :  { %705 = vperm.xlu1 %1857, %v2046_v17   ;;  %v372_v58 = vmul.f32 %v2168_v29, %v348_v2 }
 0x13f   :  { %728 = vrot.lane.b32.xlu0 %v2081_v37, %s1919_s16 }
 0x140   :  { %701 = vperm.xlu2 %1855, %v2028_v13  }
 0x141   :  { %v2385_v25 = vpop.permute.xlu1 %328  ;;  %v388_v12 = vpop.permute.xlu0 %387 }
 0x142   :  { %v402_v18 = vsel %vm3857_vm11, %v388_v12, %v396_v32  ;;  %v406_v5 = vsel %vm3857_vm11, %v396_v32, %v388_v12  ;;  %v252_v21 = vpop.permute.xlu2 %251  ;;  %v3968_v32 = vmov 0  ;;  %v302_v12 = vmul.f32 %v2147_v11, %v278_v54 }
 0x143   :  { %v3969_v32 = vsel %vm2407_vm13, 4294967295, %v3968_v32  ;;  %v416_v7 = vsel %vm2395_vm12, %v406_v5, 0.0  ;;  %v417_v10 = vsel %vm2407_vm13, %v402_v18, 0.0  ;;  %v371_v54 = vmul.f32 %v2168_v29, %v347_v50 }
 0x144   :  { %1858 = vset.pattern.permute.xlu1 %v1920_v14  ;;  %v310_v11 = vadd.f32 %v302_v12, %v241_v41  ;;  %v311_v5 = vadd.f32 %v303_v6, %v242_v59  ;;  %v440_v36 = vmul.f32 %v2190_v39, %v416_v7  ;;  %v441_v18 = vmul.f32 %v2190_v39, %v417_v10 }
 0x145   :  { %766 = vperm.xlu1 %1858, %v2011_v8  }
 0x146   :  { %v379_v50 = vadd.f32 %v371_v54, %v310_v11  ;;  %v380_v42 = vadd.f32 %v372_v58, %v311_v5 }
 0x147   :  { %738 = vrot.lane.b32.xlu0 %v2100_v49, %s1919_s16 }
 0x148   :  { %736 = vrot.lane.b32.xlu2 %v2083_v38, %s1919_s16  ;;  %v448_v7 = vadd.f32 %v440_v36, %v379_v50  ;;  %v449_v10 = vadd.f32 %v441_v18, %v380_v42 }
 0x149   :  { %v390_v8 = vpop.permute.xlu1 %389  ;;  %v465_v62 = vpop.permute.xlu0 %464  ;;  %1859 = vset.pattern.permute.xlu2 %v1920_v14 }
 0x14a   :  { %v471_v2 = vsel %vm3856_vm14, %v2306_v33, %v465_v62  ;;  %v475_v59 = vsel %vm3856_vm14, %v465_v62, %v2306_v33  ;;  %v398_v41 = vpop.permute.xlu2 %397 }
 0x14b   :  { %v485_v6 = vsel %vm2322_vm1, %v475_v59, 0.0  ;;  %v486_v12 = vsel %vm2333_vm3, %v471_v2, 0.0  ;;  %v403_v14 = vsel %vm3857_vm11, %v390_v8, %v398_v41  ;;  %v407_v11 = vsel %vm3857_vm11, %v398_v41, %v390_v8 }
 0x14c   :  { %v509_v54 = vmul.f32 %v2226_v20, %v485_v6  ;;  %v510_v58 = vmul.f32 %v2226_v20, %v486_v12  ;;  %v243_v12 = vmul.f32 %v2178_v34, %v2180_v35  ;;  %v4001_v20 = vld [vmem:[#allocation11_spill] sm:$0xff] }
 0x14d   :  { %734 = vrot.lane.b32.xlu1 %v2180_v35, %s1919_s16 }
 0x14e   :  { %v2449_v62 = vadd.f32 %v509_v54, %v448_v7  ;;  %v2451_v33 = vadd.f32 %v510_v58, %v449_v10  ;;  %v244_v7 = vmul.f32 %v2178_v34, %v2170_v31  ;;  %v419_v54 = vsel %vm2407_vm13, %v403_v14, 0.0 }
 0x14f   :  { %673 = vrot.lane.b32.xlu0 %v2170_v31, %s1918_s15 }
 0x150   :  { %665 = vrot.lane.b32.xlu2 %v2180_v35, %s1918_s15 }
 0x151   :  { %v2457_v5 = vpop.permute.xlu1 %559  ;;  %v260_v36 = vpop.permute.xlu0 %259 }
 0x152   :  { %v265_v42 = vsel %vm3851_vm5, %v252_v21, %v260_v36  ;;  %v269_v18 = vsel %vm3851_vm5, %v260_v36, %v252_v21  ;;  %v459_v8 = vpop.permute.xlu2 %458  ;;  %v50_v36 = vld [vmem:[%s3804_s4 + $0x8] sm:$0xff] }
 0x153   :  { %v280_v50 = vsel %vm2352_vm6, %v269_v18, 0.0  ;;  %v281_v2 = vsel %vm2363_vm8, %v265_v42, 0.0 }
 0x154   :  { %v304_v59 = vmul.f32 %v2156_v22, %v280_v50  ;;  %v305_v41 = vmul.f32 %v2156_v22, %v281_v2  ;;  %v443_v2 = vmul.f32 %v2214_v46, %v419_v54 }
 0x155   :  { %774 = vperm.xlu1 %1858, %v2046_v17  }
 0x156   :  { %v312_v42 = vadd.f32 %v304_v59, %v243_v12 }
 0x157   :  { %740 = vrot.lane.b32.xlu0 %v2158_v23, %s1919_s16 }
 0x158   :  { %732 = vrot.lane.b32.xlu2 %v2145_v9, %s1919_s16  ;;  %v418_v9 = vsel %vm2395_vm12, %v407_v11, 0.0  ;;  %v3970_v11 = vmov 0  }
 0x159   :  { %v2474_v21 = vpop.permute.xlu1 %592  ;;  %v321_v6 = vpop.permute.xlu0 %320  ;;  %v442_v14 = vmul.f32 %v2214_v46, %v418_v9 }
 0x15a   :  { %v334_v17 = vsel %vm3855_vm7, %v321_v6, %v2385_v25  ;;  %v338_v23 = vsel %vm3855_vm7, %v2385_v25, %v321_v6  ;;  %v2486_v10 = vpop.permute.xlu2 %563  ;;  %v313_v25 = vadd.f32 %v305_v41, %v244_v7 }
 0x15b   :  { %v349_v35 = vsel %vm2328_vm2, %v338_v23, 0.0  ;;  %v350_v58 = vsel %vm2339_vm4, %v334_v17, 0.0 }
 0x15c   :  { %v373_v18 = vmul.f32 %v2228_v48, %v349_v35  ;;  %v374_v50 = vmul.f32 %v2228_v48, %v350_v58 }
 0x15d   :  { %1862 = vset.pattern.permute.xlu1 %v3970_v11 }
 0x15e   :  { %v381_v6 = vadd.f32 %v373_v18, %v312_v42  ;;  %v382_v23 = vadd.f32 %v374_v50, %v313_v25  ;;  %804 = vperm.xlu1 %1862, %v50_v36   ;;  %v49_v42 = vld [vmem:[%s3804_s4] sm:$0xff] }
 0x15f   :  { %709 = vperm.xlu0 %1860, %v2055_v19  }
 0x160   :  { %v450_v17 = vadd.f32 %v442_v14, %v381_v6  ;;  %v451_v22 = vadd.f32 %v443_v2, %v382_v23  ;;  %770 = vperm.xlu2 %1859, %v2028_v13   ;;  %v52_v13 = vld [vmem:[%s3804_s4 + $0x18] sm:$0xff] }
 0x161   :  { %v467_v59 = vpop.permute.xlu0 %466  ;;  %v2506_v41 = vpop.permute.xlu1 %502 }
 0x162   :  { %3971 = vst [vmem:[#allocation36_spill] sm:$0xff] %v2506_v41  ;;  %v472_v12 = vsel %vm3856_vm14, %v459_v8, %v467_v59  ;;  %v476_v7 = vsel %vm3856_vm14, %v467_v59, %v459_v8  ;;  %v599_v9 = vpop.permute.xlu2 %598 }
 0x163   :  { %v487_v54 = vsel %vm2322_vm1, %v476_v7, 0.0  ;;  %v488_v35 = vsel %vm2333_vm3, %v472_v12, 0.0 }
 0x164   :  { %v511_v58 = vmul.f32 %v2506_v41, %v487_v54  ;;  %v512_v36 = vmul.f32 %v2506_v41, %v488_v35 }
 0x166   :  { %v2524_v8 = vadd.f32 %v511_v58, %v450_v17  ;;  %v2526_v25 = vadd.f32 %v512_v36, %v451_v22  ;;  %814 = vperm.xlu1 %1862, %v52_v13   ;;  %v335_v13 = vsel %vm3855_vm7, %v2221_v47, %v2253_v63 }
 0x167   :  { %1861 = vset.pattern.permute.xlu0 %v3970_v11 }
 0x168   :  { %742 = vrot.lane.b32.xlu2 %v2170_v31, %s1919_s16  ;;  %799 = vperm.xlu0 %1861, %v49_v42   ;;  %v404_v42 = vsel %vm3857_vm11, %v2233_v51, %v2265_v3 }
 0x169   :  { %v534_v18 = vpop.permute.xlu0 %533 }
 0x16a   :  { %v540_v50 = vsel %vm3858_vm15, %v2320_v40, %v534_v18  ;;  %v544_v14 = vsel %vm3858_vm15, %v534_v18, %v2320_v40  ;;  %v528_v22 = vpop.permute.xlu2 %527  ;;  %v2538_v2 = vpop.permute.xlu1 %567 }
 0x16b   :  { %3972 = vst [vmem:[#allocation37_spill] sm:$0xff] %v2538_v2  ;;  %v554_v6 = vsel %vm2367_vm9, %v540_v50, 0.0  ;;  %v555_v31 = vsel %vm2371_vm10, %v544_v14, 0.0  ;;  %v343_v50 = vsel %vm2328_vm2, %v335_v13, 0.0 }
 0x16c   :  { %v578_v23 = vmul.f32 %v2538_v2, %v554_v6  ;;  %v579_v17 = vmul.f32 %v2538_v2, %v555_v31 }
 0x16e   :  { %v2547_v59 = vadd.f32 %v578_v23, %v2449_v62  ;;  %v2550_v12 = vadd.f32 %v579_v17, %v2451_v33  ;;  %v266_v33 = vsel %vm3851_vm5, %v2238_v56, %v2210_v44  ;;  %v237_v23 = vmul.f32 %v2112_v53, %v2081_v37 }
 0x16f   :  { %v274_v58 = vsel %vm2352_vm6, %v266_v33, 0.0  ;;  %v412_v17 = vsel %vm2395_vm12, %v404_v42, 0.0  ;;  %v367_v33 = vmul.f32 %v2160_v26, %v343_v50 }
 0x170   :  { %778 = vperm.xlu2 %1859, %v2055_v19   ;;  %v51_v19 = vld [vmem:[%s3804_s4 + $0x10] sm:$0xff]  ;;  %v298_v31 = vmul.f32 %v2120_v55, %v274_v58  ;;  %s1767_s4 = sshll.u32 %s3811_s11, 4  ;;  %s1922_s11 = smov 256   ;;  %s1768_s4 = int_to_ptr.hbm [resolvable:$true] %s1767_s4 }
 0x171   :  { %v591_v40 = vpop.permute.xlu0 %590 }
 0x172   :  { %v2556_v7 = vsel %vm3854_vm0, %v591_v40, %v599_v9  ;;  %v2560_v54 = vsel %vm3854_vm0, %v599_v9, %v591_v40  ;;  %v2562_v35 = vpop.permute.xlu2 %594  ;;  %v262_v9 = vsel %vm3851_vm5, %v2210_v44, %v2238_v56  ;;  %v331_v56 = vsel %vm3855_vm7, %v2253_v63, %v2221_v47 }
 0x173   :  { %v2564_v62 = vpop.permute.xlu1 %628  ;;  %v275_v6 = vsel %vm2363_vm8, %v262_v9, 0.0  ;;  %v469_v47 = vsel %vm3856_vm14, %v2241_v57, %v2251_v61  ;;  %v263_v63 = vsel %vm3851_vm5, %v2255_v0, %v2263_v1  ;;  %v473_v40 = vsel %vm3856_vm14, %v2251_v61, %v2241_v57  ;;  %v3974_v57 = vld [vmem:[#allocation20_spill] sm:$0xff] }
 0x174   :  { %v344_v37 = vsel %vm2339_vm4, %v331_v56, 0.0  ;;  %v239_v61 = vmul.f32 %v3974_v57, %v2110_v52  ;;  %v306_v9 = vadd.f32 %v298_v31, %v237_v23  ;;  %v277_v58 = vsel %vm2363_vm8, %v263_v63, 0.0  ;;  %v3976_v52 = vld [vmem:[#allocation9_spill] sm:$0xff] }
 0x178   :  { %1863 = vset.pattern.permute.xlu2 %v3970_v11 }
 0x179   :  { %809 = vperm.xlu2 %1863, %v51_v19   ;;  %v601_v36 = vpop.permute.xlu0 %600  ;;  %v400_v19 = vsel %vm3857_vm11, %v2265_v3, %v2233_v51  ;;  %v481_v51 = vsel %vm2322_vm1, %v473_v40, 0.0  ;;  %v368_v3 = vmul.f32 %v2160_v26, %v344_v37 }
 0x17a   :  { %v2591_v18 = vsel %vm3854_vm0, %v2474_v21, %v601_v36  ;;  %v2596_v11 = vsel %vm3854_vm0, %v601_v36, %v2474_v21  ;;  %v2598_v44 = vpop.permute.xlu2 %632  ;;  %v267_v21 = vsel %vm3851_vm5, %v2263_v1, %v2255_v0  ;;  %v238_v0 = vmul.f32 %v2112_v53, %v2083_v38  ;;  %v3975_v36 = vld [vmem:[#allocation16_spill] sm:$0xff] }
 0x17b   :  { %3973 = vst [vmem:[#allocation38_spill] sm:$0xff] %v2598_v44  ;;  %v2606_v14 = vpop.permute.xlu1 %661  ;;  %v299_v1 = vmul.f32 %v2120_v55, %v275_v6  ;;  %v276_v13 = vsel %vm2352_vm6, %v267_v21, 0.0  ;;  %v436_v42 = vmul.f32 %v3975_v36, %v412_v17  ;;  %v482_v38 = vsel %vm2333_vm3, %v469_v47, 0.0 }
 0x17c   :  { %v413_v56 = vsel %vm2407_vm13, %v400_v19, 0.0  ;;  %v375_v6 = vadd.f32 %v367_v33, %v306_v9  ;;  %v300_v31 = vmul.f32 %v3976_v52, %v276_v13  ;;  %v301_v47 = vmul.f32 %v3976_v52, %v277_v58 }
 0x17d   :  { %v307_v17 = vadd.f32 %v299_v1, %v238_v0  ;;  %v437_v19 = vmul.f32 %v3975_v36, %v413_v56  ;;  %v240_v0 = vmul.f32 %v3974_v57, %v2100_v49  ;;  %v3978_v1 = vld [vmem:[#allocation19_spill] sm:$0xff] }
 0x17e   :  { %v444_v13 = vadd.f32 %v436_v42, %v375_v6  ;;  %v505_v58 = vmul.f32 %v3978_v1, %v481_v51  ;;  %v308_v41 = vadd.f32 %v300_v31, %v239_v61  ;;  %v3982_v49 = vld [vmem:[#allocation31_spill] sm:$0xff] }
 0x17f   :  { %v309_v6 = vadd.f32 %v301_v47, %v240_v0  ;;  %v3989_v47 = vld [vmem:[#allocation30_spill] sm:$0xff]  ;;  %v3991_v0 = vld [vmem:[#allocation28_spill] sm:$0xff] }
 0x181   :  { %v536_v50 = vpop.permute.xlu0 %535 }
 0x182   :  { %v541_v21 = vsel %vm3858_vm15, %v528_v22, %v536_v50  ;;  %v545_v23 = vsel %vm3858_vm15, %v536_v50, %v528_v22  ;;  %v2660_v63 = vpop.permute.xlu2 %667  ;;  %v506_v50 = vmul.f32 %v3978_v1, %v482_v38  ;;  %v3984_v38 = vld [vmem:[#allocation35_spill] sm:$0xff] }
 0x183   :  { %v556_v40 = vsel %vm2367_vm9, %v541_v21, 0.0  ;;  %v557_v37 = vsel %vm2371_vm10, %v545_v23, 0.0  ;;  %v2667_v33 = vpop.permute.xlu1 %571  ;;  %v376_v21 = vadd.f32 %v368_v3, %v307_v17  ;;  %v3979_v23 = vshra.s32 %v2302_v27, 4  ;;  %v3988_v17 = vld [vmem:[#allocation33_spill] sm:$0xff] }
 0x184   :  { %3977 = vst [vmem:[#allocation20_spill] sm:$0xff] %v2667_v33  ;;  %v580_v9 = vmul.f32 %v2667_v33, %v556_v40  ;;  %v581_v22 = vmul.f32 %v2667_v33, %v557_v37  ;;  %v3983_v40 = vld [vmem:[#allocation27_spill] sm:$0xff]  ;;  %v3985_v3 = vshra.s32 %v3984_v38, 4  ;;  %v401_v37 = vsel %vm3857_vm11, %v3989_v47, %v3988_v17 }
 0x185   :  { %vm2678_vm5 = vcmp.lt.s32.totalorder %v3979_v23, 15  ;;  %v332_v51 = vsel %vm3855_vm7, %v3983_v40, %v3982_v49  ;;  %v336_v61 = vsel %vm3855_vm7, %v3982_v49, %v3983_v40  ;;  %v3994_v40 = vmov 0 }
 0x186   :  { %v2683_v42 = vadd.f32 %v580_v9, %v2524_v8  ;;  %v2686_v56 = vadd.f32 %v581_v22, %v2526_v25  ;;  %vm2698_vm0 = vcmp.lt.s32.totalorder %v3985_v3, 15  ;;  %v445_v8 = vadd.f32 %v437_v19, %v376_v21  ;;  %v3990_v22 = vld [vmem:[#allocation25_spill] sm:$0xff]  ;;  %vm2730_vm7 = vmand %vm2322_vm1, %vm2678_vm5 }
 0x187   :  { %v513_v25 = vadd.f32 %v505_v58, %v444_v13  ;;  %v405_v9 = vsel %vm3857_vm11, %v3988_v17, %v3989_v47  ;;  %v538_v23 = vsel %vm3858_vm15, %v3991_v0, %v3990_v22  ;;  %v542_v19 = vsel %vm3858_vm15, %v3990_v22, %v3991_v0  ;;  %v3992_v13 = vld [vmem:[#allocation29_spill] sm:$0xff]  ;;  %v3993_v58 = vld [vmem:[#allocation26_spill] sm:$0xff] }
 0x188   :  { %v470_v21 = vsel %vm3856_vm14, %v3993_v58, %v3992_v13  ;;  %v474_v49 = vsel %vm3856_vm14, %v3992_v13, %v3993_v58  ;;  %v3995_v40 = vsel %vm2730_vm7, 4294967295, %v3994_v40  ;;  %v345_v3 = vsel %vm2328_vm2, %v336_v61, 0.0  ;;  %vm2742_vm14 = vmand %vm2333_vm3, %vm2698_vm0 }
 0x189   :  { %v603_v38 = vpop.permute.xlu0 %602  ;;  %v346_v17 = vsel %vm2339_vm4, %v332_v51, 0.0  ;;  %v3996_v47 = vmov 0  ;;  %vm3998_vm11 = vcmp.lt.s32.totalorder %v2302_v27, 113  ;;  %v414_v51 = vsel %vm2395_vm12, %v405_v9, 0.0 }
 0x18a   :  { %v3997_v47 = vsel %vm2742_vm14, 4294967295, %v3996_v47  ;;  %v609_v22 = vsel %vm3998_vm11, %v2562_v35, %v603_v38  ;;  %vm3999_vm15 = vmmov %vm3998_vm11  ;;  %v2752_v61 = vpop.permute.xlu2 %596  ;;  %v415_v13 = vsel %vm2407_vm13, %v401_v37, 0.0  ;;  %v514_v48 = vadd.f32 %v506_v50, %v445_v8  ;;  %v4002_v8 = vld [vmem:[#allocation21_spill] sm:$0xff] }
 0x18b   :  { %v613_v0 = vsel %vm3999_vm15, %v603_v38, %v2562_v35  ;;  %v623_v58 = vsel %vm2730_vm7, %v609_v22, 0.0  ;;  %v550_v2 = vsel %vm2367_vm9, %v538_v23, 0.0  ;;  %v551_v35 = vsel %vm2371_vm10, %v542_v19, 0.0 }
 0x18c   :  { %v624_v33 = vsel %vm2742_vm14, %v613_v0, 0.0  ;;  %v483_v38 = vsel %vm2322_vm1, %v474_v49, 0.0  ;;  %v2768_v9 = vpop.permute.xlu1 %636  ;;  %v369_v37 = vmul.f32 %v4001_v20, %v345_v3  ;;  %v370_v34 = vmul.f32 %v4001_v20, %v346_v17 }
 0x18d   :  { %4000 = vst [vmem:[#allocation16_spill] sm:$0xff] %v2768_v9  ;;  %v647_v22 = vmul.f32 %v2768_v9, %v623_v58  ;;  %v648_v0 = vmul.f32 %v2768_v9, %v624_v33  ;;  %v484_v50 = vsel %vm2333_vm3, %v470_v21, 0.0  ;;  %v438_v23 = vmul.f32 %v4002_v8, %v414_v51  ;;  %v4003_v21 = vld [vmem:[#allocation34_spill] sm:$0xff]  ;;  %v4004_v51 = vld [vmem:[#allocation32_spill] sm:$0xff] }
 0x18e   :  { %v439_v19 = vmul.f32 %v4002_v8, %v415_v13  ;;  %v619_v49 = vsel %vm2730_vm7, %v2556_v7, 0.0  ;;  %v620_v3 = vsel %vm2742_vm14, %v2560_v54, 0.0  ;;  %vm4005_vm15 = vcmp.lt.s32.totalorder %v2302_v27, 127  ;;  %v4007_v9 = vld [vmem:[#allocation18_spill] sm:$0xff] }
 0x18f   :  { %v2786_v17 = vadd.f32 %v647_v22, %v2547_v59  ;;  %v2789_v33 = vadd.f32 %v648_v0, %v2550_v12  ;;  %v539_v13 = vsel %vm4005_vm15, %v4004_v51, %v4003_v21  ;;  %vm4006_vm11 = vmmov %vm4005_vm15  ;;  %v574_v58 = vmul.f32 %v2457_v5, %v550_v2 }
 0x190   :  { %v543_v7 = vsel %vm4006_vm11, %v4003_v21, %v4004_v51  ;;  %v575_v54 = vmul.f32 %v2457_v5, %v551_v35  ;;  %v507_v59 = vmul.f32 %v4007_v9, %v483_v38  ;;  %v508_v22 = vmul.f32 %v4007_v9, %v484_v50 }
 0x191   :  { %v377_v12 = vadd.f32 %v369_v37, %v308_v41  ;;  %v378_v0 = vadd.f32 %v370_v34, %v309_v6  ;;  %v660_v39 = vpop.permute.xlu0 %659  ;;  %v643_v29 = vmul.f32 %v2564_v62, %v619_v49  ;;  %v644_v8 = vmul.f32 %v2564_v62, %v620_v3 }
 0x192   :  { %vm4008_vm15 = vcmp.lt.s32.totalorder %v2302_v27, 112  ;;  %v2811_v35 = vpop.permute.xlu2 %663  ;;  %v552_v34 = vsel %vm2367_vm9, %v539_v13, 0.0  ;;  %v553_v41 = vsel %vm2371_vm10, %v543_v7, 0.0  ;;  %v582_v6 = vadd.f32 %v574_v58, %v513_v25 }
 0x193   :  { %v676_v20 = vsel %vm4008_vm15, %v660_v39, %v2660_v63  ;;  %vm4009_vm11 = vmmov %vm4008_vm15  ;;  %v446_v38 = vadd.f32 %v438_v23, %v377_v12  ;;  %v447_v21 = vadd.f32 %v439_v19, %v378_v0  ;;  %v583_v37 = vadd.f32 %v575_v54, %v514_v48 }
 0x194   :  { %v680_v2 = vsel %vm4009_vm11, %v2660_v63, %v660_v39  ;;  %v576_v50 = vmul.f32 %v2486_v10, %v552_v34  ;;  %v577_v49 = vmul.f32 %v2486_v10, %v553_v41  ;;  %v621_v39 = vsel %vm2730_vm7, %v2591_v18, 0.0  ;;  %vm4010_vm15 = vmmov %vm4009_vm11 }
 0x195   :  { %v622_v63 = vsel %vm2742_vm14, %v2596_v11, 0.0  ;;  %v688_v23 = vsel %vm2678_vm5, %v676_v20, 0.0  ;;  %v689_v19 = vsel %vm2698_vm0, %v680_v2, 0.0  ;;  %v2829_v25 = vpop.permute.xlu1 %697  ;;  %v651_v48 = vadd.f32 %v643_v29, %v582_v6 }
 0x196   :  { %v652_v3 = vadd.f32 %v644_v8, %v583_v37  ;;  %v712_v51 = vmul.f32 %v2829_v25, %v688_v23  ;;  %v713_v13 = vmul.f32 %v2829_v25, %v689_v19  ;;  %v515_v7 = vadd.f32 %v507_v59, %v446_v38 }
 0x197   :  { %v516_v18 = vadd.f32 %v508_v22, %v447_v21  ;;  %v645_v58 = vmul.f32 %v2598_v44, %v621_v39  ;;  %v646_v11 = vmul.f32 %v2598_v44, %v622_v63 }
 0x198   :  { %v2835_v54 = vadd.f32 %v712_v51, %v651_v48  ;;  %v2837_v20 = vadd.f32 %v713_v13, %v652_v3  ;;  %v584_v0 = vadd.f32 %v576_v50, %v515_v7 }
 0x199   :  { %v670_v12 = vpop.permute.xlu0 %669  ;;  %v585_v2 = vadd.f32 %v577_v49, %v516_v18 }
 0x19a   :  { %v677_v29 = vsel %vm4010_vm15, %v2606_v14, %v670_v12  ;;  %v681_v8 = vsel %vm4009_vm11, %v670_v12, %v2606_v14  ;;  %v2845_v59 = vpop.permute.xlu2 %701  ;;  %v653_v21 = vadd.f32 %v645_v58, %v584_v0  ;;  %vm4012_vm15 = vcmp.lt.s32.totalorder %v2302_v27, 113 }
 0x19b   :  { %4011 = vst [vmem:[#allocation9_spill] sm:$0xff] %v2845_v59  ;;  %v690_v22 = vsel %vm2678_vm5, %v677_v29, 0.0  ;;  %v691_v38 = vsel %vm2698_vm0, %v681_v8, 0.0  ;;  %v654_v34 = vadd.f32 %v646_v11, %v585_v2  ;;  %vm4013_vm11 = vmmov %vm4012_vm15 }
 0x19c   :  { %v714_v41 = vmul.f32 %v2845_v59, %v690_v22  ;;  %v715_v6 = vmul.f32 %v2845_v59, %v691_v38 }
 0x19d   :  { %v731_v37 = vpop.permute.xlu1 %730 }
 0x19e   :  { %v722_v50 = vadd.f32 %v714_v41, %v653_v21  ;;  %v723_v49 = vadd.f32 %v715_v6, %v654_v34  ;;  %v4016_v34 = vmov 0 }
 0x1a1   :  { %v605_v39 = vpop.permute.xlu0 %604 }
 0x1a2   :  { %v610_v14 = vsel %vm4012_vm15, %v2752_v61, %v605_v39  ;;  %v614_v63 = vsel %vm4013_vm11, %v605_v39, %v2752_v61  ;;  %v737_v23 = vpop.permute.xlu2 %736  ;;  %vm3881_vm15 = vcmp.lt.s32.totalorder %v2302_v27, 111  ;;  %vm2888_vm11 = vmand %vm2367_vm9, %vm2678_vm5 }
 0x1a3   :  { %v625_v19 = vsel %vm2730_vm7, %v610_v14, 0.0  ;;  %v626_v48 = vsel %vm2742_vm14, %v614_v63, 0.0  ;;  %v4017_v34 = vsel %vm2888_vm11, 4294967295, %v4016_v34  ;;  %vm4018_vm14 = vcmp.lt.s32.totalorder %v2302_v27, 112 }
 0x1a4   :  { %vm4019_vm7 = vmmov %vm4018_vm14 }
 0x1a5   :  { %v2863_v3 = vpop.permute.xlu1 %640 }
 0x1a6   :  { %4014 = vst [vmem:[#allocation19_spill] sm:$0xff] %v2863_v3  ;;  %v649_v51 = vmul.f32 %v2863_v3, %v625_v19  ;;  %v650_v13 = vmul.f32 %v2863_v3, %v626_v48 }
 0x1a8   :  { %v2868_v7 = vadd.f32 %v649_v51, %v2683_v42  ;;  %v2871_v18 = vadd.f32 %v650_v13, %v2686_v56 }
 0x1a9   :  { %v672_v61 = vpop.permute.xlu0 %671 }
 0x1aa   :  { %v666_v58 = vpop.permute.xlu2 %665  ;;  %v678_v41 = vsel %vm4018_vm14, %v2811_v35, %v672_v61  ;;  %v682_v6 = vsel %vm4019_vm7, %v672_v61, %v2811_v35  ;;  %vm4023_vm7 = vcmp.lt.s32.totalorder %v2302_v27, 111 }
 0x1ab   :  { %v692_v35 = vsel %vm2678_vm5, %v678_v41, 0.0  ;;  %v693_v48 = vsel %vm2698_vm0, %v682_v6, 0.0  ;;  %vm4024_vm14 = vmmov %vm4023_vm7 }
 0x1ae   :  { %v2873_v11 = vpop.permute.xlu1 %705 }
 0x1af   :  { %4015 = vst [vmem:[#allocation31_spill] sm:$0xff] %v2873_v11  ;;  %v716_v6 = vmul.f32 %v2873_v11, %v692_v35  ;;  %v717_v3 = vmul.f32 %v2873_v11, %v693_v48 }
 0x1b1   :  { %v729_v12 = vpop.permute.xlu0 %728  ;;  %v725_v35 = vadd.f32 %v717_v3, %v2789_v33 }
 0x1b2   :  { %v733_v0 = vpop.permute.xlu2 %732 }
 0x1b7   :  { %v2875_v2 = vpop.permute.xlu1 %766 }
 0x1b9   :  { %v739_v29 = vpop.permute.xlu0 %738 }
 0x1ba   :  { %v2877_v8 = vpop.permute.xlu2 %770  ;;  %v746_v42 = vsel %vm3881_vm15, %v731_v37, %v739_v29  ;;  %v750_v56 = vsel %vm3881_vm15, %v739_v29, %v731_v37  ;;  %vm2902_vm15 = vmand %vm2371_vm10, %vm2698_vm0  ;;  %v4020_v37 = vmov 0  ;;  %vm4028_vm10 = vcmp.lt.s32.totalorder %v2302_v27, 112 }
 0x1bb   :  { %v4021_v37 = vsel %vm2902_vm15, 4294967295, %v4020_v37  ;;  %v759_v14 = vsel %vm2888_vm11, %v746_v42, 0.0  ;;  %v760_v63 = vsel %vm2902_vm15, %v750_v56, 0.0  ;;  %vm4029_vm9 = vmmov %vm4028_vm10 }
 0x1bc   :  { %v783_v29 = vmul.f32 %v2877_v8, %v759_v14  ;;  %v784_v42 = vmul.f32 %v2877_v8, %v760_v63  ;;  %v745_v14 = vsel %vm4023_vm7, %v729_v12, %v737_v23 }
 0x1be   :  { %v792_v44 = vadd.f32 %v784_v42, %v723_v49 }
 0x1bf   :  { %v735_v22 = vpop.permute.xlu1 %734 }
 0x1c1   :  { %v674_v38 = vpop.permute.xlu0 %673 }
 0x1c2   :  { %v743_v21 = vpop.permute.xlu2 %742  ;;  %v679_v48 = vsel %vm4028_vm10, %v666_v58, %v674_v38  ;;  %vm4033_vm10 = vmmov %vm4023_vm7 }
 0x1c7   :  { %v2906_v39 = vpop.permute.xlu1 %774 }
 0x1c8   :  { %4022 = vst [vmem:[#allocation27_spill] sm:$0xff] %v2906_v39 }
 0x1c9   :  { %v741_v19 = vpop.permute.xlu0 %740 }
 0x1ca   :  { %v747_v51 = vsel %vm4023_vm7, %v733_v0, %v741_v19  ;;  %v751_v13 = vsel %vm4024_vm14, %v741_v19, %v733_v0  ;;  %v2920_v61 = vpop.permute.xlu2 %778  ;;  %v791_v19 = vadd.f32 %v783_v29, %v722_v50  ;;  %vm4026_vm14 = vmmov %vm4023_vm7 }
 0x1cb   :  { %4025 = vst [vmem:[#allocation35_spill] sm:$0xff] %v2920_v61  ;;  %v761_v56 = vsel %vm2888_vm11, %v747_v51, 0.0  ;;  %v762_v41 = vsel %vm2902_vm15, %v751_v13, 0.0  ;;  %v749_v63 = vsel %vm4026_vm14, %v737_v23, %v729_v12  ;;  %v724_v13 = vadd.f32 %v716_v6, %v2786_v17 }
 0x1cc   :  { %v785_v59 = vmul.f32 %v2906_v39, %v761_v56  ;;  %v786_v0 = vmul.f32 %v2906_v39, %v762_v41  ;;  %v683_v56 = vsel %vm4029_vm9, %v674_v38, %v666_v58  ;;  %v757_v17 = vsel %vm2888_vm11, %v745_v14, 0.0  ;;  %vm4032_vm9 = vmmov %vm4023_vm7 }
 0x1cd   :  { %v758_v33 = vsel %vm2902_vm15, %v749_v63, 0.0  ;;  %v694_v38 = vsel %vm2678_vm5, %v679_v48, 0.0  ;;  %v781_v41 = vmul.f32 %v2875_v2, %v757_v17  ;;  %v748_v63 = vsel %vm4032_vm9, %v735_v22, %v743_v21 }
 0x1ce   :  { %v793_v23 = vadd.f32 %v785_v59, %v724_v13  ;;  %v794_v12 = vadd.f32 %v786_v0, %v725_v35  ;;  %v782_v6 = vmul.f32 %v2875_v2, %v758_v33  ;;  %v752_v13 = vsel %vm4033_vm10, %v743_v21, %v735_v22 }
 0x1cf   :  { %v789_v35 = vadd.f32 %v781_v41, %v2835_v54  ;;  %v764_v17 = vsel %vm2902_vm15, %v752_v13, 0.0  ;;  %v841_v13 = vld [vmem:[%s3805_s5] sm:$0xff]  ;;  %vm3906_vm7 = vcmask 64512   ;;  %vm3909_vm14 = vcmask 261120  }
 0x1d0   :  { %v2936_v51 = vpop.permute.xlu1 %804  ;;  %v790_v48 = vadd.f32 %v782_v6, %v2837_v20  ;;  %v788_v22 = vmul.f32 %v2920_v61, %v764_v17  ;;  %v843_v17 = vld [vmem:[%s3805_s5 + $0x10] sm:$0xff]  ;;  %vm4035_vm9 = vcmask 130048  }
 0x1d1   :  { %4027 = vst [vmem:[#allocation33_spill] sm:$0xff] %v2936_v51  ;;  %v2944_v50 = vpop.permute.xlu0 %709  ;;  %v2947_v49 = vadd.f32 %v2936_v51, %v791_v19  ;;  %v2950_v29 = vadd.f32 %v2936_v51, %v792_v44  ;;  %v695_v44 = vsel %vm2698_vm0, %v683_v56, 0.0  ;;  %vm4036_vm10 = vmmov %vm4035_vm9 }
 0x1d2   :  { %4030 = vst [vmem:[#allocation30_spill] sm:$0xff] %v2944_v50  ;;  %v718_v0 = vmul.f32 %v2944_v50, %v694_v38  ;;  %v719_v19 = vmul.f32 %v2944_v50, %v695_v44 }
 0x1d3   :  { %v2956_v3 = vpop.permute.xlu2 %809  ;;  %v828_v58 = vadd.f32 %v2950_v29, %v2947_v49 }
 0x1d4   :  { %4031 = vst [vmem:[#allocation25_spill] sm:$0xff] %v2956_v3  ;;  %v2965_v59 = vadd.f32 %v2956_v3, %v793_v23  ;;  %v2968_v42 = vadd.f32 %v2956_v3, %v794_v12  ;;  %v726_v56 = vadd.f32 %v718_v0, %v2868_v7  ;;  %v727_v23 = vadd.f32 %v719_v19, %v2871_v18 }
 0x1d5   :  { %829 = vadd.xlane.f32.xlu0 %v828_v58  ;;  %v763_v12 = vsel %vm2888_vm11, %v748_v63, 0.0 }
 0x1d6   :  { %v831_v14 = vadd.f32 %v2968_v42, %v2965_v59  ;;  %v787_v58 = vmul.f32 %v2920_v61, %v763_v12  ;;  %v796_v21 = vadd.f32 %v788_v22, %v727_v23 }
 0x1d8   :  { %832 = vadd.xlane.f32.xlu1 %v831_v14  ;;  %v795_v18 = vadd.f32 %v787_v58, %v726_v56  ;;  %v3000_v38 = vpop.permute.xlu1 %814  ;;  %v842_v14 = vld [vmem:[%s3805_s5 + $0x8] sm:$0xff] }
 0x1d9   :  { %4034 = vst [vmem:[#allocation28_spill] sm:$0xff] %v3000_v38  ;;  %v3006_v41 = vadd.f32 %v3000_v38, %v796_v21  ;;  %v844_v21 = vld [vmem:[%s3805_s5 + $0x18] sm:$0xff] }
 0x1da   :  { %v2988_v33 = vpop.permute.xlu0 %799  ;;  %v3003_v44 = vadd.f32 %v3000_v38, %v795_v18 }
 0x1db   :  { %v2993_v54 = vadd.f32 %v2988_v33, %v789_v35  ;;  %v2996_v20 = vadd.f32 %v2988_v33, %v790_v48 }
 0x1dc   :  { %v834_v6 = vadd.f32 %v3006_v41, %v3003_v44 }
 0x1dd   :  { %v825_v7 = vadd.f32 %v2996_v20, %v2993_v54 }
 0x1df   :  { %826 = vadd.xlane.f32.xlu2 %v825_v7 }
 0x1e7   :  { %835 = vadd.xlane.f32.xlu2 %v834_v6 }
 0x248   :  { %v830_v0 = vpop.xlane.xlu0 %829 }
 0x249   :  { %v838_v19 = vmul.f32 0.00390625, %v830_v0 }
 0x24b   :  { %v833_v63 = vpop.xlane.xlu1 %832  ;;  %v846_v56 = vmul.f32 %v842_v14, %v838_v19 }
 0x24c   :  { %v839_v23 = vmul.f32 0.00390625, %v833_v63 }
 0x24d   :  { %v851_v22 = vsel %vm3906_vm7, %v846_v56, 0.0 }
 0x24e   :  { %v847_v7 = vmul.f32 %v843_v17, %v839_v23  ;;  %v863_v23 = vld [vmem:[%s3806_s6] sm:$0x1] }
 0x250   :  { %v853_v19 = vsel %vm3906_vm7, %v847_v7, 0.0  ;;  %v869_v7 = vld [vmem:[%s3807_s7 + $0x18] sm:$0xff] }
 0x252   :  { %v827_v35 = vpop.xlane.xlu2 %826 }
 0x253   :  { %v837_v48 = vmul.f32 0.00390625, %v827_v35 }
 0x255   :  { %v845_v12 = vmul.f32 %v841_v13, %v837_v48 }
 0x257   :  { %v850_v58 = vsel %vm3906_vm7, %v845_v12, 0.0 }
 0x258   :  { %v852_v18 = vadd.f32 %v851_v22, %v850_v58 }
 0x25a   :  { %v836_v6 = vpop.xlane.xlu2 %835  ;;  %v854_v63 = vadd.f32 %v853_v19, %v852_v18  ;;  %v868_v18 = vld [vmem:[%s3807_s7 + $0x10] sm:$0xff] }
 0x25b   :  { %v840_v0 = vmul.f32 0.00390625, %v836_v6 }
 0x25d   :  { %v848_v14 = vmul.f32 %v844_v21, %v840_v0 }
 0x25f   :  { %v855_v13 = vsel %vm3906_vm7, %v848_v14, 0.0 }
 0x260   :  { %v856_v35 = vadd.f32 %v855_v13, %v854_v63  ;;  %v866_v13 = vld [vmem:[%s3807_s7] sm:$0xff] }
 0x262   :  { %v857_v48 = vrot.slane %v856_v35, 4 }
 0x264   :  { %v858_v38 = vadd.f32 %v857_v48, %v856_v35 }
 0x266   :  { %v859_v12 = vrot.slane %v858_v38, 2 }
 0x268   :  { %v860_v61 = vadd.f32 %v859_v12, %v858_v38  ;;  %v867_v38 = vld [vmem:[%s3807_s7 + $0x8] sm:$0xff]  ;;  %v890_v12 = vld [vmem:[%s3808_s8 + $0x18] sm:$0xff] }
 0x26a   :  { %v861_v56 = vrot.slane %v860_v61, 1 }
 0x26c   :  { %v862_v17 = vadd.f32 %v861_v56, %v860_v61  ;;  %v889_v56 = vld [vmem:[%s3808_s8 + $0x10] sm:$0xff] }
 0x26e   :  { %v864_v58 = vadd.f32 %v863_v23, %v862_v17  ;;  %v888_v23 = vld [vmem:[%s3808_s8 + $0x8] sm:$0xff] }
 0x270   :  { %v865_v22 = vmax.f32 %v864_v58, 0.0 }
 0x272   :  { %v870_v21 = vperm.slane %v865_v22, 0 }
 0x274   :  { %v874_v6 = vmul.f32 %v870_v21, %v869_v7  ;;  %v873_v0 = vmul.f32 %v870_v21, %v868_v18  ;;  %v872_v19 = vmul.f32 %v870_v21, %v867_v38  ;;  %v871_v35 = vmul.f32 %v870_v21, %v866_v13 }
 0x276   :  { %v884_v61 = vsel %vm3906_vm7, %v874_v6, 0.0  ;;  %v881_v14 = vsel %vm3906_vm7, %v873_v0, 0.0  ;;  %v878_v63 = vsel %vm3906_vm7, %v872_v19, 0.0  ;;  %v875_v48 = vsel %vm3906_vm7, %v871_v35, 0.0  ;;  %vm4037_vm7 = vmmov %vm4035_vm9 }
 0x277   :  { %885 = vadd.xlane.f32.xlu2 %v884_v61  ;;  %882 = vadd.xlane.f32.xlu0 %v881_v14  ;;  %vm4038_vm15 = vmmov %vm4037_vm7 }
 0x278   :  { %879 = vadd.xlane.f32.xlu1 %v878_v63  ;;  %v887_v63 = vld [vmem:[%s3808_s8] sm:$0xff]  ;;  %vm4040_vm11 = vmmov %vm4037_vm7 }
 0x27f   :  { %876 = vadd.xlane.f32.xlu2 %v875_v48 }
 0x2ea   :  { %v886_v17 = vpop.xlane.xlu2 %885  ;;  %v883_v58 = vpop.xlane.xlu0 %882 }
 0x2eb   :  { %v894_v22 = vadd.f32 %v890_v12, %v886_v17  ;;  %v893_v7 = vadd.f32 %v889_v56, %v883_v58  ;;  %v880_v18 = vpop.xlane.xlu1 %879 }
 0x2ec   :  { %v892_v38 = vadd.f32 %v888_v23, %v880_v18 }
 0x2ed   :  { %v898_v21 = vadd.f32 3.0, %v894_v22  ;;  %v897_v6 = vadd.f32 3.0, %v893_v7 }
 0x2ee   :  { %v896_v0 = vadd.f32 3.0, %v892_v38 }
 0x2ef   :  { %v902_v19 = vmax.f32 %v898_v21, 0.0  ;;  %v901_v61 = vmax.f32 %v897_v6, 0.0 }
 0x2f0   :  { %v900_v14 = vmax.f32 %v896_v0, 0.0 }
 0x2f1   :  { %v906_v13 = vmin.f32 %v902_v19, 6.0  ;;  %v905_v35 = vmin.f32 %v901_v61, 6.0 }
 0x2f2   :  { %v904_v48 = vmin.f32 %v900_v14, 6.0  ;;  %v877_v50 = vpop.xlane.xlu2 %876 }
 0x2f3   :  { %v910_v3 = vmul.f32 0.16666667, %v906_v13  ;;  %v909_v39 = vmul.f32 0.16666667, %v905_v35  ;;  %v891_v12 = vadd.f32 %v887_v63, %v877_v50 }
 0x2f4   :  { %v908_v56 = vmul.f32 0.16666667, %v904_v48 }
 0x2f5   :  { %v895_v17 = vadd.f32 3.0, %v891_v12  ;;  %928 = vperm.xlu0 %1861, %v910_v3   ;;  %923 = vperm.xlu1 %1862, %v909_v39  }
 0x2f6   :  { %918 = vperm.xlu2 %1863, %v908_v56  }
 0x2f7   :  { %v899_v23 = vmax.f32 %v895_v17, 0.0 }
 0x2f9   :  { %v903_v58 = vmin.f32 %v899_v23, 6.0 }
 0x2fb   :  { %v907_v22 = vmul.f32 0.16666667, %v903_v58 }
 0x2fd   :  { %913 = vperm.xlu0 %1861, %v907_v22  }
 0x350   :  { %v919_v7 = vpop.permute.xlu2 %918 }
 0x351   :  { %v933_v18 = vmul.f32 %v919_v7, %v2947_v49  ;;  %v934_v38 = vmul.f32 %v919_v7, %v2950_v29 }
 0x353   :  { %v941_v21 = vadd.f32 3.0, %v933_v18  ;;  %v942_v6 = vadd.f32 3.0, %v934_v38 }
 0x355   :  { %v949_v0 = vmax.f32 %v941_v21, 0.0  ;;  %v950_v63 = vmax.f32 %v942_v6, 0.0 }
 0x357   :  { %v957_v12 = vmin.f32 %v949_v0, 6.0  ;;  %v958_v58 = vmin.f32 %v950_v63, 6.0 }
 0x359   :  { %v966_v0 = vmul.f32 0.16666667, %v958_v58 }
 0x367   :  { %v929_v19 = vpop.permute.xlu0 %928  ;;  %v924_v61 = vpop.permute.xlu1 %923 }
 0x368   :  { %v937_v50 = vmul.f32 %v929_v19, %v3003_v44  ;;  %v938_v3 = vmul.f32 %v929_v19, %v3006_v41  ;;  %v935_v39 = vmul.f32 %v924_v61, %v2965_v59  ;;  %v936_v14 = vmul.f32 %v924_v61, %v2968_v42 }
 0x369   :  { %v965_v19 = vmul.f32 0.16666667, %v957_v12  ;;  %v974_v12 = vmul.f32 %v966_v0, %v934_v38  ;;  %v1792_v38 = vld [vmem:[%s3800_s0 + $0x28] sm:$0xff] }
 0x36a   :  { %v943_v13 = vadd.f32 3.0, %v935_v39  ;;  %v944_v35 = vadd.f32 3.0, %v936_v14  ;;  %v945_v48 = vadd.f32 3.0, %v937_v50  ;;  %v946_v49 = vadd.f32 3.0, %v938_v3 }
 0x36c   :  { %v951_v29 = vmax.f32 %v943_v13, 0.0  ;;  %v952_v56 = vmax.f32 %v944_v35, 0.0  ;;  %v953_v17 = vmax.f32 %v945_v48, 0.0  ;;  %v954_v23 = vmax.f32 %v946_v49, 0.0 }
 0x36e   :  { %v961_v22 = vmin.f32 %v953_v17, 6.0  ;;  %v962_v7 = vmin.f32 %v954_v23, 6.0  ;;  %v959_v44 = vmin.f32 %v951_v29, 6.0  ;;  %v960_v21 = vmin.f32 %v952_v56, 6.0 }
 0x36f   :  { %v914_v41 = vpop.permute.xlu0 %913 }
 0x370   :  { %v931_v59 = vmul.f32 %v914_v41, %v2993_v54  ;;  %v932_v42 = vmul.f32 %v914_v41, %v2996_v20  ;;  %v969_v6 = vmul.f32 0.16666667, %v961_v22  ;;  %v970_v61 = vmul.f32 0.16666667, %v962_v7  ;;  %v1867_v41 = vld [vmem:[%s3801_s1 + $0x18] sm:$0xff] }
 0x371   :  { %v967_v11 = vmul.f32 0.16666667, %v959_v44  ;;  %v968_v51 = vmul.f32 0.16666667, %v960_v21  ;;  %v973_v54 = vmul.f32 %v965_v19, %v933_v18  ;;  %v1791_v18 = vld [vmem:[%s3800_s0 + $0x20] sm:$0xff]  ;;  %v1866_v21 = vld [vmem:[%s3801_s1 + $0x10] sm:$0xff] }
 0x372   :  { %v939_v13 = vadd.f32 3.0, %v931_v59  ;;  %v940_v35 = vadd.f32 3.0, %v932_v42  ;;  %v977_v48 = vmul.f32 %v969_v6, %v937_v50  ;;  %v978_v49 = vmul.f32 %v970_v61, %v938_v3  ;;  %v43_v50 = vld [vmem:[%s3809_s9] sm:$0xff]  ;;  %v44_v3 = vld [vmem:[%s3809_s9 + $0x8] sm:$0xff] }
 0x373   :  { %v975_v29 = vmul.f32 %v967_v11, %v935_v39  ;;  %v976_v56 = vmul.f32 %v968_v51, %v936_v14  ;;  %v1793_v11 = vld [vmem:[%s3800_s0 + $0x30] sm:$0xff]  ;;  %v1794_v51 = vld [vmem:[%s3800_s0 + $0x38] sm:$0xff]  ;;  %v1864_v39 = vld [vmem:[%s3801_s1] sm:$0xff] }
 0x374   :  { %v947_v63 = vmax.f32 %v939_v13, 0.0  ;;  %v948_v17 = vmax.f32 %v940_v35, 0.0  ;;  %1008 = vmatpush.msra.mxu2 %v977_v48  ;;  %1031 = vmatpush.msra.mxu3 %v978_v49  ;;  %v1865_v14 = vld [vmem:[%s3801_s1 + $0x8] sm:$0xff]  ;;  %v4047_v13 = vld [vmem:[#allocation5_spill] sm:$0xff] }
 0x376   :  { %1009 = vmatpush.msra.mxu2 %v975_v29  ;;  %1032 = vmatpush.msra.mxu3 %v976_v56  ;;  %v955_v20 = vmin.f32 %v947_v63, 6.0  ;;  %v956_v23 = vmin.f32 %v948_v17, 6.0 }
 0x378   :  { %1010 = vmatpush.msra.mxu2 %v973_v54  ;;  %1033 = vmatpush.msra.mxu3 %v974_v12  ;;  %v963_v22 = vmul.f32 0.16666667, %v955_v20  ;;  %v964_v58 = vmul.f32 0.16666667, %v956_v23 }
 0x37a   :  { %v971_v7 = vmul.f32 %v963_v22, %v931_v59  ;;  %v972_v44 = vmul.f32 %v964_v58, %v932_v42 }
 0x37c   :  { %1011 = vmatpush.msra.mxu2 %v971_v7  ;;  %1034 = vmatpush.msra.mxu3 %v972_v44  ;;  %v4048_v7 = vld [vmem:[#allocation6_spill] sm:$0xff] }
 0x37d   :  { %1787 = vmatmul.msk.f32.vlgmr.msra.gmra.mxu2 %vm3909_vm14, %v43_v50  ;;  %1789 = vmatmul.msk.f32.vlgmr.msra.gmra.mxu3 %vm3909_vm14, %v43_v50 }
 0x37e   :  { %1069 = vmatpush.msrb.mxu2 %v1793_v11  ;;  %1098 = vmatpush.msrb.mxu3 %v1794_v51 }
 0x380   :  { %1070 = vmatpush.msrb.mxu2 %v1791_v18  ;;  %1099 = vmatpush.msrb.mxu3 %v1792_v38 }
 0x385   :  { %1788 = vmatmul.msk.f32.gmra.mxu2 %vm3909_vm14, %v44_v3  ;;  %1790 = vmatmul.msk.f32.gmra.mxu3 %vm3909_vm14, %v44_v3  ;;  %vm4039_vm14 = vmmov %vm4037_vm7 }
 0x38d   :  { %1795 = vmatmul.msk.f32.vlgmr.msrb.gmra.mxu2 %vm4035_vm9, %v1864_v39  ;;  %1799 = vmatmul.msk.f32.vlgmr.msrb.gmra.mxu3 %vm4036_vm10, %v1864_v39  ;;  %vm4041_vm9 = vmmov %vm4037_vm7 }
 0x38e   :  { %vm4042_vm10 = vmmov %vm4037_vm7 }
 0x395   :  { %1796 = vmatmul.msk.f32.gmra.mxu2 %vm4037_vm7, %v1865_v14  ;;  %1800 = vmatmul.msk.f32.gmra.mxu3 %vm4038_vm15, %v1865_v14  ;;  %vm4051_vm15 = vcmp.lt.s32.totalorder %v2302_v27, 17  ;;  %vm4054_vm7 = vcmp.lt.s32.totalorder %v2302_v27, 15 }
 0x39d   :  { %1797 = vmatmul.msk.f32.gmra.mxu2 %vm4039_vm14, %v1866_v21  ;;  %1801 = vmatmul.msk.f32.gmra.mxu3 %vm4040_vm11, %v1866_v21  ;;  %vm4052_vm11 = vmmov %vm4051_vm15 }
 0x39e   :  { %vm4055_vm14 = vmmov %vm4054_vm7 }
 0x3a5   :  { %1798 = vmatmul.msk.f32.gmra.mxu2 %vm4041_vm9, %v1867_v41  ;;  %1802 = vmatmul.msk.f32.gmra.mxu3 %vm4042_vm10, %v1867_v41  ;;  %vm4056_vm9 = vcmp.lt.s32.totalorder %v2302_v27, 16 }
 0x3a6   :  { %vm4057_vm10 = vmmov %vm4056_vm9 }
 0x400   :  { %v3107_v19 = vpop.f32.mrf.mxu2  ;;  %v3109_v59 = vpop.f32.mrf.mxu3 }
 0x401   :  { %4043 = vst [vmem:[#allocation29_spill] sm:$0xff] %v3107_v19 }
 0x402   :  { %4044 = vst [vmem:[#allocation26_spill] sm:$0xff] %v3109_v59 }
 0x408   :  { %v3111_v42 = vpop.f32.mrf.mxu2  ;;  %v3113_v6 = vpop.f32.mrf.mxu3 }
 0x409   :  { %4045 = vst [vmem:[#allocation34_spill] sm:$0xff] %v3111_v42 }
 0x40a   :  { %4046 = vst [vmem:[#allocation32_spill] sm:$0xff] %v3113_v6 }
 0x410   :  { %v1072_v61 = vpop.f32.mrf.mxu2  ;;  %v1101_v0 = vpop.f32.mrf.mxu3 }
 0x411   :  { %v1073_v35 = vadd.f32 %v1072_v61, %v4047_v13  ;;  %v1102_v48 = vadd.f32 %v1101_v0, %v4047_v13 }
 0x413   :  { %v1113_v49 = vadd.f32 3.0, %v1073_v35  ;;  %v1114_v63 = vadd.f32 3.0, %v1102_v48 }
 0x415   :  { %v1121_v17 = vmax.f32 %v1113_v49, 0.0  ;;  %v1122_v29 = vmax.f32 %v1114_v63, 0.0 }
 0x417   :  { %v1129_v56 = vmin.f32 %v1121_v17, 6.0  ;;  %v1130_v54 = vmin.f32 %v1122_v29, 6.0 }
 0x418   :  { %v1075_v58 = vpop.f32.mrf.mxu2  ;;  %v1104_v18 = vpop.f32.mrf.mxu3 }
 0x419   :  { %v1137_v12 = vmul.f32 0.16666667, %v1129_v56  ;;  %v1138_v20 = vmul.f32 0.16666667, %v1130_v54  ;;  %v1076_v44 = vadd.f32 %v1075_v58, %v4048_v7  ;;  %v1105_v3 = vadd.f32 %v1104_v18, %v4048_v7 }
 0x41b   :  { %v3117_v23 = vmul.f32 %v1137_v12, %v1073_v35  ;;  %v3119_v22 = vmul.f32 %v1138_v20, %v1102_v48  ;;  %v1115_v50 = vadd.f32 3.0, %v1076_v44  ;;  %v1116_v14 = vadd.f32 3.0, %v1105_v3  ;;  %v4049_v48 = vld [vmem:[#allocation7_spill] sm:$0xff] }
 0x41d   :  { %1265 = vrot.lane.b32.xlu0 %v3119_v22, %s1912_s12  ;;  %1169 = vrot.lane.b32.xlu2 %v3119_v22, %s1909_s3  ;;  %v1123_v11 = vmax.f32 %v1115_v50, 0.0  ;;  %v1124_v21 = vmax.f32 %v1116_v14, 0.0 }
 0x41e   :  { %1161 = vrot.lane.b32.xlu1 %v3117_v23, %s1909_s3 }
 0x41f   :  { %v1131_v51 = vmin.f32 %v1123_v11, 6.0  ;;  %v1132_v41 = vmin.f32 %v1124_v21, 6.0 }
 0x420   :  { %v1078_v13 = vpop.f32.mrf.mxu2  ;;  %v1107_v35 = vpop.f32.mrf.mxu3 }
 0x421   :  { %v1139_v38 = vmul.f32 0.16666667, %v1131_v51  ;;  %v1140_v61 = vmul.f32 0.16666667, %v1132_v41  ;;  %v1079_v49 = vadd.f32 %v1078_v13, %v4049_v48  ;;  %v1108_v63 = vadd.f32 %v1107_v35, %v4049_v48 }
 0x423   :  { %v3147_v39 = vmul.f32 %v1139_v38, %v1076_v44  ;;  %v3161_v0 = vmul.f32 %v1140_v61, %v1105_v3  ;;  %v1117_v17 = vadd.f32 3.0, %v1079_v49  ;;  %v1118_v29 = vadd.f32 3.0, %v1108_v63  ;;  %v4050_v38 = vld [vmem:[#allocation8_spill] sm:$0xff] }
 0x425   :  { %1217 = vrot.lane.b32.xlu2 %v3119_v22, %s1911_s30  ;;  %1305 = vrot.lane.b32.xlu0 %v3117_v23, %s1910_s29  ;;  %v1125_v56 = vmax.f32 %v1117_v17, 0.0  ;;  %v1126_v54 = vmax.f32 %v1118_v29, 0.0 }
 0x426   :  { %1209 = vrot.lane.b32.xlu1 %v3117_v23, %s1911_s30 }
 0x427   :  { %v1133_v12 = vmin.f32 %v1125_v56, 6.0  ;;  %v1134_v20 = vmin.f32 %v1126_v54, 6.0 }
 0x428   :  { %v1081_v51 = vpop.f32.mrf.mxu2  ;;  %v1110_v18 = vpop.f32.mrf.mxu3 }
 0x429   :  { %v1141_v58 = vmul.f32 0.16666667, %v1133_v12  ;;  %v1142_v7 = vmul.f32 0.16666667, %v1134_v20  ;;  %v1082_v3 = vadd.f32 %v1081_v51, %v4050_v38  ;;  %v1111_v14 = vadd.f32 %v1110_v18, %v4050_v38 }
 0x42b   :  { %v3189_v44 = vmul.f32 %v1141_v58, %v1079_v49  ;;  %v3191_v50 = vmul.f32 %v1142_v7, %v1108_v63  ;;  %v1119_v41 = vadd.f32 3.0, %v1082_v3  ;;  %v1120_v61 = vadd.f32 3.0, %v1111_v14 }
 0x42d   :  { %1409 = vrot.lane.b32.xlu0 %v3119_v22, %s1915_s14  ;;  %1257 = vrot.lane.b32.xlu2 %v3117_v23, %s1912_s12  ;;  %v1127_v13 = vmax.f32 %v1119_v41, 0.0  ;;  %v1128_v35 = vmax.f32 %v1120_v61, 0.0 }
 0x42e   :  { %1313 = vrot.lane.b32.xlu1 %v3119_v22, %s1910_s29 }
 0x42f   :  { %v1135_v49 = vmin.f32 %v1127_v13, 6.0  ;;  %v1136_v63 = vmin.f32 %v1128_v35, 6.0  ;;  %v1154_v13 = vmul.f32 %v3119_v22, %v2112_v53 }
 0x431   :  { %v1143_v17 = vmul.f32 0.16666667, %v1135_v49  ;;  %v1144_v29 = vmul.f32 0.16666667, %v1136_v63 }
 0x433   :  { %v3231_v7 = vmul.f32 %v1143_v17, %v1082_v3  ;;  %v3233_v51 = vmul.f32 %v1144_v29, %v1111_v14  ;;  %v1153_v17 = vmul.f32 %v3117_v23, %v2112_v53 }
 0x435   :  { %1449 = vrot.lane.b32.xlu0 %v3117_v23, %s1918_s15  ;;  %1361 = vrot.lane.b32.xlu2 %v3119_v22, %s1913_s13  ;;  %4053 = vst [vmem:[#allocation18_spill] sm:$0xff] %v3233_v51 }
 0x436   :  { %1353 = vrot.lane.b32.xlu1 %v3117_v23, %s1913_s13 }
 0x43d   :  { %1163 = vrot.lane.b32.xlu0 %v3147_v39, %s1909_s3  ;;  %1401 = vrot.lane.b32.xlu2 %v3117_v23, %s1915_s14 }
 0x43e   :  { %1457 = vrot.lane.b32.xlu1 %v3119_v22, %s1918_s15 }
 0x445   :  { %1211 = vrot.lane.b32.xlu0 %v3147_v39, %s1911_s30  ;;  %1505 = vrot.lane.b32.xlu2 %v3119_v22, %s1919_s16 }
 0x446   :  { %1497 = vrot.lane.b32.xlu1 %v3117_v23, %s1919_s16 }
 0x44d   :  { %1315 = vrot.lane.b32.xlu0 %v3161_v0, %s1910_s29  ;;  %1267 = vrot.lane.b32.xlu2 %v3161_v0, %s1912_s12 }
 0x44e   :  { %1171 = vrot.lane.b32.xlu1 %v3161_v0, %s1909_s3 }
 0x455   :  { %1355 = vrot.lane.b32.xlu0 %v3147_v39, %s1913_s13  ;;  %1307 = vrot.lane.b32.xlu2 %v3147_v39, %s1910_s29 }
 0x456   :  { %1219 = vrot.lane.b32.xlu1 %v3161_v0, %s1911_s30 }
 0x45d   :  { %1459 = vrot.lane.b32.xlu0 %v3161_v0, %s1918_s15  ;;  %1411 = vrot.lane.b32.xlu2 %v3161_v0, %s1915_s14 }
 0x45e   :  { %1259 = vrot.lane.b32.xlu1 %v3147_v39, %s1912_s12 }
 0x465   :  { %1499 = vrot.lane.b32.xlu0 %v3147_v39, %s1919_s16  ;;  %1451 = vrot.lane.b32.xlu2 %v3147_v39, %s1918_s15 }
 0x466   :  { %1363 = vrot.lane.b32.xlu1 %v3161_v0, %s1913_s13 }
 0x46d   :  { %1165 = vrot.lane.b32.xlu0 %v3189_v44, %s1909_s3  ;;  %1173 = vrot.lane.b32.xlu2 %v3191_v50, %s1909_s3 }
 0x46e   :  { %1403 = vrot.lane.b32.xlu1 %v3147_v39, %s1915_s14 }
 0x475   :  { %1221 = vrot.lane.b32.xlu0 %v3191_v50, %s1911_s30  ;;  %1261 = vrot.lane.b32.xlu2 %v3189_v44, %s1912_s12 }
 0x476   :  { %1507 = vrot.lane.b32.xlu1 %v3161_v0, %s1919_s16 }
 0x477   :  { %v1170_v11 = vpop.permute.xlu2 %1169 }
 0x47d   :  { %1309 = vrot.lane.b32.xlu0 %v3189_v44, %s1910_s29  ;;  %1317 = vrot.lane.b32.xlu2 %v3191_v50, %s1910_s29 }
 0x47e   :  { %1213 = vrot.lane.b32.xlu1 %v3189_v44, %s1911_s30 }
 0x47f   :  { %v1218_v21 = vpop.permute.xlu2 %1217 }
 0x485   :  { %1365 = vrot.lane.b32.xlu0 %v3191_v50, %s1913_s13  ;;  %1405 = vrot.lane.b32.xlu2 %v3189_v44, %s1915_s14 }
 0x486   :  { %1269 = vrot.lane.b32.xlu1 %v3191_v50, %s1912_s12 }
 0x487   :  { %v1258_v48 = vpop.permute.xlu2 %1257 }
 0x48d   :  { %1453 = vrot.lane.b32.xlu0 %v3189_v44, %s1918_s15  ;;  %1461 = vrot.lane.b32.xlu2 %v3191_v50, %s1918_s15 }
 0x48e   :  { %1357 = vrot.lane.b32.xlu1 %v3189_v44, %s1913_s13 }
 0x48f   :  { %v1266_v56 = vpop.permute.xlu0 %1265  ;;  %v3225_v54 = vpop.permute.xlu2 %1361 }
 0x490   :  { %v1162_v12 = vpop.permute.xlu1 %1161  ;;  %v1277_v41 = vsel %vm4054_vm7, %v1266_v56, %v1258_v48  ;;  %vm4060_vm7 = vcmp.lt.s32.totalorder %v2302_v27, 127 }
 0x491   :  { %v1177_v20 = vsel %vm4051_vm15, %v1162_v12, %v1170_v11  ;;  %v1181_v58 = vsel %vm4052_vm11, %v1170_v11, %v1162_v12  ;;  %v1273_v11 = vsel %vm4055_vm14, %v1258_v48, %v1266_v56  ;;  %v1281_v63 = vsel %vm2395_vm12, %v1277_v41, 0.0  ;;  %vm4061_vm14 = vmmov %vm4060_vm7 }
 0x492   :  { %v1185_v18 = vsel %vm2352_vm6, %v1181_v58, 0.0  ;;  %v1186_v38 = vsel %vm2363_vm8, %v1177_v20, 0.0  ;;  %v1289_v23 = vmul.f32 %v1281_v63, %v3975_v36  ;;  %vm4058_vm15 = vcmp.lt.s32.totalorder %v2302_v27, 1 }
 0x493   :  { %v1193_v3 = vmul.f32 %v1185_v18, %v2120_v55  ;;  %v1194_v14 = vmul.f32 %v1186_v38, %v2120_v55  ;;  %v1282_v55 = vsel %vm2407_vm13, %v1273_v11, 0.0  ;;  %vm4059_vm11 = vmmov %vm4058_vm15 }
 0x494   :  { %v1290_v18 = vmul.f32 %v1282_v55, %v3975_v36 }
 0x495   :  { %1167 = vrot.lane.b32.xlu0 %v3231_v7, %s1909_s3  ;;  %1175 = vrot.lane.b32.xlu2 %v3233_v51, %s1909_s3  ;;  %v1201_v12 = vadd.f32 %v1193_v3, %v1153_v17  ;;  %v1202_v20 = vadd.f32 %v1194_v14, %v1154_v13 }
 0x496   :  { %1413 = vrot.lane.b32.xlu1 %v3191_v50, %s1915_s14 }
 0x497   :  { %v1306_v61 = vpop.permute.xlu0 %1305  ;;  %v3253_v35 = vpop.permute.xlu2 %1401 }
 0x498   :  { %v1210_v49 = vpop.permute.xlu1 %1209 }
 0x499   :  { %v1225_v48 = vsel %vm4056_vm9, %v1210_v49, %v1218_v21  ;;  %v1229_v29 = vsel %vm4057_vm10, %v1218_v21, %v1210_v49  ;;  %vm4062_vm9 = vnez %v3963_v15  ;;  %vm4063_vm10 = vnez %v3965_v28 }
 0x49a   :  { %v1233_v22 = vsel %vm2328_vm2, %v1229_v29, 0.0  ;;  %v1234_v56 = vsel %vm2339_vm4, %v1225_v48, 0.0 }
 0x49b   :  { %v1241_v58 = vmul.f32 %v1233_v22, %v2160_v26  ;;  %v1242_v53 = vmul.f32 %v1234_v56, %v2160_v26 }
 0x49d   :  { %v1249_v21 = vadd.f32 %v1241_v58, %v1201_v12  ;;  %v1250_v38 = vadd.f32 %v1242_v53, %v1202_v20  ;;  %1223 = vrot.lane.b32.xlu0 %v3233_v51, %s1911_s30  ;;  %1263 = vrot.lane.b32.xlu2 %v3231_v7, %s1912_s12 }
 0x49e   :  { %1501 = vrot.lane.b32.xlu1 %v3189_v44, %s1919_s16 }
 0x49f   :  { %v1410_v41 = vpop.permute.xlu0 %1409  ;;  %v1298_v11 = vadd.f32 %v1290_v18, %v1250_v38  ;;  %v1297_v3 = vadd.f32 %v1289_v23, %v1249_v21  ;;  %v1506_v26 = vpop.permute.xlu2 %1505 }
 0x4a0   :  { %v1314_v14 = vpop.permute.xlu1 %1313 }
 0x4a1   :  { %v1321_v20 = vsel %vm4058_vm15, %v1306_v61, %v1314_v14  ;;  %v1325_v58 = vsel %vm4059_vm11, %v1314_v14, %v1306_v61  ;;  %vm4064_vm15 = vcmp.lt.s32.totalorder %v2302_v27, 113 }
 0x4a2   :  { %v1329_v38 = vsel %vm2322_vm1, %v1325_v58, 0.0  ;;  %v1330_v61 = vsel %vm2333_vm3, %v1321_v20, 0.0  ;;  %vm4065_vm11 = vmmov %vm4064_vm15 }
 0x4a3   :  { %v1337_v6 = vmul.f32 %v1329_v38, %v3978_v1  ;;  %v1338_v42 = vmul.f32 %v1330_v61, %v3978_v1 }
 0x4a5   :  { %1311 = vrot.lane.b32.xlu0 %v3231_v7, %s1910_s29  ;;  %1319 = vrot.lane.b32.xlu2 %v3233_v51, %s1910_s29  ;;  %v1345_v1 = vadd.f32 %v1337_v6, %v1297_v3  ;;  %v1346_v61 = vadd.f32 %v1338_v42, %v1298_v11 }
 0x4a6   :  { %1215 = vrot.lane.b32.xlu1 %v3231_v7, %s1911_s30 }
 0x4a7   :  { %v1450_v36 = vpop.permute.xlu0 %1449  ;;  %v3285_v49 = vpop.permute.xlu2 %1267 }
 0x4a8   :  { %v1354_v13 = vpop.permute.xlu1 %1353 }
 0x4a9   :  { %v1369_v23 = vsel %vm4060_vm7, %v1354_v13, %v3225_v54  ;;  %v1373_v18 = vsel %vm4061_vm14, %v3225_v54, %v1354_v13  ;;  %v1417_v54 = vsel %vm4064_vm15, %v3253_v35, %v1410_v41  ;;  %v1421_v13 = vsel %vm4065_vm11, %v1410_v41, %v3253_v35 }
 0x4aa   :  { %v1377_v59 = vsel %vm4062_vm9, %v1369_v23, 0.0  ;;  %v1378_v19 = vsel %vm4063_vm10, %v1373_v18, 0.0  ;;  %vm4066_vm7 = vcmp.lt.s32.totalorder %v2302_v27, 112  ;;  %vm4068_vm15 = vcmp.lt.s32.totalorder %v2302_v27, 17 }
 0x4ab   :  { %v1385_v20 = vmul.f32 %v1377_v59, %v2457_v5  ;;  %v1386_v58 = vmul.f32 %v1378_v19, %v2457_v5  ;;  %vm4067_vm14 = vmmov %vm4066_vm7  ;;  %vm4070_vm11 = vnez %v3995_v40  ;;  %vm4071_vm9 = vnez %v3997_v47 }
 0x4ac   :  { %vm4069_vm10 = vmmov %vm4068_vm15  ;;  %v1425_v5 = vsel %vm4070_vm11, %v1417_v54, 0.0  ;;  %v1426_v19 = vsel %vm4071_vm9, %v1421_v13, 0.0 }
 0x4ad   :  { %1367 = vrot.lane.b32.xlu0 %v3233_v51, %s1913_s13  ;;  %1407 = vrot.lane.b32.xlu2 %v3231_v7, %s1915_s14  ;;  %v1393_v42 = vadd.f32 %v1385_v20, %v1345_v1  ;;  %v1394_v11 = vadd.f32 %v1386_v58, %v1346_v61  ;;  %v1433_v13 = vmul.f32 %v1425_v5, %v2564_v62 }
 0x4ae   :  { %1271 = vrot.lane.b32.xlu1 %v3233_v51, %s1912_s12  ;;  %v1434_v20 = vmul.f32 %v1426_v19, %v2564_v62  ;;  %v1155_v5 = vmul.f32 %v3147_v39, %v3974_v57  ;;  %v1156_v19 = vmul.f32 %v3161_v0, %v3974_v57 }
 0x4af   :  { %v1164_v63 = vpop.permute.xlu0 %1163  ;;  %v3297_v48 = vpop.permute.xlu2 %1307 }
 0x4b0   :  { %v1458_v17 = vpop.permute.xlu1 %1457  ;;  %v1442_v61 = vadd.f32 %v1434_v20, %v1394_v11 }
 0x4b1   :  { %v1465_v23 = vsel %vm4066_vm7, %v1450_v36, %v1458_v17  ;;  %v1469_v18 = vsel %vm4067_vm14, %v1458_v17, %v1450_v36  ;;  %vm4072_vm7 = vcmp.lt.s32.totalorder %v2302_v27, 111  ;;  %vm4074_vm14 = vcmp.lt.s32.totalorder %v2302_v27, 16 }
 0x4b2   :  { %v1473_v59 = vsel %vm2678_vm5, %v1465_v23, 0.0  ;;  %v1474_v6 = vsel %vm2698_vm0, %v1469_v18, 0.0 }
 0x4b3   :  { %v1481_v58 = vmul.f32 %v1473_v59, %v2829_v25 }
 0x4b5   :  { %1455 = vrot.lane.b32.xlu0 %v3231_v7, %s1918_s15  ;;  %1463 = vrot.lane.b32.xlu2 %v3233_v51, %s1918_s15 }
 0x4b6   :  { %1359 = vrot.lane.b32.xlu1 %v3231_v7, %s1913_s13 }
 0x4b7   :  { %v1212_v29 = vpop.permute.xlu0 %1211  ;;  %v3309_v56 = vpop.permute.xlu2 %1411 }
 0x4b8   :  { %v1498_v55 = vpop.permute.xlu1 %1497 }
 0x4b9   :  { %v1513_v3 = vsel %vm4072_vm7, %v1498_v55, %v1506_v26 }
 0x4bd   :  { %1509 = vrot.lane.b32.xlu0 %v3191_v50, %s1919_s16  ;;  %1503 = vrot.lane.b32.xlu2 %v3231_v7, %s1919_s16 }
 0x4be   :  { %1415 = vrot.lane.b32.xlu1 %v3233_v51, %s1915_s14 }
 0x4bf   :  { %v3307_v22 = vpop.permute.xlu0 %1315  ;;  %v3329_v14 = vpop.permute.xlu2 %1451 }
 0x4c0   :  { %v1172_v12 = vpop.permute.xlu1 %1171 }
 0x4c1   :  { %v1182_v35 = vsel %vm4069_vm10, %v1172_v12, %v1164_v63  ;;  %vm4073_vm10 = vmmov %vm4072_vm7  ;;  %vm4076_vm7 = vnez %v4017_v34 }
 0x4c2   :  { %v1517_v36 = vsel %vm4073_vm10, %v1506_v26, %v1498_v55  ;;  %v1482_v26 = vmul.f32 %v1474_v6, %v2829_v25  ;;  %v1521_v23 = vsel %vm4076_vm7, %v1513_v3, 0.0  ;;  %vm4077_vm10 = vnez %v4021_v37 }
 0x4c6   :  { %1511 = vrot.lane.b32.xlu1 %v3233_v51, %s1919_s16  ;;  %v1178_v51 = vsel %vm4068_vm15, %v1164_v63, %v1172_v12  ;;  %v1187_v63 = vsel %vm2352_vm6, %v1182_v35, 0.0  ;;  %vm4075_vm15 = vmmov %vm4074_vm14  ;;  %v1441_v35 = vadd.f32 %v1433_v13, %v1393_v42  ;;  %v1490_v42 = vadd.f32 %v1482_v26, %v1442_v61 }
 0x4c7   :  { %v3317_v53 = vpop.permute.xlu0 %1355  ;;  %v1188_v17 = vsel %vm2363_vm8, %v1178_v51, 0.0  ;;  %v3379_v55 = vpop.permute.xlu2 %1173  ;;  %v1522_v51 = vsel %vm4077_vm10, %v1517_v36, 0.0  ;;  %v4080_v36 = vld [vmem:[#allocation11_spill] sm:$0xff] }
 0x4c8   :  { %v1220_v21 = vpop.permute.xlu1 %1219  ;;  %v1196_v25 = vmul.f32 %v1188_v17, %v3976_v52  ;;  %v1489_v11 = vadd.f32 %v1481_v58, %v1441_v35 }
 0x4c9   :  { %v1226_v12 = vsel %vm4074_vm14, %v1212_v29, %v1220_v21  ;;  %v1230_v54 = vsel %vm4075_vm15, %v1220_v21, %v1212_v29  ;;  %vm4078_vm14 = vcmp.lt.s32.totalorder %v2302_v27, 15  ;;  %v1195_v21 = vmul.f32 %v1187_v63, %v3976_v52 }
 0x4ca   :  { %vm4079_vm15 = vmmov %vm4078_vm14  ;;  %v1235_v18 = vsel %vm2328_vm2, %v1230_v54, 0.0  ;;  %v1236_v1 = vsel %vm2339_vm4, %v1226_v12, 0.0  ;;  %v1204_v17 = vadd.f32 %v1196_v25, %v1156_v19  ;;  %v4083_v12 = vld [vmem:[#allocation21_spill] sm:$0xff] }
 0x4cb   :  { %v1243_v63 = vmul.f32 %v1235_v18, %v4080_v36  ;;  %v1244_v39 = vmul.f32 %v1236_v1, %v4080_v36  ;;  %v1203_v0 = vadd.f32 %v1195_v21, %v1155_v5 }
 0x4cf   :  { %v3349_v38 = vpop.permute.xlu0 %1459 }
 0x4d0   :  { %v1260_v41 = vpop.permute.xlu1 %1259 }
 0x4d1   :  { %v1274_v29 = vsel %vm4078_vm14, %v1260_v41, %v3285_v49  ;;  %v1278_v62 = vsel %vm4079_vm15, %v3285_v49, %v1260_v41  ;;  %v1529_v49 = vmul.f32 %v1521_v23, %v2875_v2  ;;  %v1530_v41 = vmul.f32 %v1522_v51, %v2875_v2 }
 0x4d2   :  { %v1283_v52 = vsel %vm2395_vm12, %v1278_v62, 0.0  ;;  %v1284_v6 = vsel %vm2407_vm13, %v1274_v29, 0.0  ;;  %vm4081_vm14 = vcmp.lt.s32.totalorder %v2302_v27, 1  ;;  %vm4084_vm13 = vcmp.lt.s32.totalorder %v2302_v27, 127  ;;  %v3429_v62 = vpop.permute.xlu2 %1261 }
 0x4d3   :  { %v1322_v57 = vsel %vm4081_vm14, %v3297_v48, %v3307_v22  ;;  %vm4082_vm15 = vmmov %vm4081_vm14  ;;  %v1291_v54 = vmul.f32 %v1283_v52, %v4083_v12  ;;  %v1292_v13 = vmul.f32 %v1284_v6, %v4083_v12  ;;  %v1537_v26 = vadd.f32 %v1529_v49, %v1489_v11 }
 0x4d4   :  { %v1326_v2 = vsel %vm4082_vm15, %v3307_v22, %v3297_v48  ;;  %vm4085_vm12 = vmmov %vm4084_vm13  ;;  %v1538_v23 = vadd.f32 %v1530_v41, %v1490_v42  ;;  %v1332_v48 = vsel %vm2333_vm3, %v1322_v57, 0.0  ;;  %v1251_v22 = vadd.f32 %v1243_v63, %v1203_v0  ;;  %v4092_v63 = vld [vmem:[#allocation38_spill] sm:$0xff] }
 0x4d5   :  { %v1331_v51 = vsel %vm2322_vm1, %v1326_v2, 0.0  ;;  %v1252_v29 = vadd.f32 %v1244_v39, %v1204_v17  ;;  %vm4086_vm14 = vnez %v3963_v15  ;;  %v1340_v35 = vmul.f32 %v1332_v48, %v4007_v9 }
 0x4d6   :  { %v1299_v18 = vadd.f32 %v1291_v54, %v1251_v22  ;;  %v1339_v61 = vmul.f32 %v1331_v51, %v4007_v9  ;;  %v3438_v19 = vadd.f32 %v1537_v26, %v2988_v33  ;;  %v3441_v49 = vadd.f32 %v1538_v23, %v2988_v33 }
 0x4d7   :  { %v1500_v59 = vpop.permute.xlu0 %1499 }
 0x4d8   :  { %v1364_v3 = vpop.permute.xlu1 %1363  ;;  %v1347_v42 = vadd.f32 %v1339_v61, %v1299_v18  ;;  %v1553_v0 = vadd.f32 %v3441_v49, %v3438_v19 }
 0x4d9   :  { %v1370_v20 = vsel %vm4084_vm13, %v3317_v53, %v1364_v3  ;;  %v1374_v58 = vsel %vm4085_vm12, %v1364_v3, %v3317_v53  ;;  %vm4087_vm13 = vnez %v3965_v28  ;;  %v1300_v53 = vadd.f32 %v1292_v13, %v1252_v29 }
 0x4da   :  { %v1379_v21 = vsel %vm4086_vm14, %v1370_v20, 0.0  ;;  %v1380_v25 = vsel %vm4087_vm13, %v1374_v58, 0.0  ;;  %vm4088_vm12 = vcmp.lt.s32.totalorder %v2302_v27, 113  ;;  %vm4090_vm13 = vcmp.lt.s32.totalorder %v2302_v27, 112  ;;  %v1318_v13 = vpop.permute.xlu2 %1317  ;;  %v4093_v58 = vld [vmem:[#allocation9_spill] sm:$0xff] }
 0x4db   :  { %v1387_v41 = vmul.f32 %v1379_v21, %v2486_v10  ;;  %v1388_v52 = vmul.f32 %v1380_v25, %v2486_v10  ;;  %vm4089_vm15 = vmmov %vm4088_vm12  ;;  %v1466_v9 = vsel %vm4090_vm13, %v3329_v14, %v3349_v38  ;;  %v1348_v36 = vadd.f32 %v1340_v35, %v1300_v53 }
 0x4dc   :  { %vm4091_vm14 = vmmov %vm4090_vm13 }
 0x4dd   :  { %v1470_v33 = vsel %vm4091_vm14, %v3349_v38, %v3329_v14  ;;  %v1395_v57 = vadd.f32 %v1387_v41, %v1347_v42  ;;  %v1396_v2 = vadd.f32 %v1388_v52, %v1348_v36  ;;  %v1475_v14 = vsel %vm2678_vm5, %v1466_v9, 0.0  ;;  %v4096_v41 = vld [vmem:[#allocation33_spill] sm:$0xff] }
 0x4de   :  { %v1476_v38 = vsel %vm2698_vm0, %v1470_v33, 0.0  ;;  %v1483_v26 = vmul.f32 %v1475_v14, %v4093_v58  ;;  %vm4094_vm14 = vcmp.lt.s32.totalorder %v2302_v27, 111 }
 0x4df   :  { %v1166_v1 = vpop.permute.xlu0 %1165  ;;  %v1484_v23 = vmul.f32 %v1476_v38, %v4093_v58  ;;  %vm4095_vm13 = vmmov %vm4094_vm14  ;;  %v4103_v58 = vld [vmem:[#allocation12_spill] sm:$0xff] }
 0x4e0   :  { %v1404_v5 = vpop.permute.xlu1 %1403 }
 0x4e1   :  { %v1418_v6 = vsel %vm4088_vm12, %v1404_v5, %v3309_v56  ;;  %v1422_v3 = vsel %vm4089_vm15, %v3309_v56, %v1404_v5  ;;  %vm4097_vm12 = vcmp.lt.s32.totalorder %v2302_v27, 17 }
 0x4e2   :  { %v1427_v10 = vsel %vm4070_vm11, %v1418_v6, 0.0  ;;  %v1428_v11 = vsel %vm4071_vm9, %v1422_v3, 0.0  ;;  %v1406_v3 = vpop.permute.xlu2 %1405  ;;  %vm4098_vm15 = vmmov %vm4097_vm12 }
 0x4e3   :  { %v1435_v56 = vmul.f32 %v1427_v10, %v4092_v63  ;;  %v1436_v39 = vmul.f32 %v1428_v11, %v4092_v63 }
 0x4e5   :  { %v1443_v17 = vadd.f32 %v1435_v56, %v1395_v57  ;;  %v1444_v12 = vadd.f32 %v1436_v39, %v1396_v2  ;;  %v1179_v39 = vsel %vm4097_vm12, %v1166_v1, %v3379_v55  ;;  %v1183_v57 = vsel %vm4098_vm15, %v3379_v55, %v1166_v1 }
 0x4e6   :  { %v1189_v38 = vsel %vm2352_vm6, %v1183_v57, 0.0  ;;  %vm4101_vm12 = vcmp.lt.s32.totalorder %v2302_v27, 15 }
 0x4e7   :  { %v1222_v54 = vpop.permute.xlu0 %1221  ;;  %1554 = vadd.xlane.f32.xlu0 %v1553_v0  ;;  %v1491_v21 = vadd.f32 %v1483_v26, %v1443_v17  ;;  %v1492_v25 = vadd.f32 %v1484_v23, %v1444_v12  ;;  %v1190_v17 = vsel %vm2363_vm8, %v1179_v39, 0.0  ;;  %vm4102_vm15 = vmmov %vm4101_vm12  ;;  %v1197_v26 = vmul.f32 %v1189_v38, %v4103_v58 }
 0x4e8   :  { %v1508_v20 = vpop.permute.xlu1 %1507  ;;  %v1198_v23 = vmul.f32 %v1190_v17, %v4103_v58  ;;  %v4114_v58 = vld [vmem:[#allocation18_spill] sm:$0xff] }
 0x4e9   :  { %v1514_v51 = vsel %vm4094_vm14, %v1500_v59, %v1508_v20  ;;  %v1518_v48 = vsel %vm4095_vm13, %v1508_v20, %v1500_v59  ;;  %vm4099_vm14 = vcmp.lt.s32.totalorder %v2302_v27, 16 }
 0x4ea   :  { %v1523_v22 = vsel %vm4076_vm7, %v1514_v51, 0.0  ;;  %v1524_v29 = vsel %vm4077_vm10, %v1518_v48, 0.0  ;;  %v3491_v11 = vpop.permute.xlu2 %1461  ;;  %vm4100_vm13 = vmmov %vm4099_vm14  ;;  %vm4111_vm10 = vcmp.lt.s32.totalorder %v2302_v27, 17 }
 0x4eb   :  { %v1531_v18 = vmul.f32 %v1523_v22, %v2877_v8  ;;  %v1532_v53 = vmul.f32 %v1524_v29, %v2877_v8  ;;  %v4104_v22 = vld [vmem:[#allocation10_spill] sm:$0xff]  ;;  %vm4112_vm7 = vmmov %vm4111_vm10 }
 0x4ec   :  { %v1158_v29 = vmul.f32 %v3191_v50, %v4104_v22 }
 0x4ed   :  { %v1539_v61 = vadd.f32 %v1531_v18, %v1491_v21  ;;  %v1540_v35 = vadd.f32 %v1532_v53, %v1492_v25  ;;  %v4107_v18 = vld [vmem:[#allocation14_spill] sm:$0xff] }
 0x4ef   :  { %v1310_v5 = vpop.permute.xlu0 %1309  ;;  %v3484_v52 = vadd.f32 %v1539_v61, %v4096_v41  ;;  %v3487_v59 = vadd.f32 %v1540_v35, %v4096_v41 }
 0x4f0   :  { %v1214_v6 = vpop.permute.xlu1 %1213 }
 0x4f1   :  { %v1556_v9 = vadd.f32 %v3487_v59, %v3484_v52  ;;  %v1227_v12 = vsel %vm4099_vm14, %v1214_v6, %v1222_v54  ;;  %v1231_v20 = vsel %vm4100_vm13, %v1222_v54, %v1214_v6  ;;  %v1157_v54 = vmul.f32 %v3189_v44, %v4104_v22 }
 0x4f2   :  { %v1176_v36 = vpop.permute.xlu2 %1175  ;;  %v1237_v51 = vsel %vm2328_vm2, %v1231_v20, 0.0  ;;  %v1238_v48 = vsel %vm2339_vm4, %v1227_v12, 0.0  ;;  %vm4105_vm14 = vnez %v3967_v24  ;;  %vm4106_vm13 = vnez %v3969_v32 }
 0x4f3   :  { %1557 = vadd.xlane.f32.xlu2 %v1556_v9  ;;  %v1245_v53 = vmul.f32 %v1237_v51, %v4107_v18  ;;  %v1246_v61 = vmul.f32 %v1238_v48, %v4107_v18  ;;  %v1205_v41 = vadd.f32 %v1197_v26, %v1157_v54  ;;  %v1206_v6 = vadd.f32 %v1198_v23, %v1158_v29  ;;  %v4110_v9 = vld [vmem:[#allocation17_spill] sm:$0xff] }
 0x4f5   :  { %v1253_v38 = vadd.f32 %v1245_v53, %v1205_v41  ;;  %v1254_v17 = vadd.f32 %v1246_v61, %v1206_v6 }
 0x4f7   :  { %v1366_v33 = vpop.permute.xlu0 %1365 }
 0x4f8   :  { %v1270_v10 = vpop.permute.xlu1 %1269 }
 0x4f9   :  { %v1275_v55 = vsel %vm4101_vm12, %v3429_v62, %v1270_v10  ;;  %v1279_v1 = vsel %vm4102_vm15, %v1270_v10, %v3429_v62  ;;  %vm4108_vm12 = vcmp.lt.s32.totalorder %v2302_v27, 1 }
 0x4fa   :  { %v1264_v0 = vpop.permute.xlu2 %1263  ;;  %v1285_v21 = vsel %vm4105_vm14, %v1279_v1, 0.0  ;;  %v1286_v62 = vsel %vm4106_vm13, %v1275_v55, 0.0  ;;  %v1323_v44 = vsel %vm4108_vm12, %v1310_v5, %v1318_v13  ;;  %vm4109_vm15 = vmmov %vm4108_vm12  ;;  %vm4115_vm12 = vcmp.lt.s32.totalorder %v2302_v27, 127 }
 0x4fb   :  { %v1327_v50 = vsel %vm4109_vm15, %v1318_v13, %v1310_v5  ;;  %v1293_v10 = vmul.f32 %v1285_v21, %v4110_v9  ;;  %v1294_v39 = vmul.f32 %v1286_v62, %v4110_v9  ;;  %v1334_v1 = vsel %vm2333_vm3, %v1323_v44, 0.0  ;;  %v4113_v13 = vld [vmem:[#allocation15_spill] sm:$0xff] }
 0x4fc   :  { %v1333_v55 = vsel %vm2322_vm1, %v1327_v50, 0.0  ;;  %v1159_v5 = vmul.f32 %v3231_v7, %v4113_v13  ;;  %v1160_v26 = vmul.f32 %v4114_v58, %v4113_v13  ;;  %v4119_v21 = vld [vmem:[#allocation23_spill] sm:$0xff] }
 0x4fd   :  { %v1301_v23 = vadd.f32 %v1293_v10, %v1253_v38  ;;  %v1302_v51 = vadd.f32 %v1294_v39, %v1254_v17  ;;  %v1341_v62 = vmul.f32 %v1333_v55, %v4119_v21  ;;  %v1342_v18 = vmul.f32 %v1334_v1, %v4119_v21  ;;  %v4129_v17 = vld [vmem:[#allocation37_spill] sm:$0xff]  ;;  %v4130_v55 = vld [vmem:[#allocation24_spill] sm:$0xff] }
 0x4ff   :  { %v3493_v8 = vpop.permute.xlu0 %1453  ;;  %v1349_v44 = vadd.f32 %v1341_v62, %v1301_v23  ;;  %v1350_v50 = vadd.f32 %v1342_v18, %v1302_v51  ;;  %v4131_v51 = vld [vmem:[#allocation16_spill] sm:$0xff] }
 0x500   :  { %v1358_v42 = vpop.permute.xlu1 %1357 }
 0x501   :  { %v1371_v48 = vsel %vm4115_vm12, %v1358_v42, %v1366_v33 }
 0x502   :  { %v1320_v57 = vpop.permute.xlu2 %1319 }
 0x507   :  { %v1168_v63 = vpop.permute.xlu0 %1167 }
 0x508   :  { %v1414_v56 = vpop.permute.xlu1 %1413  ;;  %v1180_v12 = vsel %vm4111_vm10, %v1168_v63, %v1176_v36  ;;  %v1184_v20 = vsel %vm4112_vm7, %v1176_v36, %v1168_v63  ;;  %vm4116_vm10 = vmmov %vm4115_vm12  ;;  %vm4117_vm7 = vcmp.lt.s32.totalorder %v2302_v27, 16  ;;  %vm4120_vm12 = vcmp.lt.s32.totalorder %v2302_v27, 113 }
 0x509   :  { %v1375_v36 = vsel %vm4116_vm10, %v1366_v33, %v1358_v42  ;;  %v1191_v63 = vsel %vm2352_vm6, %v1184_v20, 0.0  ;;  %v1192_v22 = vsel %vm2363_vm8, %v1180_v12, 0.0  ;;  %vm4118_vm15 = vmmov %vm4117_vm7  ;;  %v1419_v33 = vsel %vm4120_vm12, %v1406_v3, %v1414_v56 }
 0x50a   :  { %vm4121_vm10 = vmmov %vm4120_vm12  ;;  %vm4122_vm6 = vnez %v3963_v15  ;;  %vm4123_vm8 = vnez %v3965_v28  ;;  %v1429_v9 = vsel %vm4070_vm11, %v1419_v33, 0.0  ;;  %vm4127_vm12 = vcmp.lt.s32.totalorder %v2302_v27, 112  ;;  %v1408_v60 = vpop.permute.xlu2 %1407 }
 0x50b   :  { %v1423_v4 = vsel %vm4121_vm10, %v1414_v56, %v1406_v3  ;;  %v1381_v43 = vsel %vm4122_vm6, %v1371_v48, 0.0  ;;  %v1382_v53 = vsel %vm4123_vm8, %v1375_v36, 0.0  ;;  %v1437_v48 = vmul.f32 %v1429_v9, %v4131_v51 }
 0x50c   :  { %v1430_v10 = vsel %vm4071_vm9, %v1423_v4, 0.0  ;;  %v1389_v12 = vmul.f32 %v1381_v43, %v4129_v17  ;;  %v1390_v20 = vmul.f32 %v1382_v53, %v4129_v17 }
 0x50e   :  { %v1398_v21 = vadd.f32 %v1390_v20, %v1350_v50 }
 0x50f   :  { %v1224_v2 = vpop.permute.xlu0 %1223 }
 0x510   :  { %v3501_v14 = vpop.permute.xlu1 %1501 }
 0x517   :  { %v1312_v25 = vpop.permute.xlu0 %1311 }
 0x518   :  { %v1216_v35 = vpop.permute.xlu1 %1215 }
 0x519   :  { %v1228_v7 = vsel %vm4117_vm7, %v1216_v35, %v1224_v2  ;;  %v1232_v54 = vsel %vm4118_vm15, %v1224_v2, %v1216_v35  ;;  %vm4124_vm7 = vcmp.lt.s32.totalorder %v2302_v27, 15  ;;  %v4126_v35 = vld [vmem:[#allocation13_spill] sm:$0xff] }
 0x51a   :  { %vm4125_vm15 = vmmov %vm4124_vm7  ;;  %v1199_v41 = vmul.f32 %v1191_v63, %v4126_v35  ;;  %v1200_v6 = vmul.f32 %v1192_v22, %v4126_v35  ;;  %v1239_v3 = vsel %vm2328_vm2, %v1232_v54, 0.0  ;;  %v1240_v56 = vsel %vm2339_vm4, %v1228_v7, 0.0 }
 0x51b   :  { %vm4128_vm2 = vmmov %vm4127_vm12  ;;  %v1247_v1 = vmul.f32 %v1239_v3, %v4130_v55  ;;  %v1248_v13 = vmul.f32 %v1240_v56, %v4130_v55  ;;  %vm4132_vm4 = vcmp.lt.s32.totalorder %v2302_v27, 1  ;;  %v1397_v54 = vadd.f32 %v1389_v12, %v1349_v44  ;;  %v1464_v44 = vpop.permute.xlu2 %1463 }
 0x51c   :  { %v1471_v30 = vsel %vm4128_vm2, %v3491_v11, %v3493_v8  ;;  %v1207_v58 = vadd.f32 %v1199_v41, %v1159_v5  ;;  %v1208_v23 = vadd.f32 %v1200_v6, %v1160_v26  ;;  %v1324_v24 = vsel %vm4132_vm4, %v1312_v25, %v1320_v57  ;;  %v4138_v6 = vld [vmem:[#allocation36_spill] sm:$0xff] }
 0x51d   :  { %v1478_v5 = vsel %vm2698_vm0, %v1471_v30, 0.0  ;;  %v4139_v30 = vld [vmem:[#allocation20_spill] sm:$0xff] }
 0x51e   :  { %v1255_v62 = vadd.f32 %v1247_v1, %v1207_v58  ;;  %v1256_v18 = vadd.f32 %v1248_v13, %v1208_v23  ;;  %v4146_v13 = vld [vmem:[#allocation27_spill] sm:$0xff] }
 0x51f   :  { %v1368_v29 = vpop.permute.xlu0 %1367 }
 0x520   :  { %v1272_v42 = vpop.permute.xlu1 %1271 }
 0x521   :  { %v1276_v2 = vsel %vm4124_vm7, %v1264_v0, %v1272_v42  ;;  %v1280_v61 = vsel %vm4125_vm15, %v1272_v42, %v1264_v0  ;;  %v1467_v0 = vsel %vm4127_vm12, %v3493_v8, %v3491_v11  ;;  %v1438_v11 = vmul.f32 %v1430_v10, %v4131_v51  ;;  %v4134_v8 = vld [vmem:[#allocation22_spill] sm:$0xff]  ;;  %vm4147_vm12 = vmmov %vm4128_vm2 }
 0x522   :  { %v1287_v39 = vsel %vm4105_vm14, %v1280_v61, 0.0  ;;  %v1288_v38 = vsel %vm4106_vm13, %v1276_v2, 0.0  ;;  %vm4133_vm14 = vmmov %vm4132_vm4  ;;  %v1477_v7 = vsel %vm2678_vm5, %v1467_v0, 0.0  ;;  %vm4135_vm13 = vcmp.lt.s32.totalorder %v2302_v27, 127  ;;  %v4137_v61 = vld [vmem:[#allocation31_spill] sm:$0xff] }
 0x523   :  { %v1328_v32 = vsel %vm4133_vm14, %v1320_v57, %v1312_v25  ;;  %v1295_v36 = vmul.f32 %v1287_v39, %v4134_v8  ;;  %v1296_v63 = vmul.f32 %v1288_v38, %v4134_v8  ;;  %v1336_v25 = vsel %vm2333_vm3, %v1324_v24, 0.0  ;;  %vm4136_vm10 = vmmov %vm4135_vm13  ;;  %v4148_v24 = vld [vmem:[#allocation19_spill] sm:$0xff] }
 0x524   :  { %v1335_v33 = vsel %vm2322_vm1, %v1328_v32, 0.0  ;;  %v1445_v42 = vadd.f32 %v1437_v48, %v1397_v54  ;;  %v1446_v43 = vadd.f32 %v1438_v11, %v1398_v21  ;;  %v1485_v35 = vmul.f32 %v1477_v7, %v4137_v61 }
 0x525   :  { %v1303_v53 = vadd.f32 %v1295_v36, %v1255_v62  ;;  %v1304_v2 = vadd.f32 %v1296_v63, %v1256_v18  ;;  %v1486_v41 = vmul.f32 %v1478_v5, %v4137_v61  ;;  %v1343_v16 = vmul.f32 %v1335_v33, %v4138_v6  ;;  %v4149_v5 = vld [vmem:[#allocation25_spill] sm:$0xff]  ;;  %v1504_v62 = vpop.permute.xlu2 %1503  ;;  %v4153_v61 = vld [vmem:[#allocation35_spill] sm:$0xff] }
 0x526   :  { %v1344_v3 = vmul.f32 %v1336_v25, %v4138_v6  ;;  %v1493_v10 = vadd.f32 %v1485_v35, %v1445_v42  ;;  %vm4140_vm1 = vcmp.lt.s32.totalorder %v2302_v27, 111  ;;  %vm4144_vm7 = vcmp.lt.s32.totalorder %v2302_v27, 113  ;;  %v4150_v25 = vld [vmem:[#allocation30_spill] sm:$0xff] }
 0x527   :  { %v1456_v22 = vpop.permute.xlu0 %1455  ;;  %v1494_v0 = vadd.f32 %v1486_v41, %v1446_v43  ;;  %vm4141_vm3 = vmmov %vm4140_vm1 }
 0x528   :  { %v1360_v26 = vpop.permute.xlu1 %1359  ;;  %v1352_v50 = vadd.f32 %v1344_v3, %v1304_v2  ;;  %vm4145_vm15 = vmmov %vm4144_vm7  ;;  %v1468_v48 = vsel %vm4147_vm12, %v1456_v22, %v1464_v44  ;;  %v1472_v11 = vsel %vm4128_vm2, %v1464_v44, %v1456_v22  ;;  %v4154_v3 = vld [vmem:[#allocation28_spill] sm:$0xff] }
 0x529   :  { %v1372_v57 = vsel %vm4135_vm13, %v1360_v26, %v1368_v29  ;;  %v1376_v4 = vsel %vm4136_vm10, %v1368_v29, %v1360_v26  ;;  %v1351_v29 = vadd.f32 %v1343_v16, %v1303_v53  ;;  %v1479_v40 = vsel %vm2678_vm5, %v1468_v48, 0.0  ;;  %vm4151_vm5 = vmmov %vm4140_vm1 }
 0x52a   :  { %v1383_v45 = vsel %vm4122_vm6, %v1372_v57, 0.0  ;;  %v1384_v56 = vsel %vm4123_vm8, %v1376_v4, 0.0  ;;  %vm4142_vm6 = vnez %v4017_v34  ;;  %vm4143_vm8 = vnez %v4021_v37 }
 0x52b   :  { %v1391_v39 = vmul.f32 %v1383_v45, %v4139_v30  ;;  %v1392_v38 = vmul.f32 %v1384_v56, %v4139_v30  ;;  %v1480_v47 = vsel %vm2698_vm0, %v1472_v11, 0.0  ;;  %v1487_v57 = vmul.f32 %v1479_v40, %v4150_v25  ;;  %vm4152_vm0 = vmmov %vm4140_vm1  ;;  %v1571_v30 = vld [vmem:[%s3805_s5 + $0x10] sm:$0xff]  ;;  %v1596_v40 = vld [vmem:[%s3807_s7 + $0x18] sm:$0xff] }
 0x52c   :  { %v1488_v46 = vmul.f32 %v1480_v47, %v4150_v25  ;;  %v1595_v47 = vld [vmem:[%s3807_s7 + $0x10] sm:$0xff] }
 0x52d   :  { %v1399_v63 = vadd.f32 %v1391_v39, %v1351_v29  ;;  %v1400_v7 = vadd.f32 %v1392_v38, %v1352_v50  ;;  %v1570_v50 = vld [vmem:[%s3805_s5 + $0x8] sm:$0xff] }
 0x52f   :  { %v1510_v9 = vpop.permute.xlu0 %1509 }
 0x530   :  { %v1515_v17 = vsel %vm4140_vm1, %v3501_v14, %v1510_v9  ;;  %v1519_v15 = vsel %vm4141_vm3, %v1510_v9, %v3501_v14  ;;  %v1416_v28 = vpop.permute.xlu1 %1415 }
 0x531   :  { %v1525_v12 = vsel %vm4142_vm6, %v1515_v17, 0.0  ;;  %v1526_v20 = vsel %vm4143_vm8, %v1519_v15, 0.0  ;;  %v1420_v55 = vsel %vm4144_vm7, %v1408_v60, %v1416_v28  ;;  %v1424_v1 = vsel %vm4145_vm15, %v1416_v28, %v1408_v60  ;;  %v1572_v28 = vld [vmem:[%s3805_s5 + $0x18] sm:$0xff] }
 0x532   :  { %v1533_v58 = vmul.f32 %v1525_v12, %v4146_v13  ;;  %v1534_v23 = vmul.f32 %v1526_v20, %v4146_v13  ;;  %v1431_v14 = vsel %vm4070_vm11, %v1420_v55, 0.0  ;;  %v1432_v51 = vsel %vm4071_vm9, %v1424_v1, 0.0 }
 0x533   :  { %v1439_v32 = vmul.f32 %v1431_v14, %v4148_v24  ;;  %v1440_v60 = vmul.f32 %v1432_v51, %v4148_v24  ;;  %vm4155_vm9 = vcmask 64512  }
 0x534   :  { %v1541_v8 = vadd.f32 %v1533_v58, %v1493_v10  ;;  %v1542_v36 = vadd.f32 %v1534_v23, %v1494_v0  ;;  %v1569_v0 = vld [vmem:[%s3805_s5] sm:$0xff]  ;;  %vm4156_vm11 = vmmov %vm4155_vm9 }
 0x535   :  { %v1447_v22 = vadd.f32 %v1439_v32, %v1399_v63  ;;  %v1448_v21 = vadd.f32 %v1440_v60, %v1400_v7  ;;  %vm4157_vm4 = vmmov %vm4155_vm9 }
 0x536   :  { %v3664_v26 = vadd.f32 %v1541_v8, %v4149_v5  ;;  %v3667_v54 = vadd.f32 %v1542_v36, %v4149_v5  ;;  %vm4158_vm14 = vmmov %vm4157_vm4  ;;  %v1590_v8 = vld [vmem:[%s3806_s6] sm:$0x1]  ;;  %v1594_v5 = vld [vmem:[%s3807_s7 + $0x8] sm:$0xff] }
 0x537   :  { %v1495_v53 = vadd.f32 %v1487_v57, %v1447_v22  ;;  %v1496_v2 = vadd.f32 %v1488_v46, %v1448_v21  ;;  %vm4159_vm13 = vmmov %vm4157_vm4  ;;  %v1593_v46 = vld [vmem:[%s3807_s7] sm:$0xff] }
 0x538   :  { %v1512_v18 = vpop.permute.xlu1 %1511  ;;  %v1559_v33 = vadd.f32 %v3667_v54, %v3664_v26  ;;  %vm4160_vm10 = vmmov %vm4157_vm4 }
 0x539   :  { %v1516_v31 = vsel %vm4151_vm5, %v1504_v62, %v1512_v18  ;;  %v1520_v4 = vsel %vm4152_vm0, %v1512_v18, %v1504_v62  ;;  %vm4161_vm1 = vmmov %vm4157_vm4 }
 0x53a   :  { %v1527_v42 = vsel %vm4142_vm6, %v1516_v31, 0.0  ;;  %v1528_v43 = vsel %vm4143_vm8, %v1520_v4, 0.0  ;;  %1560 = vadd.xlane.f32.xlu1 %v1559_v33  ;;  %vm4162_vm3 = vmmov %vm4161_vm1  ;;  %vm4167_vm6 = vcmask 261120  }
 0x53b   :  { %v1535_v35 = vmul.f32 %v1527_v42, %v4153_v61  ;;  %v1536_v41 = vmul.f32 %v1528_v43, %v4153_v61  ;;  %v1617_v42 = vld [vmem:[%s3808_s8 + $0x18] sm:$0xff]  ;;  %v1616_v43 = vld [vmem:[%s3808_s8 + $0x10] sm:$0xff]  ;;  %vm4168_vm8 = vmmov %vm4167_vm6 }
 0x53c   :  { %vm4169_vm7 = vmmov %vm4167_vm6 }
 0x53d   :  { %v1543_v6 = vadd.f32 %v1535_v35, %v1495_v53  ;;  %v1544_v16 = vadd.f32 %v1536_v41, %v1496_v2  ;;  %v1615_v53 = vld [vmem:[%s3808_s8 + $0x8] sm:$0xff]  ;;  %vm4170_vm15 = vmmov %vm4167_vm6 }
 0x53f   :  { %v3684_v45 = vadd.f32 %v1543_v6, %v4154_v3  ;;  %v3687_v27 = vadd.f32 %v1544_v16, %v4154_v3 }
 0x541   :  { %v1562_v34 = vadd.f32 %v3687_v27, %v3684_v45 }
 0x543   :  { %1563 = vadd.xlane.f32.xlu0 %v1562_v34 }
 0x55a   :  { %v1555_v56 = vpop.xlane.xlu0 %1554 }
 0x55b   :  { %v1565_v9 = vmul.f32 0.00390625, %v1555_v56 }
 0x55d   :  { %v1573_v38 = vmul.f32 %v1569_v0, %v1565_v9 }
 0x55f   :  { %v1577_v20 = vsel %vm4156_vm11, %v1573_v38, 0.0 }
 0x566   :  { %v1558_v37 = vpop.xlane.xlu2 %1557 }
 0x567   :  { %v1566_v44 = vmul.f32 0.00390625, %v1558_v37 }
 0x569   :  { %v1574_v39 = vmul.f32 %v1570_v50, %v1566_v44  ;;  %v1614_v50 = vld [vmem:[%s3808_s8] sm:$0xff] }
 0x56b   :  { %v1578_v15 = vsel %vm4155_vm9, %v1574_v39, 0.0 }
 0x56c   :  { %v1579_v13 = vadd.f32 %v1578_v15, %v1577_v20 }
 0x5ad   :  { %v1561_v29 = vpop.xlane.xlu1 %1560 }
 0x5ae   :  { %v1567_v10 = vmul.f32 0.00390625, %v1561_v29 }
 0x5b0   :  { %v1575_v17 = vmul.f32 %v1571_v30, %v1567_v10 }
 0x5b2   :  { %v1580_v55 = vsel %vm4157_vm4, %v1575_v17, 0.0 }
 0x5b3   :  { %v1581_v23 = vadd.f32 %v1580_v55, %v1579_v13  ;;  %v53_v55 = vld [vmem:[%s3810_s10] sm:$0xff]  ;;  %v54_v13 = vld [vmem:[%s3810_s10 + $0x8] sm:$0xff] }
 0x5b6   :  { %v1564_v12 = vpop.xlane.xlu0 %1563 }
 0x5b7   :  { %v1568_v1 = vmul.f32 0.00390625, %v1564_v12 }
 0x5b9   :  { %v1576_v58 = vmul.f32 %v1572_v28, %v1568_v1 }
 0x5bb   :  { %v1582_v14 = vsel %vm4158_vm14, %v1576_v58, 0.0 }
 0x5bc   :  { %v1583_v51 = vadd.f32 %v1582_v14, %v1581_v23  ;;  %v4163_v14 = vld [vmem:[#allocation34_spill] sm:$0xff] }
 0x5be   :  { %v1584_v48 = vrot.slane %v1583_v51, 4 }
 0x5c0   :  { %v1585_v11 = vadd.f32 %v1584_v48, %v1583_v51  ;;  %v4164_v48 = vld [vmem:[#allocation32_spill] sm:$0xff] }
 0x5c2   :  { %v1586_v24 = vrot.slane %v1585_v11, 2 }
 0x5c4   :  { %v1587_v32 = vadd.f32 %v1586_v24, %v1585_v11  ;;  %v1868_v24 = vld [vmem:[%s3800_s0 + $0x10] sm:$0xff] }
 0x5c6   :  { %v1588_v60 = vrot.slane %v1587_v32, 1 }
 0x5c8   :  { %v1589_v36 = vadd.f32 %v1588_v60, %v1587_v32  ;;  %v1869_v60 = vld [vmem:[%s3800_s0 + $0x18] sm:$0xff] }
 0x5ca   :  { %v1591_v63 = vadd.f32 %v1590_v8, %v1589_v36 }
 0x5cc   :  { %v1592_v7 = vmax.f32 %v1591_v63, 0.0 }
 0x5ce   :  { %v1597_v22 = vperm.slane %v1592_v7, 0 }
 0x5d0   :  { %v1601_v21 = vmul.f32 %v1597_v22, %v1596_v40  ;;  %v1600_v62 = vmul.f32 %v1597_v22, %v1595_v47  ;;  %v1599_v18 = vmul.f32 %v1597_v22, %v1594_v5  ;;  %v1598_v31 = vmul.f32 %v1597_v22, %v1593_v46 }
 0x5d2   :  { %v1611_v33 = vsel %vm4159_vm13, %v1601_v21, 0.0  ;;  %v1608_v25 = vsel %vm4160_vm10, %v1600_v62, 0.0  ;;  %v1605_v57 = vsel %vm4161_vm1, %v1599_v18, 0.0  ;;  %v1602_v4 = vsel %vm4162_vm3, %v1598_v31, 0.0 }
 0x5d3   :  { %1612 = vadd.xlane.f32.xlu2 %v1611_v33  ;;  %1609 = vadd.xlane.f32.xlu1 %v1608_v25 }
 0x5d4   :  { %1606 = vadd.xlane.f32.xlu0 %v1605_v57 }
 0x5db   :  { %1603 = vadd.xlane.f32.xlu2 %v1602_v4 }
 0x646   :  { %v1613_v2 = vpop.xlane.xlu2 %1612  ;;  %v1610_v61 = vpop.xlane.xlu1 %1609 }
 0x647   :  { %v1621_v35 = vadd.f32 %v1617_v42, %v1613_v2  ;;  %v1620_v41 = vadd.f32 %v1616_v43, %v1610_v61  ;;  %v1607_v6 = vpop.xlane.xlu0 %1606 }
 0x648   :  { %v1619_v16 = vadd.f32 %v1615_v53, %v1607_v6 }
 0x649   :  { %v1625_v3 = vadd.f32 3.0, %v1621_v35  ;;  %v1624_v34 = vadd.f32 3.0, %v1620_v41 }
 0x64a   :  { %v1623_v37 = vadd.f32 3.0, %v1619_v16  ;;  %v4165_v16 = vld [vmem:[#allocation29_spill] sm:$0xff] }
 0x64b   :  { %v1629_v56 = vmax.f32 %v1625_v3, 0.0  ;;  %v1628_v44 = vmax.f32 %v1624_v34, 0.0  ;;  %v4166_v3 = vld [vmem:[#allocation26_spill] sm:$0xff] }
 0x64c   :  { %v1627_v29 = vmax.f32 %v1623_v37, 0.0 }
 0x64d   :  { %v1633_v9 = vmin.f32 %v1629_v56, 6.0  ;;  %v1632_v10 = vmin.f32 %v1628_v44, 6.0 }
 0x64e   :  { %v1631_v0 = vmin.f32 %v1627_v29, 6.0  ;;  %v1604_v30 = vpop.xlane.xlu2 %1603 }
 0x64f   :  { %v1637_v39 = vmul.f32 0.16666667, %v1633_v9  ;;  %v1636_v38 = vmul.f32 0.16666667, %v1632_v10  ;;  %v1618_v17 = vadd.f32 %v1614_v50, %v1604_v30  ;;  %v1870_v9 = vld [vmem:[%s3800_s0] sm:$0xff] }
 0x650   :  { %v1635_v15 = vmul.f32 0.16666667, %v1631_v0  ;;  %v1871_v0 = vld [vmem:[%s3800_s0 + $0x8] sm:$0xff] }
 0x651   :  { %v1622_v28 = vadd.f32 3.0, %v1618_v17  ;;  %1655 = vperm.xlu1 %1862, %v1637_v39   ;;  %1650 = vperm.xlu0 %1861, %v1636_v38  }
 0x652   :  { %1645 = vperm.xlu2 %1863, %v1635_v15  }
 0x653   :  { %v1626_v12 = vmax.f32 %v1622_v28, 0.0 }
 0x655   :  { %v1630_v20 = vmin.f32 %v1626_v12, 6.0 }
 0x657   :  { %v1634_v1 = vmul.f32 0.16666667, %v1630_v20 }
 0x659   :  { %981 = vperm.xlu1 %1862, %v53_v55   ;;  %1640 = vperm.xlu0 %1861, %v1634_v1  }
 0x65a   :  { %986 = vperm.xlu2 %1863, %v54_v13  }
 0x6ac   :  { %v1646_v58 = vpop.permute.xlu2 %1645 }
 0x6ad   :  { %v1660_v36 = vmul.f32 %v1646_v58, %v3484_v52  ;;  %v1661_v63 = vmul.f32 %v1646_v58, %v3487_v59 }
 0x6af   :  { %v1668_v7 = vadd.f32 3.0, %v1660_v36  ;;  %v1669_v40 = vadd.f32 3.0, %v1661_v63 }
 0x6b1   :  { %v1676_v47 = vmax.f32 %v1668_v7, 0.0  ;;  %v1677_v52 = vmax.f32 %v1669_v40, 0.0  ;;  %v1874_v40 = vld [vmem:[%s3800_s0 + $0x20] sm:$0xff] }
 0x6b3   :  { %v1684_v4 = vmin.f32 %v1676_v47, 6.0 }
 0x6b4   :  { %v3744_v23 = vpop.permute.xlu2 %986 }
 0x6b5   :  { %v1017_v51 = vadd.f32 %v4163_v14, %v3744_v23  ;;  %v1040_v11 = vadd.f32 %v4164_v48, %v3744_v23  ;;  %v1692_v6 = vmul.f32 0.16666667, %v1684_v4 }
 0x6b7   :  { %v1044_v32 = vadd.f32 %v1868_v24, %v1017_v51  ;;  %v1045_v8 = vadd.f32 %v1869_v60, %v1040_v11  ;;  %v1700_v58 = vmul.f32 %v1692_v6, %v1660_v36  ;;  %v1873_v60 = vld [vmem:[%s3809_s9 + $0x8] sm:$0xff] }
 0x6b9   :  { %1048 = vst [vmem:[#allocation2 + $0x10] sm:$0xff] %v1044_v32  ;;  %v1872_v32 = vld [vmem:[%s3809_s9] sm:$0xff] }
 0x6ba   :  { %1049 = vst [vmem:[#allocation2 + $0x18] sm:$0xff] %v1045_v8 }
 0x6c3   :  { %v1656_v5 = vpop.permute.xlu1 %1655  ;;  %v1651_v22 = vpop.permute.xlu0 %1650 }
 0x6c4   :  { %v1664_v21 = vmul.f32 %v1656_v5, %v3684_v45  ;;  %v1665_v62 = vmul.f32 %v1656_v5, %v3687_v27  ;;  %v1662_v18 = vmul.f32 %v1651_v22, %v3664_v26  ;;  %v1663_v33 = vmul.f32 %v1651_v22, %v3667_v54  ;;  %v1875_v5 = vld [vmem:[%s3800_s0 + $0x28] sm:$0xff] }
 0x6c5   :  { %v1685_v26 = vmin.f32 %v1677_v52, 6.0 }
 0x6c6   :  { %v1672_v25 = vadd.f32 3.0, %v1664_v21  ;;  %v1673_v57 = vadd.f32 3.0, %v1665_v62  ;;  %v1670_v46 = vadd.f32 3.0, %v1662_v18  ;;  %v1671_v31 = vadd.f32 3.0, %v1663_v33 }
 0x6c7   :  { %v1693_v28 = vmul.f32 0.16666667, %v1685_v26 }
 0x6c8   :  { %v1680_v59 = vmax.f32 %v1672_v25, 0.0  ;;  %v1681_v42 = vmax.f32 %v1673_v57, 0.0  ;;  %v1678_v43 = vmax.f32 %v1670_v46, 0.0  ;;  %v1679_v53 = vmax.f32 %v1671_v31, 0.0  ;;  %v1876_v25 = vld [vmem:[%s3800_s0 + $0x30] sm:$0xff]  ;;  %v1877_v46 = vld [vmem:[%s3800_s0 + $0x38] sm:$0xff] }
 0x6c9   :  { %v1701_v14 = vmul.f32 %v1693_v28, %v1661_v63 }
 0x6ca   :  { %v1688_v2 = vmin.f32 %v1680_v59, 6.0  ;;  %v1689_v61 = vmin.f32 %v1681_v42, 6.0  ;;  %v1686_v35 = vmin.f32 %v1678_v43, 6.0  ;;  %v1687_v27 = vmin.f32 %v1679_v53, 6.0 }
 0x6cb   :  { %v982_v45 = vpop.permute.xlu1 %981  ;;  %v1641_v41 = vpop.permute.xlu0 %1640 }
 0x6cc   :  { %v1014_v54 = vadd.f32 %v4165_v16, %v982_v45  ;;  %v1037_v34 = vadd.f32 %v4166_v3, %v982_v45  ;;  %v1658_v37 = vmul.f32 %v1641_v41, %v3438_v19  ;;  %v1659_v56 = vmul.f32 %v1641_v41, %v3441_v49 }
 0x6cd   :  { %v1696_v44 = vmul.f32 0.16666667, %v1688_v2  ;;  %v1697_v29 = vmul.f32 0.16666667, %v1689_v61  ;;  %v1694_v50 = vmul.f32 0.16666667, %v1686_v35 }
 0x6ce   :  { %v1042_v10 = vadd.f32 %v1870_v9, %v1014_v54  ;;  %v1043_v30 = vadd.f32 %v1871_v0, %v1037_v34  ;;  %v1666_v39 = vadd.f32 3.0, %v1658_v37  ;;  %v1667_v38 = vadd.f32 3.0, %v1659_v56 }
 0x6cf   :  { %v1704_v17 = vmul.f32 %v1696_v44, %v1664_v21  ;;  %v1705_v15 = vmul.f32 %v1697_v29, %v1665_v62  ;;  %v1695_v19 = vmul.f32 0.16666667, %v1687_v27  ;;  %v1702_v20 = vmul.f32 %v1694_v50, %v1662_v18 }
 0x6d0   :  { %1046 = vst [vmem:[#allocation2] sm:$0xff] %v1042_v10  ;;  %v1674_v49 = vmax.f32 %v1666_v39, 0.0  ;;  %v1675_v12 = vmax.f32 %v1667_v38, 0.0 }
 0x6d1   :  { %1047 = vst [vmem:[#allocation2 + $0x8] sm:$0xff] %v1043_v30  ;;  %1718 = vmatpush.msrb.mxu0 %v1704_v17  ;;  %1741 = vmatpush.msrb.mxu1 %v1705_v15  ;;  %v1703_v55 = vmul.f32 %v1695_v19, %v1663_v33 }
 0x6d2   :  { %v1682_v1 = vmin.f32 %v1674_v49, 6.0  ;;  %v1683_v13 = vmin.f32 %v1675_v12, 6.0 }
 0x6d3   :  { %1719 = vmatpush.msrb.mxu0 %v1702_v20  ;;  %1742 = vmatpush.msrb.mxu1 %v1703_v55 }
 0x6d4   :  { %v1690_v51 = vmul.f32 0.16666667, %v1682_v1  ;;  %v1691_v48 = vmul.f32 0.16666667, %v1683_v13 }
 0x6d5   :  { %1720 = vmatpush.msrb.mxu0 %v1700_v58  ;;  %1743 = vmatpush.msrb.mxu1 %v1701_v14 }
 0x6d6   :  { %v1698_v11 = vmul.f32 %v1690_v51, %v1658_v37  ;;  %v1699_v24 = vmul.f32 %v1691_v48, %v1659_v56 }
 0x6d8   :  { %1721 = vmatpush.msrb.mxu0 %v1698_v11  ;;  %1744 = vmatpush.msrb.mxu1 %v1699_v24 }
 0x6d9   :  { %1803 = vmatmul.msk.f32.vlgmr.msrb.gmra.mxu0 %vm4167_vm6, %v1872_v32  ;;  %1805 = vmatmul.msk.f32.vlgmr.msrb.gmra.mxu1 %vm4168_vm8, %v1872_v32 }
 0x6e1   :  { %1804 = vmatmul.msk.f32.gmra.mxu0 %vm4169_vm7, %v1873_v60  ;;  %1806 = vmatmul.msk.f32.gmra.mxu1 %vm4170_vm15, %v1873_v60 }
 0x756   :  { %v1723_v8 = vpop.f32.mrf.mxu0  ;;  %v1746_v36 = vpop.f32.mrf.mxu1 }
 0x757   :  { %v1724_v63 = vadd.f32 %v1723_v8, %v982_v45  ;;  %v1747_v7 = vadd.f32 %v1746_v36, %v982_v45 }
 0x759   :  { %v1752_v47 = vadd.f32 %v1874_v40, %v1724_v63  ;;  %v1753_v22 = vadd.f32 %v1875_v5, %v1747_v7 }
 0x75b   :  { %1757 = vst [vmem:[#allocation2 + $0x20] sm:$0xff] %v1752_v47 }
 0x75c   :  { %1758 = vst [vmem:[#allocation2 + $0x28] sm:$0xff] %v1753_v22 }
 0x75e   :  { %v1726_v21 = vpop.f32.mrf.mxu0  ;;  %v1749_v62 = vpop.f32.mrf.mxu1 }
 0x75f   :  { %v1727_v18 = vadd.f32 %v1726_v21, %v3744_v23  ;;  %v1750_v33 = vadd.f32 %v1749_v62, %v3744_v23 }
 0x761   :  { %v1754_v57 = vadd.f32 %v1876_v25, %v1727_v18  ;;  %v1755_v31 = vadd.f32 %v1877_v46, %v1750_v33 }
 0x763   :  { %1759 = vst [vmem:[#allocation2 + $0x30] sm:$0xff] %v1754_v57 }
 0x764   :  { %1760 = vst [vmem:[#allocation2 + $0x38] sm:$0xff] %v1755_v31 }
 0x765   :  { %1773 = dma.vmem_to_hbm [thread:$0]  %s1766_s25, 1024, %s1768_s4, [#allocation3], %s1922_s11, %s1922_s11, %s1911_s30  }
 0x766   :  { %1902 = dma.done.wait [#allocation3], 1024  }
 0x767   :  { %1903 = vsyncadd [#allocation3], 4294966272 }
 0x768   :  { %1778 = vsyncpa [#allocation3], 1 }

</bundles_post_ra>
